<compile_context>
chip_gen: v7x
topology: tpu7x:2x2x1
jax: 0.10.0
libtpu: 0.0.40
codegen_flags: <defaults>
</compile_context>

<pallas_src>
import functools
import math

import numpy as np

import jax
import jax.numpy as jnp
from jax.experimental import pallas as pl
from jax.experimental.pallas import tpu as pltpu

_INV_SQRT2 = 0.7071067811865475
_SQRT_2_OVER_PI = 0.7978845608028654


def _round_up(x, m):
    return -(-x // m) * m


def conv_pe_kernel(xm_ref, xh_ref, w_ref, b_ref, o_ref, *,
                   n_taps, n_groups, cg, approximate_gelu):
    # xm_ref: (T_TILE, C)     main input tile (rows [t*T_TILE, (t+1)*T_TILE) of padded input)
    # xh_ref: (H, C)          halo tile       (rows [(t+1)*T_TILE, (t+1)*T_TILE + H))
    # w_ref : (G, K*Cg, Cg)   folded grouped weight, row index = k*Cg + ci (resident, fetched once)
    # b_ref : (1, C)          bias (f32, lane-dense)
    # o_ref : (T_TILE, C)     output tile (lane-dense store)
    t_tile = o_ref.shape[0]

    # Stitch the halo onto the main tile: rows [0, T_TILE + H) of this tile's input window.
    x_ext = jnp.concatenate([xm_ref[...], xh_ref[...]], axis=0)        # (T_TILE+H, C)

    outs = []
    for g in range(n_groups):
        # One lane slice per group, then im2col over taps -> a single folded MXU contraction
        # of depth n_taps * Cg for this group's output channels.
        x_g = x_ext[:, g * cg:(g + 1) * cg]                            # (T_TILE+H, Cg)
        x_taps = jnp.concatenate(
            [x_g[k:k + t_tile, :] for k in range(n_taps)], axis=1)     # (T_TILE, K*Cg)
        outs.append(jnp.dot(x_taps, w_ref[g],
                            preferred_element_type=jnp.float32))       # (T_TILE, Cg) f32

    acc = outs[0] if n_groups == 1 else jnp.concatenate(outs, axis=1)  # (T_TILE, C) f32
    acc = acc + b_ref[...].astype(jnp.float32)

    if approximate_gelu:
        # tanh-approx GELU: transcendental goes to the EUP slot (v6e/v7x option).
        inner = _SQRT_2_OVER_PI * (acc + 0.044715 * acc * acc * acc)
        y = 0.5 * acc * (1.0 + jnp.tanh(inner))
    else:
        # exact GELU (matches torch.nn.GELU(approximate='none'))
        y = 0.5 * acc * (1.0 + jax.lax.erf(acc * _INV_SQRT2))

    o_ref[...] = y.astype(o_ref.dtype)


def conv_positional_encoding(x, w_folded, bias_c, d_conv, g_conv, *,
                             t_tile=256, compute_dtype=None, approximate_gelu=False):
    """x: (B, T, C). w_folded: (G, K*Cg, Cg). bias_c: (C,) f32. Returns (B, T, C)."""
    B, T, C = x.shape
    K = int(d_conv)
    G = int(g_conv)
    assert C % G == 0
    Cg = C // G
    assert w_folded.shape == (G, K * Cg, Cg)
    pad = K // 2
    cdt = jnp.dtype(compute_dtype) if compute_dtype is not None else x.dtype

    # Halo size: multiple of 8 sublanes, >= K-1, and dividing the time tile.
    H = max(8, _round_up(max(K - 1, 1), 8))
    tt = max(8, min(int(t_tile), _round_up(T, 8)))
    tt = _round_up(tt, H)
    nT = -(-T // tt)
    Tp = nT * tt          # padded output length (extra rows are discarded)
    L = Tp + H            # padded input length (front pad + data + zero tail incl. halo)

    # Zero-pad the time axis only: `pad` leading zeros, zeros to length L.  No group transpose.
    xg = jnp.pad(x, ((0, 0), (pad, L - pad - T), (0, 0))).astype(cdt)
    wf = w_folded.astype(cdt)
    b2 = bias_c.reshape(1, C).astype(jnp.float32)

    kernel = functools.partial(conv_pe_kernel, n_taps=K, n_groups=G, cg=Cg,
                               approximate_gelu=approximate_gelu)

    out = pl.pallas_call(
        kernel,
        out_shape=jax.ShapeDtypeStruct((B, Tp, C), cdt),
        grid=(B, nT),
        in_specs=[
            # main time tile (lane-dense: full C on lanes)
            pl.BlockSpec((None, tt, C), lambda b, t: (b, t, 0)),
            # halo tile: starts exactly at the end of the main tile ((t+1)*tt is a multiple of H)
            pl.BlockSpec((None, H, C), lambda b, t: (b, (t + 1) * (tt // H), 0)),
            # whole folded grouped weight: constant block index -> fetched once, stays resident
            pl.BlockSpec((G, K * Cg, Cg), lambda b, t: (0, 0, 0)),
            # bias (f32, lane-dense)
            pl.BlockSpec((1, C), lambda b, t: (0, 0)),
        ],
        out_specs=pl.BlockSpec((None, tt, C), lambda b, t: (b, t, 0)),
        compiler_params=pltpu.CompilerParams(
            dimension_semantics=("parallel", "parallel")),
    )(xg, xg, wf, b2)

    # (B, Tp, C) -> (B, T, C): drop the tail-padding rows (also implements SamePad for even K).
    return out[:, :T, :]


def build_params(key, d_model, d_conv, g_conv):
    """Deterministic init mirroring the PyTorch module. Returns torch-layout (w, bias)."""
    C, K, G = d_model, d_conv, g_conv
    Cg = C // G
    std = math.sqrt(4.0 / (K * C))
    # Conv1d weight v: (out_channels, in_channels/groups, kernel) ~ N(0, std^2)
    v = std * jax.random.normal(key, (C, Cg, K), dtype=jnp.float32)
    # weight_norm(name='weight', dim=2): w = g_param * v / ||v[:,:,k]||; at init g_param=||v||.
    norm = jnp.sqrt(jnp.sum(v * v, axis=(0, 1), keepdims=True))      # (1, 1, K)
    g_param = norm                                                    # replace with trained g if any
    w = v * (g_param / norm)                                          # (C, Cg, K)
    bias_c = jnp.zeros((C,), dtype=jnp.float32)
    return w, bias_c


def fold_params(w, g_conv):
    """(C, Cg, K) torch-layout grouped weight -> (G, K*Cg, Cg) folded, row index = k*Cg + ci."""
    C, Cg, K = w.shape
    G = g_conv
    wr = w.reshape(G, Cg, Cg, K)              # (G, co_local, ci, K)
    wf = jnp.transpose(wr, (0, 3, 2, 1))      # (G, K, ci, co_local)
    return wf.reshape(G, K * Cg, Cg)


def ref_forward(x, w, bias_c, d_conv, g_conv):
    """Pure-JAX reference: grouped Conv1d (+SamePad) + exact GELU, channels-last."""
    K = d_conv
    pad = K // 2
    T = x.shape[1]
    y = jax.lax.conv_general_dilated(
        x.astype(jnp.float32), w.astype(jnp.float32),
        window_strides=(1,), padding=[(pad, pad)],
        dimension_numbers=("NWC", "OIW", "NWC"),
        feature_group_count=g_conv,
        precision=jax.lax.Precision.HIGHEST)
    y = y[:, :T, :] + bias_c[None, None, :]     # [:T] == SamePad trim for even K
    return 0.5 * y * (1.0 + jax.lax.erf(y * _INV_SQRT2))


if __name__ == "__main__":
    key = jax.random.PRNGKey(0)
    k_w, k_x, k2_w, k2_x = jax.random.split(key, 4)

    # Config 1: lane-dense channels (C multiple of 128), multi-tile T, even d_conv (SamePad trims).
    B, T, d_model, d_conv, g_conv = 2, 512, 128, 4, 4
    w, bias_c = build_params(k_w, d_model, d_conv, g_conv)
    w_folded = fold_params(w, g_conv)
    x = jax.random.normal(k_x, (B, T, d_model), dtype=jnp.float32)

    out = jax.block_until_ready(
        conv_positional_encoding(x, w_folded, bias_c, d_conv, g_conv, t_tile=256))
    ref = jax.block_until_ready(ref_forward(x, w, bias_c, d_conv, g_conv))
    assert out.shape == (B, T, d_model)
    np.testing.assert_allclose(np.asarray(out), np.asarray(ref), rtol=1e-4, atol=1e-4)

    # Config 1, bf16 compute (v6e/v7x path) with tanh-approx GELU epilogue.
    out_bf16 = jax.block_until_ready(
        conv_positional_encoding(x, w_folded, bias_c, d_conv, g_conv, t_tile=256,
                                 compute_dtype=jnp.bfloat16, approximate_gelu=True))
    np.testing.assert_allclose(np.asarray(out_bf16.astype(jnp.float32)), np.asarray(ref),
                               rtol=5e-2, atol=5e-2)

    # Config 2: odd d_conv (no SamePad trim), ragged T (not a multiple of the time tile), 2 groups.
    B2, T2, C2, K2, G2 = 1, 100, 64, 5, 2
    w2, b2_c = build_params(k2_w, C2, K2, G2)
    w2_folded = fold_params(w2, G2)
    x2 = jax.random.normal(k2_x, (B2, T2, C2), dtype=jnp.float32)
    out2 = jax.block_until_ready(
        conv_positional_encoding(x2, w2_folded, b2_c, K2, G2, t_tile=64))
    ref2 = jax.block_until_ready(ref_forward(x2, w2, b2_c, K2, G2))
    assert out2.shape == (B2, T2, C2)
    np.testing.assert_allclose(np.asarray(out2), np.asarray(ref2), rtol=1e-4, atol=1e-4)

    print("KERNEL_OK")
</pallas_src>

<mosaic_0001>
module attributes {stable_mosaic.version = 11 : i64} {
  func.func @conv_pe_kernel(%arg0: i32, %arg1: i32, %arg2: memref<1x256x128xf32, #tpu.memory_space<vmem>>, %arg3: memref<1x8x128xf32, #tpu.memory_space<vmem>>, %arg4: memref<4x128x32xf32, #tpu.memory_space<vmem>>, %arg5: memref<1x128xf32, #tpu.memory_space<vmem>>, %arg6: memref<1x256x128xf32, #tpu.memory_space<vmem>>) attributes {dimension_semantics = [#tpu.dimension_semantics<parallel>, #tpu.dimension_semantics<parallel>], iteration_bounds = array<i64: 2, 2>, scalar_prefetch = 0 : i64, scratch_operands = 0 : i64, tpu.core_type = #tpu.core_type<tc>, window_params = [{transform_indices = @transform_0, window_bounds = array<i64: 1, 256, 128>}, {transform_indices = @transform_1, window_bounds = array<i64: 1, 8, 128>}, {pipeline_mode = #tpu.pipeline_mode<synchronous>, transform_indices = @transform_2, window_bounds = array<i64: 4, 128, 32>}, {pipeline_mode = #tpu.pipeline_mode<synchronous>, transform_indices = @transform_3, window_bounds = array<i64: 1, 128>}, {transform_indices = @transform_4, window_bounds = array<i64: 1, 256, 128>}]} {
    %c0 = arith.constant 0 : index
    %c0_0 = arith.constant 0 : index
    %c0_1 = arith.constant 0 : index
    %0 = vector.load %arg2[%c0, %c0_0, %c0_1] : memref<1x256x128xf32, #tpu.memory_space<vmem>>, vector<1x256x128xf32>
    %1 = vector.shape_cast %0 : vector<1x256x128xf32> to vector<256x128xf32>
    %c0_2 = arith.constant 0 : index
    %c0_3 = arith.constant 0 : index
    %c0_4 = arith.constant 0 : index
    %2 = vector.load %arg3[%c0_2, %c0_3, %c0_4] : memref<1x8x128xf32, #tpu.memory_space<vmem>>, vector<1x8x128xf32>
    %3 = vector.shape_cast %2 : vector<1x8x128xf32> to vector<8x128xf32>
    %4 = tpu.concatenate %1, %3 in 0 : vector<256x128xf32>, vector<8x128xf32> -> vector<264x128xf32>
    %5 = vector.extract_strided_slice %4 {offsets = [0, 0], sizes = [264, 32], strides = [1, 1]} : vector<264x128xf32> to vector<264x32xf32>
    %6 = vector.extract_strided_slice %5 {offsets = [0, 0], sizes = [256, 32], strides = [1, 1]} : vector<264x32xf32> to vector<256x32xf32>
    %7 = vector.extract_strided_slice %5 {offsets = [1, 0], sizes = [256, 32], strides = [1, 1]} : vector<264x32xf32> to vector<256x32xf32>
    %8 = vector.extract_strided_slice %5 {offsets = [2, 0], sizes = [256, 32], strides = [1, 1]} : vector<264x32xf32> to vector<256x32xf32>
    %9 = vector.extract_strided_slice %5 {offsets = [3, 0], sizes = [256, 32], strides = [1, 1]} : vector<264x32xf32> to vector<256x32xf32>
    %10 = tpu.concatenate %6, %7, %8, %9 in 1 : vector<256x32xf32>, vector<256x32xf32>, vector<256x32xf32>, vector<256x32xf32> -> vector<256x128xf32>
    %c0_5 = arith.constant 0 : index
    %c0_6 = arith.constant 0 : index
    %c0_7 = arith.constant 0 : index
    %11 = vector.load %arg4[%c0_5, %c0_6, %c0_7] : memref<4x128x32xf32, #tpu.memory_space<vmem>>, vector<1x128x32xf32>
    %12 = vector.shape_cast %11 : vector<1x128x32xf32> to vector<128x32xf32>
    %cst = arith.constant dense<0.000000e+00> : vector<256x32xf32>
    %13 = tpu.matmul %10, %12, %cst {dimension_numbers = #tpu.dot_dimension_numbers<[1], [0], [0], [1], [0, 0, 1, 1], [], []>} : vector<256x128xf32>, vector<128x32xf32>, vector<256x32xf32> -> vector<256x32xf32>
    %14 = vector.extract_strided_slice %4 {offsets = [0, 32], sizes = [264, 32], strides = [1, 1]} : vector<264x128xf32> to vector<264x32xf32>
    %15 = vector.extract_strided_slice %14 {offsets = [0, 0], sizes = [256, 32], strides = [1, 1]} : vector<264x32xf32> to vector<256x32xf32>
    %16 = vector.extract_strided_slice %14 {offsets = [1, 0], sizes = [256, 32], strides = [1, 1]} : vector<264x32xf32> to vector<256x32xf32>
    %17 = vector.extract_strided_slice %14 {offsets = [2, 0], sizes = [256, 32], strides = [1, 1]} : vector<264x32xf32> to vector<256x32xf32>
    %18 = vector.extract_strided_slice %14 {offsets = [3, 0], sizes = [256, 32], strides = [1, 1]} : vector<264x32xf32> to vector<256x32xf32>
    %19 = tpu.concatenate %15, %16, %17, %18 in 1 : vector<256x32xf32>, vector<256x32xf32>, vector<256x32xf32>, vector<256x32xf32> -> vector<256x128xf32>
    %c1 = arith.constant 1 : index
    %c0_8 = arith.constant 0 : index
    %c0_9 = arith.constant 0 : index
    %20 = vector.load %arg4[%c1, %c0_8, %c0_9] : memref<4x128x32xf32, #tpu.memory_space<vmem>>, vector<1x128x32xf32>
    %21 = vector.shape_cast %20 : vector<1x128x32xf32> to vector<128x32xf32>
    %cst_10 = arith.constant dense<0.000000e+00> : vector<256x32xf32>
    %22 = tpu.matmul %19, %21, %cst_10 {dimension_numbers = #tpu.dot_dimension_numbers<[1], [0], [0], [1], [0, 0, 1, 1], [], []>} : vector<256x128xf32>, vector<128x32xf32>, vector<256x32xf32> -> vector<256x32xf32>
    %23 = vector.extract_strided_slice %4 {offsets = [0, 64], sizes = [264, 32], strides = [1, 1]} : vector<264x128xf32> to vector<264x32xf32>
    %24 = vector.extract_strided_slice %23 {offsets = [0, 0], sizes = [256, 32], strides = [1, 1]} : vector<264x32xf32> to vector<256x32xf32>
    %25 = vector.extract_strided_slice %23 {offsets = [1, 0], sizes = [256, 32], strides = [1, 1]} : vector<264x32xf32> to vector<256x32xf32>
    %26 = vector.extract_strided_slice %23 {offsets = [2, 0], sizes = [256, 32], strides = [1, 1]} : vector<264x32xf32> to vector<256x32xf32>
    %27 = vector.extract_strided_slice %23 {offsets = [3, 0], sizes = [256, 32], strides = [1, 1]} : vector<264x32xf32> to vector<256x32xf32>
    %28 = tpu.concatenate %24, %25, %26, %27 in 1 : vector<256x32xf32>, vector<256x32xf32>, vector<256x32xf32>, vector<256x32xf32> -> vector<256x128xf32>
    %c2 = arith.constant 2 : index
    %c0_11 = arith.constant 0 : index
    %c0_12 = arith.constant 0 : index
    %29 = vector.load %arg4[%c2, %c0_11, %c0_12] : memref<4x128x32xf32, #tpu.memory_space<vmem>>, vector<1x128x32xf32>
    %30 = vector.shape_cast %29 : vector<1x128x32xf32> to vector<128x32xf32>
    %cst_13 = arith.constant dense<0.000000e+00> : vector<256x32xf32>
    %31 = tpu.matmul %28, %30, %cst_13 {dimension_numbers = #tpu.dot_dimension_numbers<[1], [0], [0], [1], [0, 0, 1, 1], [], []>} : vector<256x128xf32>, vector<128x32xf32>, vector<256x32xf32> -> vector<256x32xf32>
    %32 = vector.extract_strided_slice %4 {offsets = [0, 96], sizes = [264, 32], strides = [1, 1]} : vector<264x128xf32> to vector<264x32xf32>
    %33 = vector.extract_strided_slice %32 {offsets = [0, 0], sizes = [256, 32], strides = [1, 1]} : vector<264x32xf32> to vector<256x32xf32>
    %34 = vector.extract_strided_slice %32 {offsets = [1, 0], sizes = [256, 32], strides = [1, 1]} : vector<264x32xf32> to vector<256x32xf32>
    %35 = vector.extract_strided_slice %32 {offsets = [2, 0], sizes = [256, 32], strides = [1, 1]} : vector<264x32xf32> to vector<256x32xf32>
    %36 = vector.extract_strided_slice %32 {offsets = [3, 0], sizes = [256, 32], strides = [1, 1]} : vector<264x32xf32> to vector<256x32xf32>
    %37 = tpu.concatenate %33, %34, %35, %36 in 1 : vector<256x32xf32>, vector<256x32xf32>, vector<256x32xf32>, vector<256x32xf32> -> vector<256x128xf32>
    %c3 = arith.constant 3 : index
    %c0_14 = arith.constant 0 : index
    %c0_15 = arith.constant 0 : index
    %38 = vector.load %arg4[%c3, %c0_14, %c0_15] : memref<4x128x32xf32, #tpu.memory_space<vmem>>, vector<1x128x32xf32>
    %39 = vector.shape_cast %38 : vector<1x128x32xf32> to vector<128x32xf32>
    %cst_16 = arith.constant dense<0.000000e+00> : vector<256x32xf32>
    %40 = tpu.matmul %37, %39, %cst_16 {dimension_numbers = #tpu.dot_dimension_numbers<[1], [0], [0], [1], [0, 0, 1, 1], [], []>} : vector<256x128xf32>, vector<128x32xf32>, vector<256x32xf32> -> vector<256x32xf32>
    %41 = tpu.concatenate %13, %22, %31, %40 in 1 : vector<256x32xf32>, vector<256x32xf32>, vector<256x32xf32>, vector<256x32xf32> -> vector<256x128xf32>
    %c0_17 = arith.constant 0 : index
    %c0_18 = arith.constant 0 : index
    %42 = vector.load %arg5[%c0_17, %c0_18] : memref<1x128xf32, #tpu.memory_space<vmem>>, vector<1x128xf32>
    %43 = vector.broadcast %42 : vector<1x128xf32> to vector<256x128xf32>
    %44 = arith.addf %41, %43 : vector<256x128xf32>
    %cst_19 = arith.constant 5.000000e-01 : f32
    %45 = vector.broadcast %cst_19 : f32 to vector<256x128xf32>
    %46 = arith.mulf %45, %44 : vector<256x128xf32>
    %cst_20 = arith.constant 0.707106769 : f32
    %47 = vector.broadcast %cst_20 : f32 to vector<256x128xf32>
    %48 = arith.mulf %44, %47 : vector<256x128xf32>
    %49 = math.erf %48 : vector<256x128xf32>
    %cst_21 = arith.constant 1.000000e+00 : f32
    %50 = vector.broadcast %cst_21 : f32 to vector<256x128xf32>
    %51 = arith.addf %50, %49 : vector<256x128xf32>
    %52 = arith.mulf %46, %51 : vector<256x128xf32>
    %c0_22 = arith.constant 0 : index
    %c0_23 = arith.constant 0 : index
    %c0_24 = arith.constant 0 : index
    %53 = vector.load %arg6[%c0_22, %c0_23, %c0_24] : memref<1x256x128xf32, #tpu.memory_space<vmem>>, vector<1x256x128xf32>
    %54 = vector.shape_cast %53 : vector<1x256x128xf32> to vector<256x128xf32>
    %55 = vector.shape_cast %52 : vector<256x128xf32> to vector<1x256x128xf32>
    tpu.vector_store %arg6[%c0_22, %c0_23, %c0_24], %55 {strides = array<i32>} : memref<1x256x128xf32, #tpu.memory_space<vmem>>, vector<1x256x128xf32>,
    return
  }
  func.func @transform_0(%arg0: i32, %arg1: i32) -> (i32, i32, i32) {
    %c0_i32 = arith.constant 0 : i32
    %c0_i32_0 = arith.constant 0 : i32
    return %arg0, %arg1, %c0_i32 : i32, i32, i32
  }
  func.func @transform_1(%arg0: i32, %arg1: i32) -> (i32, i32, i32) {
    %c1_i32 = arith.constant 1 : i32
    %0 = arith.addi %arg1, %c1_i32 : i32
    %c32_i32 = arith.constant 32 : i32
    %1 = arith.muli %0, %c32_i32 : i32
    %c0_i32 = arith.constant 0 : i32
    %c0_i32_0 = arith.constant 0 : i32
    return %arg0, %1, %c0_i32 : i32, i32, i32
  }
  func.func @transform_2(%arg0: i32, %arg1: i32) -> (i32, i32, i32) {
    %c0_i32 = arith.constant 0 : i32
    %c0_i32_0 = arith.constant 0 : i32
    %c0_i32_1 = arith.constant 0 : i32
    %c0_i32_2 = arith.constant 0 : i32
    return %c0_i32, %c0_i32_0, %c0_i32_1 : i32, i32, i32
  }
  func.func @transform_3(%arg0: i32, %arg1: i32) -> (i32, i32) {
    %c0_i32 = arith.constant 0 : i32
    %c0_i32_0 = arith.constant 0 : i32
    %c0_i32_1 = arith.constant 0 : i32
    return %c0_i32, %c0_i32_0 : i32, i32
  }
  func.func @transform_4(%arg0: i32, %arg1: i32) -> (i32, i32, i32) {
    %c0_i32 = arith.constant 0 : i32
    %c0_i32_0 = arith.constant 0 : i32
    return %arg0, %arg1, %c0_i32 : i32, i32, i32
  }
}

</mosaic_0001>

<bundles_post_ra>
// kernel: tpu_custom_call.1
= control target key start
LH: loop header
LB: loop body
LE: loop exit
PB: predicated region body
PF: predicated region fallthrough
CT: control target
= control target key end

     0   :  { %s9498_s0 = inlined_call_operand.hbm [shape: f32[2,520,128], index: 0, kind: input, shape index: {}]   ;;  %s9499_s1 = inlined_call_operand.hbm [shape: f32[2,520,128], index: 1, kind: input, shape index: {}]   ;;  %s9500_s2 = inlined_call_operand.vmem [shape: f32[4,128,32], index: 2, kind: input, shape index: {}]   ;;  %s9501_s3 = inlined_call_operand.vmem [shape: f32[1,128], index: 3, kind: input, shape index: {}]   ;;  %s9502_s4 = inlined_call_operand.hbm [shape: f32[2,512,128], index: 4, kind: output, shape index: {}]  }
   0x1   :  { %9708 = sst [smem:[#allocation164_spill]] %s9502_s4 }
   0x2   :  { %9 = vsyncpa [#allocation3], 0 }
   0x3   :  { %11 = vsyncpa [#allocation3 + $0x1], 0 }
   0x4   :  { %12 = vsyncpa [#allocation6], 0 }
   0x5   :  { %14 = vsyncpa [#allocation6 + $0x1], 0 }
   0x6   :  { %15 = vsyncpa [#allocation4], 0 }
   0x7   :  { %17 = vsyncpa [#allocation4 + $0x1], 0  ;;  %s6124_s15 = smov 0   ;;  %s6126_s16 = smov 0  }
   0x8   :  { %s6128_s17 = smov 0   ;;  %s6130_s18 = smov 0  }
   0x9   :  { %s6132_s19 = smov 0   ;;  %s6134_s20 = smov 0  }
   0xa   :  { %s6136_s21 = smov 0   ;;  %s6138_s22 = smov 0  }
   0xb   :  { %s6140_s23 = smov 0   ;;  %s6142_s24 = smov 0  }
   0xc   :  { %s6144_s25 = smov 0  }
   0xd LB: > { %9709 = sst [smem:[#allocation11_spill]] %s6059_s18  ;;  %s9503_s26 = sadd.s32 4294967295, %s6087_s25   ;;  %s6087_s25 = sphi %s6144_s25, %s23_s25   ;;  %s6083_s24 = sphi %s6142_s24, %s10109_s24   ;;  %s6079_s23 = sphi %s6140_s23, %s10101_s23   ;;  %s6075_s22 = sphi %s6138_s22, %s10108_s22   ;;  %s6071_s21 = sphi %s6136_s21, %s10100_s21   ;;  %s6067_s20 = sphi %s6134_s20, %s10099_s20   ;;  %s6063_s19 = sphi %s6132_s19, %s10107_s19   ;;  %s6059_s18 = sphi %s6130_s18, %s10106_s18   ;;  %s6055_s17 = sphi %s6128_s17, %s10105_s17   ;;  %s6051_s16 = sphi %s6126_s16, %s10104_s16   ;;  %s6047_s15 = sphi %s6124_s15, %s10103_s15  }
   0xe   : > { %9710 = sst [smem:[#allocation12_spill]] %s6067_s20  ;;  %s32_s28 = sadd.s32 1, %s6079_s23 }
   0xf   : > { %9711 = sst [smem:[#allocation13_spill]] %s6075_s22  ;;  %s35_s29 = sadd.s32 1, %s6083_s24 }
  0x10   : > { %9712 = sst [smem:[#allocation14_spill]] %s6079_s23  ;;  %p33_p0 = scmp.ge.s32.totalorder %s32_s28, 2 }
  0x11   : > { %s44_s30 = sadd.s32 1, %s6067_s20  ;;  %p51_p1 = scmp.ne.s32.totalorder %s6067_s20, %s6063_s19 }
  0x12   : > { %p52_p2 = scmp.eq.s32.totalorder %s6087_s25, 0  ;;  %s10111_s28 = smov (%p33_p0, %s32_s28), 0 }
  0x13   : > { %9713 = sst [smem:[#allocation15_spill]] %s10111_s28  ;;  %s10113_s29 = smov (!%p33_p0, %s35_s29), %s6083_s24 }
  0x14   : > { %s40_s5 = ssub.s32 %s6079_s23, %s10111_s28  ;;  %p6197_p3 = por %p52_p2, %p51_p1 }
  0x15   : > { %p37_p4 = scmp.ge.s32.totalorder %s10113_s29, 2  ;;  %p57_p5 = scmp.ne.s32.totalorder %s6063_s19, %s6059_s18 }
  0x16   : > { %p6205_p6 = scmp.eq.s32.totalorder %s9503_s26, 0  ;;  %s6210_s8 = sshll.u32 %s6079_s23, 5 }
  0x17   : > { %s10115_s29 = smov (%p37_p4, %s10113_s29), 0  ;;  %s4081_s10 = sadd.s32 32, %s6210_s8 }
  0x18   : > { %9716 = sst [smem:[#allocation16_spill]] %s10115_s29  ;;  %p6219_p7 = por %p6205_p6, %p57_p5 }
  0x19   : > { %s39_s11 = ssub.s32 %s6083_s24, %s10115_s29  ;;  %s4082_s12 = sshll.u32 %s10111_s28, 5 }
  0x1a   : > { %s41_s13 = sor.u32 %s40_s5, %s39_s11  ;;  %s4083_s14 = sadd.s32 32, %s4082_s12 }
  0x1b   : > { %p42_p8 = scmp.eq.s32.totalorder %s41_s13, 0  ;;  %s72_s27 = ssub.s32 %s4081_s10, %s4083_s14 }
  0x1c   : > { %s73_s26 = sor.u32 %s72_s27, %s39_s11  ;;  %s76_s23 = sadd.s32 1, %s6055_s17 }
  0x1d   : > { %s6229_s4 = scalar_select %p42_p8, %s6067_s20, %s44_s30  }
  0x1e   : > { %p74_p9 = scmp.eq.s32.totalorder %s73_s26, 0  ;;  %p83_p10 = scmp.ne.s32.totalorder %s6055_s17, %s6051_s16 }
  0x1f   : > { %9718 = sst [smem:[#allocation17_spill]] %s6229_s4  ;;  %p89_p11 = scmp.ne.s32.totalorder %s6051_s16, %s6047_s15 }
  0x20   : > { %s9719_s22 = sadd.s32 4294967295, %s6087_s25   ;;  %p6242_p13 = por %p83_p10, %p52_p2 }
  0x21   : > { %p157_p12 = scmp.eq.s32.totalorder %s9719_s22, 3  ;;  %p6248_p0 = por %p89_p11, %p6205_p6 }
  0x22   : > { %s6238_s29 = scalar_select %p74_p9, %s6055_s17, %s76_s23  }
  0x23   : > { %s9722_s5 = scalar_select %p6248_p0, 1, 0 }
  0x24   : > { %9720 = sst [smem:[#allocation18_spill]] %s6238_s29  ;;  %p6255_p4 = por %p157_p12, %p51_p1 }
  0x25   : > { %s9724_s15 = sadd.s32 4294967294, %s6087_s25   ;;  %p4010_p2 = scmp.ge.s32.totalorder %s6087_s25, 4 }
  0x26   : > { %s9723_s27 = scalar_select %p6255_p4, 1, 0 }
  0x27   : > { %p163_p8 = scmp.eq.s32.totalorder %s9724_s15, 3  ;;  %185 = sbr.rel (%p4010_p2) target bundleno = 102 (0x66), region = 24 }
  0x29   : > { %p6264_p9 = por %p163_p8, %p57_p5 }
  0x2b   : > { %s9725_s22 = scalar_select %p6264_p9, 1, 0 }
  0x2d   : > { %9726 = sst [smem:[#allocation19_spill]] %s9725_s22 }
  0x2e   : > { %188 = sbr.rel (!%p6197_p3) target bundleno = 75 (0x4b), region = 28  ;;  %s189_s23 = sand.u32 (%p6197_p3), 1, %s6067_s20  }
  0x2f   : > { %s4011_s26 = sshll.u32 (%p6197_p3), %s189_s23, 8  ;;  %s6272_s30 = scalar_lea.sflag (%p6197_p3), [#allocation3], %s189_s23 }
  0x30   : > { %s193_s7 = scalar_lea.vmem (%p6197_p3), [#allocation2], %s4011_s26  ;;  %s4724_s10 = smul.u32 (%p6197_p3), 65, %s6083_s24 }
  0x31   : > { %s208_s11 = sshll.u32 (%p6197_p3), %s193_s7, 4  ;;  %s5906_s20 = scalar_lea.hbm (%p6197_p3), %s9498_s0, 16640  ;;  %s6276_s11 = int_to_ptr.vmem [resolvable:$true] %s208_s11 }
  0x32   : > { %s204_s12 = sadd.s32 (%p6197_p3), %s4724_s10, %s6210_s8 }
  0x33   : > { %s4015_s13 = sshll.u32 (%p6197_p3), %s204_s12, 7 }
  0x34   : > { %s206_s4 = scalar_lea.hbm (%p6197_p3), %s9498_s0, %s4015_s13 }
  0x35   : > { %s5902_s6 = scalar_lea.hbm %s206_s4, 4096  ;;  %p5907_p3 = scmp.lt.u32.totalorder %s206_s4, %s9498_s0 }
  0x36   : > { %p5903_p1 = scmp.ne.s32.totalorder %s206_s4, %s5902_s6  ;;  %p5908_p5 = scmp.lt.u32.totalorder %s5906_s20, %s5902_s6 }
  0x37   : > { %p5910_p10 = scmp.lt.u32.totalorder %s5902_s6, %s206_s4 }
  0x38   : > { %p5909_p6 = por %p5908_p5, %p5907_p3 }
  0x3a   : > { %p5911_p11 = por %p5910_p10, %p5909_p6 }
  0x3c   : > { %p5912_p12 = pnand %p5911_p11, %p5903_p1 }
  0x3e   : > { %5915 = shalt.err (!%p5912_p12)
}
  0x3f   : > { %s5916_s26 = scalar_lea.vmem %s6276_s11, 4096  ;;  %s6089_s7 = smov [#allocation2]  }
  0x40   : > { %p5917_p8 = scmp.ne.s32.totalorder %s6276_s11, %s5916_s26  ;;  %s5920_s10 = sshll.u32 %s6089_s7, 4  ;;  %s5921_s10 = int_to_ptr.vmem [resolvable:$false] %s5920_s10 }
  0x41   : > { %s5922_s29 = scalar_lea.vmem %s5921_s10, 8192  ;;  %p5923_p2 = scmp.lt.s32.totalorder %s6276_s11, %s5921_s10 }
  0x42   : > { %p5924_p9 = scmp.lt.s32.totalorder %s5922_s29, %s5916_s26 }
  0x44   : > { %p5925_p4 = por %p5924_p9, %p5923_p2 }
  0x46   : > { %p5926_p0 = pnand %p5925_p4, %p5917_p8 }
  0x48   : > { %5929 = shalt.err (!%p5926_p0)
}
  0x49   : > { %s6090_s18 = smov 128   ;;  %s6091_s20 = smov 8  }
  0x4a   : > { %214 = dma.hbm_to_vmem [thread:$0]  %s206_s4, 4096, %s6276_s11, %s6272_s30, %s6090_s18, %s6090_s18, %s6091_s20  }
  0x4b PF: > { %s218_s22 = sand.u32 1, %s6055_s17   ;;  %s3930_s12 = smul.u32 65, %s6083_s24 }
  0x4c   : > { %s4018_s13 = sshll.u32 %s218_s22, 3  ;;  %s219_s4 = scalar_lea.sflag [#allocation6], %s218_s22 }
  0x4d   : > { %s3931_s14 = sadd.s32 %s6210_s8, %s3930_s12  ;;  %s222_s6 = scalar_lea.vmem [#allocation5], %s4018_s13 }
  0x4e   : > { %s4020_s15 = sshll.u32 %s3931_s14, 7  ;;  %s233_s23 = sshll.u32 %s222_s6, 4  ;;  %s6298_s23 = int_to_ptr.vmem [resolvable:$true] %s233_s23 }
  0x4f   : > { %s3933_s10 = scalar_lea.hbm %s9499_s1, %s4020_s15  ;;  %s5934_s8 = scalar_lea.hbm %s9499_s1, 16640 }
  0x50   : > { %s3934_s29 = scalar_lea.hbm %s3933_s10, 4096  ;;  %s5958_s30 = scalar_lea.hbm %s3933_s10, 4224 }
  0x51   : > { %p5931_p0 = scmp.ne.s32.totalorder %s3934_s29, %s5958_s30  ;;  %p5935_p1 = scmp.lt.u32.totalorder %s3934_s29, %s9499_s1 }
  0x52   : > { %p5936_p3 = scmp.lt.u32.totalorder %s5934_s8, %s5958_s30  ;;  %p5938_p6 = scmp.lt.u32.totalorder %s5958_s30, %s3934_s29 }
  0x53   : > { %p5932_p4 = pnand %p5931_p0, %p6242_p13 }
  0x54   : > { %p5937_p5 = por %p5936_p3, %p5935_p1 }
  0x55   : > { %p5933_p9 = pneg %p5932_p4 }
  0x56   : > { %p5939_p10 = por %p5938_p6, %p5937_p5 }
  0x58   : > { %p5940_p11 = pnand %p5939_p10, %p5933_p9 }
  0x5a   : > { %5943 = shalt.err (!%p5940_p11)
}
  0x5b   : > { %s5944_s22 = scalar_lea.vmem %s6298_s23, 128  ;;  %s6092_s13 = smov [#allocation5]  }
  0x5c   : > { %p5945_p12 = scmp.ne.s32.totalorder %s6298_s23, %s5944_s22  ;;  %s5948_s14 = sshll.u32 %s6092_s13, 4  ;;  %s5949_s14 = int_to_ptr.vmem [resolvable:$false] %s5948_s14 }
  0x5d   : > { %s5950_s15 = scalar_lea.vmem %s5949_s14, 256  ;;  %p5951_p0 = scmp.lt.s32.totalorder %s6298_s23, %s5949_s14 }
  0x5e   : > { %p5946_p8 = pnand %p5945_p12, %p6242_p13  ;;  %p5952_p4 = scmp.lt.s32.totalorder %s5950_s15, %s5944_s22 }
  0x60   : > { %p5947_p2 = pneg %p5946_p8  ;;  %p5953_p1 = por %p5952_p4, %p5951_p0 }
  0x62   : > { %p5954_p3 = pnand %p5953_p1, %p5947_p2 }
  0x64   : > { %5957 = shalt.err (!%p5954_p3)
}
  0x65   : > { %4725 = dma.hbm_to_vmem [thread:$0]  (%p6242_p13), %s3934_s29, 128, %s6298_s23, %s219_s4  }
  0x66 PF: > { %p4021_p9 = scmp.ge.s32.totalorder %s6087_s25, 1  ;;  %p238_p5 = scmp.lt.s32.totalorder %s6087_s25, 5 }
  0x68   : > { %p239_p6 = pnand %p4021_p9, %p238_p5 }
  0x6a   : > { %242 = sbr.rel (%p239_p6) target bundleno = 1054 (0x41e), region = 36 }
  0x71   : > { %s6319_s6 = sand.u32 1, %s6063_s19  }
  0x72   : > { %s4022_s26 = sshll.u32 %s6319_s6, 8  ;;  %s245_s7 = scalar_lea.sflag [#allocation3], %s6319_s6 }
  0x73   : > { %s6325_s28 = scalar_lea.vmem [#allocation2], %s4022_s26 }
  0x74   : > { %6032 = dma.done.wait (%p6219_p7), %s245_s7, 4096  }
  0x75   : > { %6034 = vsyncadd (%p6219_p7), %s245_s7, 4294963200  ;;  %s253_s23 = sand.u32 1, %s6051_s16   ;;  %p9727_p13 = scmp.ne.s32.totalorder %s9722_s5, 0 }
  0x76   : > { %s6332_s10 = sshll.u32 %s253_s23, 3  ;;  %s254_s29 = scalar_lea.sflag [#allocation6], %s253_s23 }
  0x77   : > { %s257_s4 = scalar_lea.vmem [#allocation5], %s6332_s10 }
  0x78   : > { %6036 = dma.done.wait (%p9727_p13), %s254_s29, 128  }
  0x79   : > { %6038 = vsyncadd (%p9727_p13), %s254_s29, 4294967168  ;;  %v6340_v0 = vld [vmem:[%s6325_s28 + $0x20] sm:$0xff]  ;;  %v6343_v1 = vld [vmem:[%s6325_s28 + $0x28] sm:$0xff]  ;;  %vm361_vm0 = vcmask 1046528   ;;  %s6093_s9 = smov 32   ;;  %vm523_vm1 = vcmask 1045504  }
  0x7a   : > { %v6346_v2 = vld [vmem:[%s6325_s28 + $0x30] sm:$0xff]  ;;  %v369_v3 = vrot.slane %v6340_v0, 1  ;;  %v371_v4 = vrot.slane %v6343_v1, 1  ;;  %v6352_v6 = vld [vmem:[%s6325_s28] sm:$0xff]  ;;  %v6355_v7 = vld [vmem:[%s6325_s28 + $0x8] sm:$0xff]  ;;  %s6094_s5 = smov 64  }
  0x7b   : > { %v373_v5 = vrot.slane %v6346_v2, 1  ;;  %v6358_v8 = vld [vmem:[%s6325_s28 + $0x10] sm:$0xff]  ;;  %v362_v9 = vrot.slane %v6352_v6, 1  ;;  %v363_v10 = vrot.slane %v6355_v7, 1  ;;  %v6364_v12 = vld [vmem:[%s6325_s28 + $0x38] sm:$0xff]  ;;  %v6367_v13 = vld [vmem:[%s6325_s28 + $0x40] sm:$0xff] }
  0x7c   : > { %v365_v11 = vrot.slane %v6358_v8, 1  ;;  %v6370_v14 = vld [vmem:[%s6325_s28 + $0x18] sm:$0xff]  ;;  %v6373_v15 = vsel %vm361_vm0, %v369_v3, %v371_v4  ;;  %v375_v17 = vrot.slane %v6364_v12, 1  ;;  %v377_v18 = vrot.slane %v6367_v13, 1  ;;  %v6381_v19 = vld [vmem:[%s6325_s28 + $0x50] sm:$0xff]  ;;  %v6398_v25 = vld [vmem:[%s6325_s28 + $0x60] sm:$0xff] }
  0x7d   : > { %9728 = vst [vmem:[#allocation20_spill] sm:$0xff] %v6373_v15  ;;  %v6376_v16 = vsel %vm361_vm0, %v371_v4, %v373_v5  ;;  %v6384_v20 = vld [vmem:[%s6325_s28 + $0x58] sm:$0xff]  ;;  %v6391_v22 = vsel %vm361_vm0, %v362_v9, %v363_v10  ;;  %v367_v24 = vrot.slane %v6370_v14, 1  ;;  %v6401_v26 = vld [vmem:[%s6325_s28 + $0x48] sm:$0xff]  ;;  %v6404_v27 = vld [vmem:[%s6325_s28 + $0x70] sm:$0xff]  ;;  %v381_v31 = vrot.slane %v6381_v19, 1 }
  0x7e   : > { %9729 = vst [vmem:[#allocation21_spill] sm:$0xff] %v6376_v16  ;;  %v6388_v21 = vpack.i.bf16 %v6376_v16, %v6373_v15  ;;  %9731 = vst [vmem:[#allocation23_spill] sm:$0xff] %v6391_v22  ;;  %v6394_v23 = vsel %vm361_vm0, %v363_v10, %v365_v11  ;;  %v6411_v29 = vsel %vm361_vm0, %v373_v5, %v375_v17  ;;  %v6418_v32 = vld [vmem:[%s6325_s28 + $0x78] sm:$0xff]  ;;  %v6421_v33 = vld [vmem:[%s6325_s28 + $0x80] sm:$0xff]  ;;  %v383_v38 = vrot.slane %v6384_v20, 1  ;;  %s6095_s10 = smov 96  }
  0x7f   : > { %9732 = vst [vmem:[#allocation24_spill] sm:$0xff] %v6394_v23  ;;  %v6408_v28 = vpack.i.bf16 %v6394_v23, %v6391_v22  ;;  %9734 = vst [vmem:[#allocation26_spill] sm:$0xff] %v6411_v29  ;;  %v6414_v30 = vsel %vm361_vm0, %v375_v17, %v377_v18  ;;  %v6424_v34 = vld [vmem:[%s6325_s28 + $0x68] sm:$0xff]  ;;  %v6433_v36 = vsel %vm361_vm0, %v365_v11, %v367_v24  ;;  %v385_v40 = vrot.slane %v6398_v25, 1  ;;  %v6449_v43 = vld [vmem:[%s6325_s28 + $0x90] sm:$0xff]  ;;  %s10092_s13 = sld [smem:[#allocation164_spill]] }
  0x80   : > { %9730 = vst [vmem:[#allocation22_spill] sm:$0xff] %v6388_v21  ;;  %9735 = vst [vmem:[#allocation27_spill] sm:$0xff] %v6414_v30  ;;  %4841 = vrot.lane.b32.xlu1 %v6388_v21, %s6093_s9  ;;  %v6430_v35 = vpack.i.bf16 %v6414_v30, %v6411_v29  ;;  %v6436_v37 = vsel %vm361_vm0, %v367_v24, %v369_v3  ;;  %v379_v41 = vrot.slane %v6401_v26, 1  ;;  %v389_v42 = vrot.slane %v6404_v27, 1  ;;  %v6458_v48 = vld [vmem:[%s6325_s28 + $0x98] sm:$0xff]  ;;  %v6470_v52 = vld [vmem:[%s6325_s28 + $0xa0] sm:$0xff] }
  0x81   : > { %9733 = vst [vmem:[#allocation25_spill] sm:$0xff] %v6408_v28  ;;  %9737 = vst [vmem:[#allocation29_spill] sm:$0xff] %v6433_v36  ;;  %4831 = vrot.lane.b32.xlu0 %v6408_v28, %s6093_s9  ;;  %v6443_v39 = vpack.i.bf16 %v6436_v37, %v6433_v36  ;;  %v6452_v44 = vsel %vm361_vm0, %v381_v31, %v383_v38  ;;  %v391_v45 = vrot.slane %v6418_v32, 1  ;;  %v393_v46 = vrot.slane %v6421_v33, 1  ;;  %v6473_v53 = vld [vmem:[%s6325_s28 + $0x88] sm:$0xff]  ;;  %v6502_v62 = vld [vmem:[%s6325_s28 + $0xb0] sm:$0xff] }
  0x82   : > { %9736 = vst [vmem:[#allocation28_spill] sm:$0xff] %v6430_v35  ;;  %9738 = vst [vmem:[#allocation30_spill] sm:$0xff] %v6436_v37  ;;  %v387_v47 = vrot.slane %v6424_v34, 1  ;;  %v6461_v49 = vsel %vm361_vm0, %v383_v38, %v385_v40  ;;  %v6464_v50 = vsel %vm361_vm0, %v377_v18, %v379_v41  ;;  %v6467_v51 = vsel %vm361_vm0, %v379_v41, %v381_v31  ;;  %v6505_v63 = vld [vmem:[%s6325_s28 + $0xb8] sm:$0xff]  ;;  %v6508_v3 = vld [vmem:[%s6325_s28 + $0xc0] sm:$0xff]  ;;  %s3873_s15 = scalar_lea.sflag [#allocation4], %s6319_s6 }
  0x83   : > { %9739 = vst [vmem:[#allocation31_spill] sm:$0xff] %v6443_v39  ;;  %9740 = vst [vmem:[#allocation32_spill] sm:$0xff] %v6452_v44  ;;  %v6479_v54 = vpack.i.bf16 %v6461_v49, %v6452_v44  ;;  %v6482_v55 = vsel %vm361_vm0, %v389_v42, %v391_v45  ;;  %v6485_v56 = vsel %vm361_vm0, %v391_v45, %v393_v46  ;;  %v397_v57 = vrot.slane %v6449_v43, 1  ;;  %v6513_v9 = vld [vmem:[%s6325_s28 + $0xa8] sm:$0xff]  ;;  %v6532_v38 = vld [vmem:[%s6325_s28 + $0xd0] sm:$0xff]  ;;  %p10093_p10 = scmp.ne.s32.totalorder %s9723_s27, 0 }
  0x84   : > { %9741 = vst [vmem:[#allocation33_spill] sm:$0xff] %v6461_v49  ;;  %9742 = vst [vmem:[#allocation34_spill] sm:$0xff] %v6464_v50  ;;  %4846 = vrot.lane.b32.xlu1 %v6430_v35, %s6093_s9  ;;  %v6492_v58 = vpack.i.bf16 %v6467_v51, %v6464_v50  ;;  %v6495_v59 = vsel %vm361_vm0, %v385_v40, %v387_v47  ;;  %v6498_v60 = vsel %vm361_vm0, %v387_v47, %v389_v42  ;;  %v6547_v47 = vld [vmem:[%s6325_s28 + $0xd8] sm:$0xff]  ;;  %v6594_v44 = vld [vmem:[%s6325_s28 + $0xe8] sm:$0xff]  ;;  %vm685_vm2 = vcmask 1044480   ;;  %s6096_s23 = smov [#allocation7]  }
  0x85   : > { %9743 = vst [vmem:[#allocation35_spill] sm:$0xff] %v6467_v51  ;;  %9744 = vst [vmem:[#allocation36_spill] sm:$0xff] %v6479_v54  ;;  %4836 = vrot.lane.b32.xlu0 %v6443_v39, %s6093_s9  ;;  %v399_v61 = vrot.slane %v6458_v48, 1  ;;  %v401_v4 = vrot.slane %v6470_v52, 1  ;;  %v395_v5 = vrot.slane %v6473_v53, 1  ;;  %v6517_v10 = vpack.i.bf16 %v6485_v56, %v6482_v55  ;;  %v6587_v51 = vld [vmem:[%s6325_s28 + $0xf8] sm:$0xff] }
  0x86   : > { %9745 = vst [vmem:[#allocation37_spill] sm:$0xff] %v6482_v55  ;;  %9746 = vst [vmem:[#allocation38_spill] sm:$0xff] %v6485_v56  ;;  %v6521_v11 = vpack.i.bf16 %v6498_v60, %v6495_v59  ;;  %v405_v18 = vrot.slane %v6502_v62, 1  ;;  %v407_v24 = vrot.slane %v6505_v63, 1  ;;  %v409_v31 = vrot.slane %v6508_v3, 1  ;;  %v6550_v56 = vld [vmem:[%s6325_s28 + $0xe0] sm:$0xff] }
  0x87   : > { %9747 = vst [vmem:[#allocation39_spill] sm:$0xff] %v6492_v58  ;;  %9748 = vst [vmem:[#allocation40_spill] sm:$0xff] %v6495_v59  ;;  %v6526_v17 = vsel %vm361_vm0, %v397_v57, %v399_v61  ;;  %v6537_v40 = vsel %vm361_vm0, %v399_v61, %v401_v4  ;;  %v6540_v41 = vsel %vm361_vm0, %v393_v46, %v395_v5  ;;  %v403_v45 = vrot.slane %v6513_v9, 1  ;;  %v6554_v61 = vld [vmem:[%s6325_s28 + $0xc8] sm:$0xff]  ;;  %s5963_s29 = sshll.u32 %s6096_s23, 4  ;;  %s5964_s29 = int_to_ptr.vmem [resolvable:$false] %s5963_s29 }
  0x88   : > { %9749 = vst [vmem:[#allocation41_spill] sm:$0xff] %v6498_v60  ;;  %9750 = vst [vmem:[#allocation42_spill] sm:$0xff] %v6517_v10  ;;  %4856 = vrot.lane.b32.xlu1 %v6479_v54, %s6093_s9  ;;  %v6543_v42 = vsel %vm361_vm0, %v395_v5, %v397_v57  ;;  %v413_v60 = vrot.slane %v6532_v38, 1  ;;  %v6560_v46 = vpack.i.bf16 %v6537_v40, %v6526_v17  ;;  %v423_v16 = vrot.slane %v6587_v51, 1 }
  0x89   : > { %9751 = vst [vmem:[#allocation43_spill] sm:$0xff] %v6521_v11  ;;  %9752 = vst [vmem:[#allocation44_spill] sm:$0xff] %v6526_v17  ;;  %4851 = vrot.lane.b32.xlu0 %v6492_v58, %s6093_s9  ;;  %v6564_v57 = vpack.i.bf16 %v6543_v42, %v6540_v41  ;;  %v6567_v5 = vsel %vm361_vm0, %v405_v18, %v407_v24  ;;  %v6570_v55 = vsel %vm361_vm0, %v407_v24, %v409_v31  ;;  %v6583_v17 = vld [vmem:[%s6325_s28 + $0xf0] sm:$0xff]  ;;  %v6591_v24 = vld [vmem:[%s257_s4] sm:$0xff]  ;;  %vm847_vm3 = vcmask 261120   ;;  %s5965_s4 = scalar_lea.vmem %s5964_s29, 8192 }
  0x8a   : > { %9753 = vst [vmem:[#allocation45_spill] sm:$0xff] %v6537_v40  ;;  %9754 = vst [vmem:[#allocation46_spill] sm:$0xff] %v6540_v41  ;;  %v6575_v59 = vsel %vm361_vm0, %v401_v4, %v403_v45  ;;  %v6578_v49 = vsel %vm361_vm0, %v403_v45, %v405_v18  ;;  %v415_v40 = vrot.slane %v6547_v47, 1  ;;  %v411_v41 = vrot.slane %v6554_v61, 1 }
  0x8b   : > { %9755 = vst [vmem:[#allocation47_spill] sm:$0xff] %v6543_v42  ;;  %9756 = vst [vmem:[#allocation48_spill] sm:$0xff] %v6560_v46  ;;  %v417_v42 = vrot.slane %v6550_v56, 1  ;;  %v6600_v4 = vpack.i.bf16 %v6570_v55, %v6567_v5  ;;  %v6604_v18 = vpack.i.bf16 %v6578_v49, %v6575_v59  ;;  %v421_v45 = vrot.slane %v6583_v17, 1 }
  0x8c   : > { %4866 = vrot.lane.b32.xlu1 %v6517_v10, %s6093_s9  ;;  %9757 = vst [vmem:[#allocation49_spill] sm:$0xff] %v6564_v57  ;;  %9758 = vst [vmem:[#allocation50_spill] sm:$0xff] %v6567_v5  ;;  %v6610_v50 = vsel %vm361_vm0, %v413_v60, %v415_v40  ;;  %v6618_v5 = vsel %vm361_vm0, %v409_v31, %v411_v41  ;;  %v529_v15 = vrot.slane %v6370_v14, 2  ;;  %v531_v37 = vrot.slane %v6340_v0, 2 }
  0x8d   : > { %9759 = vst [vmem:[#allocation51_spill] sm:$0xff] %v6570_v55  ;;  %4861 = vrot.lane.b32.xlu0 %v6521_v11, %s6093_s9  ;;  %9760 = vst [vmem:[#allocation52_spill] sm:$0xff] %v6575_v59  ;;  %v6613_v30 = vsel %vm361_vm0, %v415_v40, %v417_v42  ;;  %v425_v55 = vrot.slane %v6591_v24, 1  ;;  %v419_v59 = vrot.slane %v6594_v44, 1  ;;  %v527_v40 = vrot.slane %v6358_v8, 2 }
  0x8e   : > { %9761 = vst [vmem:[#allocation53_spill] sm:$0xff] %v6578_v49  ;;  %9762 = vst [vmem:[#allocation54_spill] sm:$0xff] %v6600_v4  ;;  %v6621_v49 = vsel %vm361_vm0, %v411_v41, %v413_v60  ;;  %v6628_v29 = vpack.i.bf16 %v6613_v30, %v6610_v50  ;;  %v6640_v31 = vsel %vm361_vm0, %v421_v45, %v423_v16  ;;  %v524_v23 = vrot.slane %v6352_v6, 2 }
  0x8f   : > { %9763 = vst [vmem:[#allocation55_spill] sm:$0xff] %v6604_v18  ;;  %9764 = vst [vmem:[#allocation56_spill] sm:$0xff] %v6610_v50  ;;  %v6637_v60 = vpack.i.bf16 %v6621_v49, %v6618_v5  ;;  %v6643_v41 = vsel %vm361_vm0, %v423_v16, %v425_v55  ;;  %v6649_v50 = vsel %vm361_vm0, %v419_v59, %v421_v45  ;;  %v525_v22 = vrot.slane %v6355_v7, 2 }
  0x90   : > { %4876 = vrot.lane.b32.xlu1 %v6560_v46, %s6093_s9  ;;  %9765 = vst [vmem:[#allocation57_spill] sm:$0xff] %v6613_v30  ;;  %9766 = vst [vmem:[#allocation58_spill] sm:$0xff] %v6618_v5  ;;  %v6646_v30 = vsel %vm361_vm0, %v417_v42, %v419_v59  ;;  %v537_v5 = vrot.slane %v6364_v12, 2  ;;  %v6659_v16 = vpack.i.bf16 %v6643_v41, %v6640_v31  ;;  %v539_v42 = vrot.slane %v6367_v13, 2 }
  0x91   : > { %4871 = vrot.lane.b32.xlu0 %v6564_v57, %s6093_s9  ;;  %9767 = vst [vmem:[#allocation59_spill] sm:$0xff] %v6621_v49  ;;  %9768 = vst [vmem:[#allocation60_spill] sm:$0xff] %v6628_v29  ;;  %v535_v49 = vrot.slane %v6346_v2, 2  ;;  %v6662_v55 = vsel %vm523_vm1, %v527_v40, %v529_v15  ;;  %v6665_v59 = vsel %vm523_vm1, %v529_v15, %v531_v37  ;;  %v577_v46 = vrot.slane %v6547_v47, 2 }
  0x92   : > { %9769 = vst [vmem:[#allocation61_spill] sm:$0xff] %v6637_v60  ;;  %9770 = vst [vmem:[#allocation62_spill] sm:$0xff] %v6640_v31  ;;  %v6672_v45 = vpack.i.bf16 %v6649_v50, %v6646_v30  ;;  %v6675_v36 = vsel %vm523_vm1, %v524_v23, %v525_v22  ;;  %v533_v31 = vrot.slane %v6343_v1, 2  ;;  %v6683_v15 = vpack.i.bf16 %v6665_v59, %v6662_v55 }
  0x93   : > { %9771 = vst [vmem:[#allocation63_spill] sm:$0xff] %v6643_v41  ;;  %9772 = vst [vmem:[#allocation64_spill] sm:$0xff] %v6646_v30  ;;  %v6678_v41 = vsel %vm523_vm1, %v525_v22, %v527_v40  ;;  %v543_v23 = vrot.slane %v6381_v19, 2  ;;  %v545_v22 = vrot.slane %v6384_v20, 2  ;;  %v547_v40 = vrot.slane %v6398_v25, 2 }
  0x94   : > { %4886 = vrot.lane.b32.xlu1 %v6600_v4, %s6093_s9  ;;  %9773 = vst [vmem:[#allocation65_spill] sm:$0xff] %v6649_v50  ;;  %9774 = vst [vmem:[#allocation66_spill] sm:$0xff] %v6659_v16  ;;  %v6691_v50 = vsel %vm523_vm1, %v537_v5, %v539_v42  ;;  %v6704_v30 = vsel %vm523_vm1, %v531_v37, %v533_v31  ;;  %v569_v4 = vrot.slane %v6505_v63, 2  ;;  %v579_v11 = vrot.slane %v6550_v56, 2 }
  0x95   : > { %4881 = vrot.lane.b32.xlu0 %v6604_v18, %s6093_s9  ;;  %9775 = vst [vmem:[#allocation67_spill] sm:$0xff] %v6662_v55  ;;  %9776 = vst [vmem:[#allocation68_spill] sm:$0xff] %v6665_v59  ;;  %v6700_v59 = vpack.i.bf16 %v6678_v41, %v6675_v36  ;;  %v541_v55 = vrot.slane %v6401_v26, 2  ;;  %v6721_v37 = vsel %vm523_vm1, %v545_v22, %v547_v40  ;;  %v573_v10 = vrot.slane %v6554_v61, 2 }
  0x96   : > { %9777 = vst [vmem:[#allocation69_spill] sm:$0xff] %v6672_v45  ;;  %9778 = vst [vmem:[#allocation70_spill] sm:$0xff] %v6675_v36  ;;  %v583_v58 = vrot.slane %v6583_v17, 2  ;;  %v585_v54 = vrot.slane %v6587_v51, 2  ;;  %v697_v28 = vrot.slane %v6346_v2, 3  ;;  %vm880_vm4 = vcmask 523264  }
  0x97   : > { %9779 = vst [vmem:[#allocation71_spill] sm:$0xff] %v6678_v41  ;;  %9780 = vst [vmem:[#allocation72_spill] sm:$0xff] %v6683_v15  ;;  %v6718_v41 = vsel %vm523_vm1, %v543_v23, %v545_v22  ;;  %v6735_v36 = vsel %vm523_vm1, %v541_v55, %v543_v23  ;;  %vm913_vm5 = vcmask 785408  }
  0x98   : > { %4896 = vrot.lane.b32.xlu1 %v6628_v29, %s6093_s9  ;;  %v6686_v29 = vsel %vm523_vm1, %v535_v49, %v537_v5  ;;  %9782 = vst [vmem:[#allocation74_spill] sm:$0xff] %v6691_v50  ;;  %9783 = vst [vmem:[#allocation75_spill] sm:$0xff] %v6700_v59  ;;  %v6707_v5 = vsel %vm523_vm1, %v533_v31, %v535_v49  ;;  %v555_v49 = vrot.slane %v6421_v33, 2  ;;  %v549_v31 = vrot.slane %v6424_v34, 2 }
  0x99   : > { %4891 = vrot.lane.b32.xlu0 %v6637_v60, %s6093_s9  ;;  %9781 = vst [vmem:[#allocation73_spill] sm:$0xff] %v6686_v29  ;;  %9784 = vst [vmem:[#allocation76_spill] sm:$0xff] %v6704_v30  ;;  %v551_v60 = vrot.slane %v6404_v27, 2  ;;  %v6739_v22 = vpack.i.bf16 %v6721_v37, %v6718_v41  ;;  %v6854_v21 = vsel %vm523_vm1, %v583_v58, %v585_v54 }
  0x9a   : > { %9785 = vst [vmem:[#allocation77_spill] sm:$0xff] %v6707_v5  ;;  %9787 = vst [vmem:[#allocation79_spill] sm:$0xff] %v6718_v41  ;;  %v563_v41 = vrot.slane %v6470_v52, 2 }
  0x9b   : > { %9788 = vst [vmem:[#allocation80_spill] sm:$0xff] %v6721_v37  ;;  %9791 = vst [vmem:[#allocation83_spill] sm:$0xff] %v6735_v36  ;;  %v6759_v23 = vsel %vm523_vm1, %v549_v31, %v551_v60  ;;  %v559_v37 = vrot.slane %v6449_v43, 2 }
  0x9c   : > { %4906 = vrot.lane.b32.xlu1 %v6659_v16, %s6093_s9  ;;  %v6711_v16 = vpack.i.bf16 %v6691_v50, %v6686_v29  ;;  %v6729_v50 = vpack.i.bf16 %v6707_v5, %v6704_v30  ;;  %v6732_v29 = vsel %vm523_vm1, %v539_v42, %v541_v55  ;;  %9792 = vst [vmem:[#allocation84_spill] sm:$0xff] %v6739_v22  ;;  %9797 = vst [vmem:[#allocation89_spill] sm:$0xff] %v6759_v23 }
  0x9d   : > { %4901 = vrot.lane.b32.xlu0 %v6672_v45, %s6093_s9  ;;  %v553_v45 = vrot.slane %v6418_v32, 2  ;;  %9790 = vst [vmem:[#allocation82_spill] sm:$0xff] %v6732_v29  ;;  %v6745_v18 = vpack.i.bf16 %v6735_v36, %v6732_v29  ;;  %v6754_v55 = vsel %vm523_vm1, %v547_v40, %v549_v31  ;;  %v561_v36 = vrot.slane %v6458_v48, 2  ;;  %9817 = vst [vmem:[#allocation109_spill] sm:$0xff] %v6854_v21 }
  0x9e   : > { %9786 = vst [vmem:[#allocation78_spill] sm:$0xff] %v6711_v16  ;;  %9789 = vst [vmem:[#allocation81_spill] sm:$0xff] %v6729_v50  ;;  %v557_v29 = vrot.slane %v6473_v53, 2  ;;  %v6773_v40 = vpack.i.bf16 %v6759_v23, %v6754_v55 }
  0x9f   : > { %9793 = vst [vmem:[#allocation85_spill] sm:$0xff] %v6745_v18  ;;  %v6748_v5 = vsel %vm523_vm1, %v551_v60, %v553_v45  ;;  %v6751_v42 = vsel %vm523_vm1, %v553_v45, %v555_v49  ;;  %9796 = vst [vmem:[#allocation88_spill] sm:$0xff] %v6754_v55  ;;  %v567_v60 = vrot.slane %v6502_v62, 2  ;;  %v6779_v31 = vsel %vm523_vm1, %v559_v37, %v561_v36 }
  0xa0   : > { %4916 = vrot.lane.b32.xlu1 %v6683_v15, %s6094_s5  ;;  %9794 = vst [vmem:[#allocation86_spill] sm:$0xff] %v6748_v5  ;;  %9795 = vst [vmem:[#allocation87_spill] sm:$0xff] %v6751_v42  ;;  %v6769_v45 = vpack.i.bf16 %v6751_v42, %v6748_v5  ;;  %v6782_v30 = vsel %vm523_vm1, %v561_v36, %v563_v41  ;;  %v571_v42 = vrot.slane %v6508_v3, 2  ;;  %v565_v55 = vrot.slane %v6513_v9, 2 }
  0xa1   : > { %4911 = vrot.lane.b32.xlu0 %v6700_v59, %s6094_s5  ;;  %9799 = vst [vmem:[#allocation91_spill] sm:$0xff] %v6773_v40  ;;  %9800 = vst [vmem:[#allocation92_spill] sm:$0xff] %v6779_v31  ;;  %v6787_v5 = vsel %vm523_vm1, %v555_v49, %v557_v29  ;;  %v6790_v23 = vsel %vm523_vm1, %v557_v29, %v559_v37  ;;  %v6797_v57 = vpack.i.bf16 %v6782_v30, %v6779_v31 }
  0xa2   : > { %9798 = vst [vmem:[#allocation90_spill] sm:$0xff] %v6769_v45  ;;  %9801 = vst [vmem:[#allocation93_spill] sm:$0xff] %v6782_v30  ;;  %v575_v36 = vrot.slane %v6532_v38, 2  ;;  %v6806_v29 = vpack.i.bf16 %v6790_v23, %v6787_v5  ;;  %v6809_v37 = vsel %vm523_vm1, %v567_v60, %v569_v4  ;;  %v6812_v49 = vsel %vm523_vm1, %v569_v4, %v571_v42 }
  0xa3   : > { %9802 = vst [vmem:[#allocation94_spill] sm:$0xff] %v6787_v5  ;;  %9803 = vst [vmem:[#allocation95_spill] sm:$0xff] %v6790_v23  ;;  %v6815_v30 = vsel %vm523_vm1, %v563_v41, %v565_v55  ;;  %v6818_v31 = vsel %vm523_vm1, %v565_v55, %v567_v60  ;;  %v6827_v23 = vpack.i.bf16 %v6812_v49, %v6809_v37  ;;  %v587_v55 = vrot.slane %v6591_v24, 2 }
  0xa4   : > { %4926 = vrot.lane.b32.xlu1 %v6711_v16, %s6094_s5  ;;  %9804 = vst [vmem:[#allocation96_spill] sm:$0xff] %v6797_v57  ;;  %9805 = vst [vmem:[#allocation97_spill] sm:$0xff] %v6806_v29  ;;  %v6830_v4 = vsel %vm523_vm1, %v575_v36, %v577_v46  ;;  %v6833_v41 = vsel %vm523_vm1, %v577_v46, %v579_v11  ;;  %v6840_v60 = vpack.i.bf16 %v6818_v31, %v6815_v30 }
  0xa5   : > { %4921 = vrot.lane.b32.xlu0 %v6729_v50, %s6094_s5  ;;  %9806 = vst [vmem:[#allocation98_spill] sm:$0xff] %v6809_v37  ;;  %9807 = vst [vmem:[#allocation99_spill] sm:$0xff] %v6812_v49  ;;  %v6843_v5 = vsel %vm523_vm1, %v571_v42, %v573_v10  ;;  %v6846_v49 = vsel %vm523_vm1, %v573_v10, %v575_v36  ;;  %v581_v37 = vrot.slane %v6594_v44, 2  ;;  %v689_v42 = vrot.slane %v6358_v8, 3 }
  0xa6   : > { %9808 = vst [vmem:[#allocation100_spill] sm:$0xff] %v6815_v30  ;;  %9809 = vst [vmem:[#allocation101_spill] sm:$0xff] %v6818_v31  ;;  %v6851_v46 = vpack.i.bf16 %v6833_v41, %v6830_v4  ;;  %v6859_v31 = vsel %vm523_vm1, %v585_v54, %v587_v55  ;;  %v691_v10 = vrot.slane %v6370_v14, 3  ;;  %v693_v36 = vrot.slane %v6340_v0, 3 }
  0xa7   : > { %9810 = vst [vmem:[#allocation102_spill] sm:$0xff] %v6827_v23  ;;  %9811 = vst [vmem:[#allocation103_spill] sm:$0xff] %v6830_v4  ;;  %v6871_v4 = vsel %vm523_vm1, %v579_v11, %v581_v37  ;;  %v6874_v54 = vsel %vm523_vm1, %v581_v37, %v583_v58  ;;  %v686_v55 = vrot.slane %v6352_v6, 3  ;;  %v687_v30 = vrot.slane %v6355_v7, 3 }
  0xa8   : > { %4936 = vrot.lane.b32.xlu1 %v6739_v22, %s6094_s5  ;;  %9812 = vst [vmem:[#allocation104_spill] sm:$0xff] %v6833_v41  ;;  %9813 = vst [vmem:[#allocation105_spill] sm:$0xff] %v6840_v60  ;;  %v6868_v41 = vpack.i.bf16 %v6846_v49, %v6843_v5  ;;  %v6880_v35 = vpack.i.bf16 %v6859_v31, %v6854_v21  ;;  %v6889_v11 = vsel %vm685_vm2, %v691_v10, %v693_v36 }
  0xa9   : > { %4931 = vrot.lane.b32.xlu0 %v6745_v18, %s6094_s5  ;;  %9814 = vst [vmem:[#allocation106_spill] sm:$0xff] %v6843_v5  ;;  %9815 = vst [vmem:[#allocation107_spill] sm:$0xff] %v6846_v49  ;;  %v6886_v49 = vsel %vm685_vm2, %v689_v42, %v691_v10  ;;  %v699_v58 = vrot.slane %v6364_v12, 3  ;;  %v701_v37 = vrot.slane %v6367_v13, 3  ;;  %v6900_v21 = vsel %vm685_vm2, %v686_v55, %v687_v30  ;;  %v947_v55 = vld [vmem:[%s9500_s2 + $0x8] sm:$0xff] }
  0xaa   : > { %9816 = vst [vmem:[#allocation108_spill] sm:$0xff] %v6851_v46  ;;  %9818 = vst [vmem:[#allocation110_spill] sm:$0xff] %v6859_v31  ;;  %v6897_v31 = vpack.i.bf16 %v6874_v54, %v6871_v4  ;;  %v6903_v5 = vsel %vm685_vm2, %v687_v30, %v689_v42  ;;  %v695_v10 = vrot.slane %v6343_v1, 3  ;;  %v6908_v39 = vpack.i.bf16 %v6889_v11, %v6886_v49 }
  0xab   : > { %9819 = vst [vmem:[#allocation111_spill] sm:$0xff] %v6868_v41  ;;  %9820 = vst [vmem:[#allocation112_spill] sm:$0xff] %v6871_v4  ;;  %v6920_v30 = vsel %vm685_vm2, %v697_v28, %v699_v58  ;;  %v6923_v42 = vsel %vm685_vm2, %v699_v58, %v701_v37  ;;  %v709_v4 = vrot.slane %v6398_v25, 3 }
  0xac   : > { %4946 = vrot.lane.b32.xlu1 %v6769_v45, %s6094_s5  ;;  %9821 = vst [vmem:[#allocation113_spill] sm:$0xff] %v6874_v54  ;;  %9822 = vst [vmem:[#allocation114_spill] sm:$0xff] %v6880_v35  ;;  %v707_v54 = vrot.slane %v6384_v20, 3  ;;  %v6940_v58 = vsel %vm685_vm2, %v693_v36, %v695_v10  ;;  %v950_v36 = vld [vmem:[%s9500_s2 + $0x20] sm:$0xff] }
  0xad   : > { %4941 = vrot.lane.b32.xlu0 %v6773_v40, %s6094_s5  ;;  %9823 = vst [vmem:[#allocation115_spill] sm:$0xff] %v6886_v49  ;;  %9824 = vst [vmem:[#allocation116_spill] sm:$0xff] %v6889_v11  ;;  %v948_v11 = vld [vmem:[%s9500_s2 + $0x10] sm:$0xff]  ;;  %v949_v49 = vld [vmem:[%s9500_s2 + $0x18] sm:$0xff]  ;;  %v713_v40 = vrot.slane %v6404_v27, 3 }
  0xae   : > { %9825 = vst [vmem:[#allocation117_spill] sm:$0xff] %v6897_v31  ;;  %9826 = vst [vmem:[#allocation118_spill] sm:$0xff] %v6900_v21  ;;  %v4600_v45 = vpack.c.bf16 %v949_v49, %v948_v11  ;;  %v717_v49 = vrot.slane %v6421_v33, 3  ;;  %v711_v11 = vrot.slane %v6424_v34, 3 }
  0xaf   : > { %9827 = vst [vmem:[#allocation119_spill] sm:$0xff] %v6903_v5  ;;  %9828 = vst [vmem:[#allocation120_spill] sm:$0xff] %v6920_v30 }
  0xb0   : > { %4956 = vrot.lane.b32.xlu1 %v6797_v57, %s6094_s5  ;;  %9829 = vst [vmem:[#allocation121_spill] sm:$0xff] %v6923_v42  ;;  %9831 = vst [vmem:[#allocation123_spill] sm:$0xff] %v6940_v58  ;;  %v6948_v57 = vpack.i.bf16 %v6923_v42, %v6920_v30 }
  0xb1   : > { %4951 = vrot.lane.b32.xlu0 %v6806_v29, %s6094_s5 }
  0xb4   : > { %4966 = vrot.lane.b32.xlu1 %v6827_v23, %s6094_s5  ;;  %v703_v23 = vrot.slane %v6401_v26, 3 }
  0xb5   : > { %4961 = vrot.lane.b32.xlu0 %v6840_v60, %s6094_s5  ;;  %v6943_v60 = vsel %vm685_vm2, %v695_v10, %v697_v28  ;;  %v951_v28 = vld [vmem:[%s9500_s2 + $0x28] sm:$0xff]  ;;  %v6964_v10 = vsel %vm685_vm2, %v707_v54, %v709_v4 }
  0xb6   : > { %9832 = vst [vmem:[#allocation124_spill] sm:$0xff] %v6943_v60  ;;  %9834 = vst [vmem:[#allocation126_spill] sm:$0xff] %v6964_v10  ;;  %v6975_v42 = vsel %vm685_vm2, %v701_v37, %v703_v23  ;;  %v7000_v37 = vsel %vm685_vm2, %v709_v4, %v711_v11 }
  0xb7   : > { %9835 = vst [vmem:[#allocation127_spill] sm:$0xff] %v6975_v42  ;;  %9840 = vst [vmem:[#allocation132_spill] sm:$0xff] %v7000_v37 }
  0xb8   : > { %4976 = vrot.lane.b32.xlu1 %v6851_v46, %s6094_s5  ;;  %v705_v46 = vrot.slane %v6381_v19, 3 }
  0xb9   : > { %4971 = vrot.lane.b32.xlu0 %v6868_v41, %s6094_s5  ;;  %v946_v41 = vld [vmem:[%s9500_s2] sm:$0xff] }
  0xba   : > { %v4596_v29 = vpack.c.bf16 %v947_v55, %v946_v41  ;;  %v6961_v41 = vsel %vm685_vm2, %v705_v46, %v707_v54  ;;  %v6972_v55 = vpack.i.bf16 %v6943_v60, %v6940_v58  ;;  %v6978_v30 = vsel %vm685_vm2, %v703_v23, %v705_v46  ;;  %v953_v23 = vld [vmem:[%s9500_s2 + $0x38] sm:$0xff] }
  0xbb   : > { %9833 = vst [vmem:[#allocation125_spill] sm:$0xff] %v6961_v41  ;;  %9836 = vst [vmem:[#allocation128_spill] sm:$0xff] %v6978_v30  ;;  %v4604_v54 = vpack.c.bf16 %v951_v28, %v950_v36  ;;  %v7003_v36 = vsel %vm685_vm2, %v711_v11, %v713_v40  ;;  %v723_v28 = vrot.slane %v6458_v48, 3  ;;  %v727_v60 = vrot.slane %v6513_v9, 3 }
  0xbc   : > { %4986 = vrot.lane.b32.xlu1 %v6880_v35, %s6094_s5  ;;  %v6937_v35 = vpack.i.bf16 %v6903_v5, %v6900_v21  ;;  %4597 = vmatprep.subr.bf16.mxu0 %v4596_v29  ;;  %v6982_v5 = vpack.i.bf16 %v6964_v10, %v6961_v41  ;;  %9841 = vst [vmem:[#allocation133_spill] sm:$0xff] %v7003_v36  ;;  %v725_v41 = vrot.slane %v6470_v52, 3 }
  0xbd   : > { %4981 = vrot.lane.b32.xlu0 %v6897_v31, %s6094_s5  ;;  %v715_v31 = vrot.slane %v6418_v32, 3  ;;  %4599 = vmatpush3.bf16.msra.mxu0 %v4596_v29  ;;  %v952_v29 = vld [vmem:[%s9500_s2 + $0x30] sm:$0xff]  ;;  %v7010_v10 = vpack.i.bf16 %v6978_v30, %v6975_v42  ;;  %v7020_v11 = vpack.i.bf16 %v7003_v36, %v7000_v37  ;;  %v954_v30 = vld [vmem:[%s9500_s2 + $0x40] sm:$0xff]  ;;  %v955_v42 = vld [vmem:[%s9500_s2 + $0x48] sm:$0xff] }
  0xbe   : > { %9830 = vst [vmem:[#allocation122_spill] sm:$0xff] %v6937_v35  ;;  %4601 = vmatprep.subr.bf16.mxu0 %v4600_v45  ;;  %9837 = vst [vmem:[#allocation129_spill] sm:$0xff] %v6982_v5  ;;  %v4608_v4 = vpack.c.bf16 %v953_v23, %v952_v29  ;;  %v729_v29 = vrot.slane %v6502_v62, 3  ;;  %v731_v23 = vrot.slane %v6505_v63, 3  ;;  %v4612_v58 = vpack.c.bf16 %v955_v42, %v954_v30 }
  0xbf   : > { %v6985_v21 = vsel %vm685_vm2, %v713_v40, %v715_v31  ;;  %v6997_v46 = vsel %vm685_vm2, %v715_v31, %v717_v49  ;;  %9842 = vst [vmem:[#allocation134_spill] sm:$0xff] %v7010_v10  ;;  %v719_v31 = vrot.slane %v6473_v53, 3  ;;  %9843 = vst [vmem:[#allocation135_spill] sm:$0xff] %v7020_v11 }
  0xc0   : > { %4996 = vrot.lane.b32.xlu1 %v6908_v39, %s6095_s10  ;;  %9838 = vst [vmem:[#allocation130_spill] sm:$0xff] %v6985_v21  ;;  %9839 = vst [vmem:[#allocation131_spill] sm:$0xff] %v6997_v46  ;;  %v7016_v40 = vpack.i.bf16 %v6997_v46, %v6985_v21  ;;  %v733_v46 = vrot.slane %v6508_v3, 3  ;;  %v7039_v21 = vsel %vm685_vm2, %v723_v28, %v725_v41 }
  0xc1   : > { %4991 = vrot.lane.b32.xlu0 %v6937_v35, %s6095_s10  ;;  %v721_v35 = vrot.slane %v6449_v43, 3  ;;  %4603 = vmatpush3.bf16.msra.mxu0 %v4600_v45  ;;  %9845 = vst [vmem:[#allocation137_spill] sm:$0xff] %v7039_v21  ;;  %v7042_v36 = vsel %vm685_vm2, %v717_v49, %v719_v31  ;;  %v7066_v42 = vsel %vm685_vm2, %v729_v29, %v731_v23 }
  0xc2   : > { %4605 = vmatprep.subr.bf16.mxu0 %v4604_v54  ;;  %9846 = vst [vmem:[#allocation138_spill] sm:$0xff] %v7042_v36  ;;  %9850 = vst [vmem:[#allocation142_spill] sm:$0xff] %v7066_v42  ;;  %v7069_v49 = vsel %vm685_vm2, %v731_v23, %v733_v46  ;;  %v958_v23 = vld [vmem:[%s9500_s2 + $0x60] sm:$0xff] }
  0xc3   : > { %v7031_v45 = vsel %vm685_vm2, %v721_v35, %v723_v28  ;;  %v7045_v37 = vsel %vm685_vm2, %v719_v31, %v721_v35  ;;  %v957_v28 = vld [vmem:[%s9500_s2 + $0x58] sm:$0xff]  ;;  %9851 = vst [vmem:[#allocation143_spill] sm:$0xff] %v7069_v49  ;;  %v7077_v31 = vsel %vm685_vm2, %v727_v60, %v729_v29 }
  0xc4   : > { %5006 = vrot.lane.b32.xlu1 %v6948_v57, %s6095_s10  ;;  %9844 = vst [vmem:[#allocation136_spill] sm:$0xff] %v7031_v45  ;;  %9847 = vst [vmem:[#allocation139_spill] sm:$0xff] %v7045_v37  ;;  %v7059_v35 = vpack.i.bf16 %v7039_v21, %v7031_v45  ;;  %v7063_v30 = vpack.i.bf16 %v7045_v37, %v7042_v36  ;;  %v739_v21 = vrot.slane %v6547_v47, 3  ;;  %v741_v45 = vrot.slane %v6550_v56, 3 }
  0xc5   : > { %5001 = vrot.lane.b32.xlu0 %v6972_v55, %s6095_s10  ;;  %4607 = vmatpush3.bf16.msra.mxu0 %v4604_v54  ;;  %v7074_v54 = vsel %vm685_vm2, %v725_v41, %v727_v60  ;;  %9853 = vst [vmem:[#allocation145_spill] sm:$0xff] %v7077_v31  ;;  %v735_v37 = vrot.slane %v6554_v61, 3  ;;  %v959_v41 = vld [vmem:[%s9500_s2 + $0x68] sm:$0xff]  ;;  %v7092_v60 = vpack.i.bf16 %v7069_v49, %v7066_v42  ;;  %v749_v49 = vrot.slane %v6591_v24, 3 }
  0xc6   : > { %4609 = vmatprep.subr.bf16.mxu0 %v4608_v4  ;;  %9848 = vst [vmem:[#allocation140_spill] sm:$0xff] %v7059_v35  ;;  %9849 = vst [vmem:[#allocation141_spill] sm:$0xff] %v7063_v30 }
  0xc7   : > { %9852 = vst [vmem:[#allocation144_spill] sm:$0xff] %v7074_v54  ;;  %v7110_v42 = vsel %vm685_vm2, %v733_v46, %v735_v37 }
  0xc8   : > { %5016 = vrot.lane.b32.xlu1 %v6982_v5, %s6095_s10  ;;  %v737_v5 = vrot.slane %v6532_v38, 3  ;;  %9856 = vst [vmem:[#allocation148_spill] sm:$0xff] %v7110_v42 }
  0xc9   : > { %5011 = vrot.lane.b32.xlu0 %v7010_v10, %s6095_s10  ;;  %v956_v10 = vld [vmem:[%s9500_s2 + $0x50] sm:$0xff]  ;;  %4611 = vmatpush3.bf16.msra.mxu0 %v4608_v4  ;;  %v7096_v4 = vpack.i.bf16 %v7077_v31, %v7074_v54  ;;  %v743_v54 = vrot.slane %v6594_v44, 3 }
  0xca   : > { %4613 = vmatprep.subr.bf16.mxu0 %v4612_v58  ;;  %v4616_v36 = vpack.c.bf16 %v957_v28, %v956_v10  ;;  %v745_v10 = vrot.slane %v6583_v17, 3  ;;  %v7102_v29 = vsel %vm685_vm2, %v737_v5, %v739_v21  ;;  %v7105_v28 = vsel %vm685_vm2, %v739_v21, %v741_v45  ;;  %v960_v21 = vld [vmem:[%s9500_s2 + $0x70] sm:$0xff] }
  0xcb   : > { %9854 = vst [vmem:[#allocation146_spill] sm:$0xff] %v7102_v29  ;;  %9855 = vst [vmem:[#allocation147_spill] sm:$0xff] %v7105_v28  ;;  %v7113_v31 = vsel %vm685_vm2, %v735_v37, %v737_v5  ;;  %v7126_v24 = vpack.i.bf16 %v7105_v28, %v7102_v29  ;;  %v7141_v37 = vsel %vm685_vm2, %v741_v45, %v743_v54 }
  0xcc   : > { %5026 = vrot.lane.b32.xlu1 %v7016_v40, %s6095_s10  ;;  %9857 = vst [vmem:[#allocation149_spill] sm:$0xff] %v7113_v31  ;;  %v7132_v5 = vpack.i.bf16 %v7113_v31, %v7110_v42  ;;  %9860 = vst [vmem:[#allocation152_spill] sm:$0xff] %v7141_v37  ;;  %v5070_v45 = vpack.i.bf16 %v6355_v7, %v6352_v6  ;;  %v5090_v6 = vpack.i.bf16 %v6401_v26, %v6367_v13  ;;  %v4025_v26 = vld [vmem:[%s9500_s2 + $0x80] sm:$0xff] }
  0xcd   : > { %5021 = vrot.lane.b32.xlu0 %v7020_v11, %s6095_s10  ;;  %4615 = vmatpush3.bf16.msra.mxu0 %v4612_v58  ;;  %v961_v11 = vld [vmem:[%s9500_s2 + $0x78] sm:$0xff]  ;;  %v5110_v7 = vpack.i.bf16 %v6473_v53, %v6421_v33  ;;  %v5120_v13 = vpack.i.bf16 %v6513_v9, %v6470_v52  ;;  %v4027_v52 = vld [vmem:[%s9500_s2 + $0x90] sm:$0xff] }
  0xce   : > { %4617 = vmatprep.subr.bf16.mxu0 %v4616_v36  ;;  %v4028_v53 = vld [vmem:[%s9500_s2 + $0x98] sm:$0xff]  ;;  %v9876_v29 = vld [vmem:[#allocation140_spill] sm:$0xff] }
  0xcf   : > { %v9877_v42 = vld [vmem:[#allocation141_spill] sm:$0xff] }
  0xd0   : > { %5036 = vrot.lane.b32.xlu1 %v7059_v35, %s6095_s10  ;;  %v747_v35 = vrot.slane %v6587_v51, 3 }
  0xd1   : > { %5031 = vrot.lane.b32.xlu0 %v7063_v30, %s6095_s10  ;;  %v4620_v30 = vpack.c.bf16 %v959_v41, %v958_v23  ;;  %4619 = vmatpush3.bf16.msra.mxu0 %v4616_v36  ;;  %v7144_v23 = vsel %vm685_vm2, %v743_v54, %v745_v10  ;;  %v4624_v41 = vpack.c.bf16 %v961_v11, %v960_v21  ;;  %v4034_v21 = vld [vmem:[%s9500_s2 + $0xc8] sm:$0xff] }
  0xd2   : > { %v7135_v58 = vsel %vm685_vm2, %v745_v10, %v747_v35  ;;  %v7138_v46 = vsel %vm685_vm2, %v747_v35, %v749_v49  ;;  %9861 = vst [vmem:[#allocation153_spill] sm:$0xff] %v7144_v23  ;;  %v7156_v36 = vpack.i.bf16 %v7144_v23, %v7141_v37  ;;  %v5075_v11 = vpack.i.bf16 %v6370_v14, %v6358_v8  ;;  %v4033_v10 = vld [vmem:[%s9500_s2 + $0xc0] sm:$0xff] }
  0xd3   : > { %9858 = vst [vmem:[#allocation150_spill] sm:$0xff] %v7135_v58  ;;  %9859 = vst [vmem:[#allocation151_spill] sm:$0xff] %v7138_v46  ;;  %4621 = vmatprep.subr.bf16.mxu0 %v4620_v30  ;;  %v7150_v28 = vpack.i.bf16 %v7138_v46, %v7135_v58  ;;  %v5085_v35 = vpack.i.bf16 %v6364_v12, %v6346_v2  ;;  %v5095_v8 = vpack.i.bf16 %v6384_v20, %v6381_v19 }
  0xd4   : > { %5046 = vrot.lane.b32.xlu1 %v7092_v60, %s6095_s10  ;;  %v5105_v2 = vpack.i.bf16 %v6418_v32, %v6404_v27  ;;  %v5125_v12 = vpack.i.bf16 %v6505_v63, %v6502_v62  ;;  %v5135_v20 = vpack.i.bf16 %v6547_v47, %v6532_v38  ;;  %v4026_v27 = vld [vmem:[%s9500_s2 + $0x88] sm:$0xff]  ;;  %v4632_v63 = vpack.c.bf16 %v4028_v53, %v4027_v52  ;;  %v4031_v38 = vld [vmem:[%s9500_s2 + $0xb0] sm:$0xff]  ;;  %v4032_v47 = vld [vmem:[%s9500_s2 + $0xb8] sm:$0xff] }
  0xd5   : > { %5041 = vrot.lane.b32.xlu0 %v7096_v4, %s6095_s10  ;;  %4623 = vmatpush3.bf16.msra.mxu0 %v4620_v30  ;;  %v5080_v30 = vpack.i.bf16 %v6343_v1, %v6340_v0  ;;  %v5100_v0 = vpack.i.bf16 %v6424_v34, %v6398_v25  ;;  %v5115_v1 = vpack.i.bf16 %v6458_v48, %v6449_v43 }
  0xd6   : > { %4625 = vmatprep.subr.bf16.mxu0 %v4624_v41  ;;  %v5130_v25 = vpack.i.bf16 %v6554_v61, %v6508_v3  ;;  %v4628_v33 = vpack.c.bf16 %v4026_v27, %v4025_v26  ;;  %v5145_v43 = vpack.i.bf16 %v6587_v51, %v6583_v17  ;;  %v5140_v48 = vpack.i.bf16 %v6594_v44, %v6550_v56  ;;  %v4029_v44 = vld [vmem:[%s9500_s2 + $0xa0] sm:$0xff]  ;;  %v4030_v51 = vld [vmem:[%s9500_s2 + $0xa8] sm:$0xff]  ;;  %v9864_v26 = vld [vmem:[#allocation96_spill] sm:$0xff] }
  0xd7   : > { %v4636_v9 = vpack.c.bf16 %v4030_v51, %v4029_v44  ;;  %v4640_v49 = vpack.c.bf16 %v4032_v47, %v4031_v38  ;;  %v9865_v27 = vld [vmem:[#allocation97_spill] sm:$0xff]  ;;  %v9868_v38 = vld [vmem:[#allocation108_spill] sm:$0xff]  ;;  %v9869_v47 = vld [vmem:[#allocation111_spill] sm:$0xff] }
  0xd8   : > { %5056 = vrot.lane.b32.xlu1 %v7126_v24, %s6095_s10  ;;  %4629 = vmatprep.subr.bf16.mxu1 %v4628_v33  ;;  %v9867_v44 = vld [vmem:[#allocation105_spill] sm:$0xff] }
  0xd9   : > { %5051 = vrot.lane.b32.xlu0 %v7132_v5, %s6095_s10  ;;  %4627 = vmatpush3.bf16.msra.mxu0 %v4624_v41 }
  0xda   : > { %4631 = vmatpush3.bf16.msra.mxu1 %v4628_v33  ;;  %v4039_v33 = vld [vmem:[%s9500_s2 + $0xf0] sm:$0xff] }
  0xdb   : > { %4633 = vmatprep.subr.bf16.mxu1 %v4632_v63 }
  0xdc   : > { %5066 = vrot.lane.b32.xlu1 %v7150_v28, %s6095_s10 }
  0xdd   : > { %5061 = vrot.lane.b32.xlu0 %v7156_v36, %s6095_s10 }
  0xde   : > { %4635 = vmatpush3.bf16.msra.mxu1 %v4632_v63  ;;  %v9866_v63 = vld [vmem:[#allocation102_spill] sm:$0xff] }
  0xdf   : > { %4637 = vmatprep.subr.bf16.mxu1 %v4636_v9 }
  0xe0   : > { %5076 = vrot.lane.b32.xlu1 %v5075_v11, %s6095_s10  ;;  %v4644_v11 = vpack.c.bf16 %v4034_v21, %v4033_v10  ;;  %v9870_v21 = vld [vmem:[#allocation114_spill] sm:$0xff] }
  0xe1   : > { %5071 = vrot.lane.b32.xlu0 %v5070_v45, %s6095_s10 }
  0xe2   : > { %4639 = vmatpush3.bf16.msra.mxu1 %v4636_v9 }
  0xe3   : > { %4641 = vmatprep.subr.bf16.mxu1 %v4640_v49 }
  0xe4   : > { %5086 = vrot.lane.b32.xlu1 %v5085_v35, %s6095_s10  ;;  %v4035_v35 = vld [vmem:[%s9500_s2 + $0xd0] sm:$0xff] }
  0xe5   : > { %5081 = vrot.lane.b32.xlu0 %v5080_v30, %s6095_s10  ;;  %v4036_v30 = vld [vmem:[%s9500_s2 + $0xd8] sm:$0xff] }
  0xe6   : > { %4643 = vmatpush3.bf16.msra.mxu1 %v4640_v49 }
  0xe7   : > { %4645 = vmatprep.subr.bf16.mxu1 %v4644_v11 }
  0xe8   : > { %5096 = vrot.lane.b32.xlu1 %v5095_v8, %s6095_s10 }
  0xe9   : > { %5091 = vrot.lane.b32.xlu0 %v5090_v6, %s6095_s10  ;;  %v4648_v6 = vpack.c.bf16 %v4036_v30, %v4035_v35 }
  0xea   : > { %4647 = vmatpush3.bf16.msra.mxu1 %v4644_v11  ;;  %v9871_v11 = vld [vmem:[#allocation117_spill] sm:$0xff] }
  0xeb   : > { %4649 = vmatprep.subr.bf16.mxu1 %v4648_v6 }
  0xec   : > { %5106 = vrot.lane.b32.xlu1 %v5105_v2, %s6095_s10 }
  0xed   : > { %5101 = vrot.lane.b32.xlu0 %v5100_v0, %s6095_s10  ;;  %v9862_v0 = vld [vmem:[#allocation90_spill] sm:$0xff] }
  0xee   : > { %4651 = vmatpush3.bf16.msra.mxu1 %v4648_v6  ;;  %v9872_v6 = vld [vmem:[#allocation122_spill] sm:$0xff] }
  0xf0   : > { %5116 = vrot.lane.b32.xlu1 %v5115_v1, %s6095_s10  ;;  %v9863_v1 = vld [vmem:[#allocation91_spill] sm:$0xff] }
  0xf1   : > { %5111 = vrot.lane.b32.xlu0 %v5110_v7, %s6095_s10  ;;  %v4037_v7 = vld [vmem:[%s9500_s2 + $0xe0] sm:$0xff] }
  0xf2   : > { %v7196_v14 = vpop.permute.xlu1 %4841 }
  0xf3   : > { %v7198_v19 = vpop.permute.xlu0 %4831 }
  0xf4   : > { %5126 = vrot.lane.b32.xlu1 %v5125_v12, %s6095_s10  ;;  %v4038_v12 = vld [vmem:[%s9500_s2 + $0xe8] sm:$0xff]  ;;  %v4833_v23 = vunpack.i.l.bf16 %v7198_v19 }
  0xf5   : > { %5121 = vrot.lane.b32.xlu0 %v5120_v13, %s6095_s10 }
  0xf6   : > { %v7212_v32 = vpop.permute.xlu1 %4846 }
  0xf7   : > { %v7214_v34 = vpop.permute.xlu0 %4836 }
  0xf8   : > { %5136 = vrot.lane.b32.xlu1 %v5135_v20, %s6095_s10  ;;  %v4652_v20 = vpack.c.bf16 %v4038_v12, %v4037_v7 }
  0xf9   : > { %5131 = vrot.lane.b32.xlu0 %v5130_v25, %s6095_s10 }
  0xfa   : > { %v7228_v62 = vpop.permute.xlu1 %4856  ;;  %4653 = vmatprep.subr.bf16.mxu1 %v4652_v20 }
  0xfb   : > { %v7230_v3 = vpop.permute.xlu0 %4851  ;;  %4655 = vmatpush3.bf16.msra.mxu1 %v4652_v20 }
  0xfc   : > { %5146 = vrot.lane.b32.xlu1 %v5145_v43, %s6095_s10  ;;  %v4040_v43 = vld [vmem:[%s9500_s2 + $0xf8] sm:$0xff] }
  0xfd   : > { %5141 = vrot.lane.b32.xlu0 %v5140_v48, %s6095_s10  ;;  %v4656_v52 = vpack.c.bf16 %v4040_v43, %v4039_v33  ;;  %v9873_v43 = vld [vmem:[#allocation129_spill] sm:$0xff] }
  0xfe   : > { %v7240_v56 = vpop.permute.xlu1 %4866 }
  0xff   : > { %v7242_v17 = vpop.permute.xlu0 %4861  ;;  %4657 = vmatprep.subr.bf16.mxu1 %v4656_v52 }
 0x100   : > { %5156 = vrot.lane.b32.xlu1 %v6683_v15, %s6093_s9  ;;  %4659 = vmatpush3.bf16.msra.mxu1 %v4656_v52  ;;  %v9874_v52 = vld [vmem:[#allocation134_spill] sm:$0xff] }
 0x101   : > { %5151 = vrot.lane.b32.xlu0 %v6700_v59, %s6093_s9 }
 0x102   : > { %v7254_v61 = vpop.permute.xlu1 %4876 }
 0x103   : > { %v7256_v54 = vpop.permute.xlu0 %4871 }
 0x104   : > { %5166 = vrot.lane.b32.xlu1 %v6711_v16, %s6093_s9  ;;  %v4848_v16 = vunpack.i.l.bf16 %v7212_v32 }
 0x105   : > { %5161 = vrot.lane.b32.xlu0 %v6729_v50, %s6093_s9  ;;  %v4839_v50 = vunpack.i.h.bf16 %v7214_v34 }
 0x106   : > { %v7268_v41 = vpop.permute.xlu1 %4886 }
 0x107   : > { %v7270_v45 = vpop.permute.xlu0 %4881 }
 0x108   : > { %5176 = vrot.lane.b32.xlu1 %v6739_v22, %s6093_s9 }
 0x109   : > { %5171 = vrot.lane.b32.xlu0 %v6745_v18, %s6093_s9 }
 0x10a   : > { %v7282_v8 = vpop.permute.xlu1 %4896 }
 0x10b   : > { %v7284_v2 = vpop.permute.xlu0 %4891 }
 0x10c   : > { %5186 = vrot.lane.b32.xlu1 %v9862_v0, %s6093_s9  ;;  %v7378_v0 = vld [vmem:[%s6325_s28] sm:$0xff] }
 0x10d   : > { %5181 = vrot.lane.b32.xlu0 %v9863_v1, %s6093_s9 }
 0x10e   : > { %v7296_v13 = vpop.permute.xlu1 %4906 }
 0x10f   : > { %v7298_v25 = vpop.permute.xlu0 %4901 }
 0x110   : > { %5196 = vrot.lane.b32.xlu1 %v9864_v26, %s6093_s9  ;;  %v4843_v26 = vunpack.i.l.bf16 %v7196_v14 }
 0x111   : > { %5191 = vrot.lane.b32.xlu0 %v9865_v27, %s6093_s9 }
 0x112   : > { %v7310_v48 = vpop.permute.xlu1 %4916 }
 0x113   : > { %v4912_v53 = vpop.permute.xlu0 %4911  ;;  %v4918_v27 = vunpack.i.l.bf16 %v7310_v48 }
 0x114   : > { %5206 = vrot.lane.b32.xlu1 %v9866_v63, %s6093_s9  ;;  %v4913_v31 = vunpack.i.l.bf16 %v4912_v53  ;;  %v4838_v63 = vunpack.i.l.bf16 %v7214_v34 }
 0x115   : > { %5201 = vrot.lane.b32.xlu0 %v9867_v44, %s6093_s9 }
 0x116   : > { %v7316_v51 = vpop.permute.xlu1 %4926 }
 0x117   : > { %v7318_v9 = vpop.permute.xlu0 %4921 }
 0x118   : > { %5216 = vrot.lane.b32.xlu1 %v9868_v38, %s6093_s9  ;;  %v4834_v38 = vunpack.i.h.bf16 %v7198_v19 }
 0x119   : > { %5211 = vrot.lane.b32.xlu0 %v9869_v47, %s6093_s9  ;;  %v4914_v47 = vunpack.i.h.bf16 %v4912_v53 }
 0x11a   : > { %v7324_v49 = vpop.permute.xlu1 %4936 }
 0x11b   : > { %v7326_v10 = vpop.permute.xlu0 %4931 }
 0x11c   : > { %5226 = vrot.lane.b32.xlu1 %v9870_v21, %s6093_s9 }
 0x11d   : > { %5221 = vrot.lane.b32.xlu0 %v9871_v11, %s6093_s9  ;;  %v9875_v11 = vld [vmem:[#allocation135_spill] sm:$0xff] }
 0x11e   : > { %v7332_v35 = vpop.permute.xlu1 %4946 }
 0x11f   : > { %v7334_v30 = vpop.permute.xlu0 %4941 }
 0x120   : > { %5236 = vrot.lane.b32.xlu1 %v6908_v39, %s6094_s5 }
 0x121   : > { %5231 = vrot.lane.b32.xlu0 %v9872_v6, %s6094_s5 }
 0x122   : > { %v7340_v7 = vpop.permute.xlu1 %4956 }
 0x123   : > { %v7342_v12 = vpop.permute.xlu0 %4951 }
 0x124   : > { %5246 = vrot.lane.b32.xlu1 %v6948_v57, %s6094_s5 }
 0x125   : > { %5241 = vrot.lane.b32.xlu0 %v6972_v55, %s6094_s5 }
 0x126   : > { %v7348_v20 = vpop.permute.xlu1 %4966 }
 0x127   : > { %v7350_v33 = vpop.permute.xlu0 %4961 }
 0x128   : > { %5256 = vrot.lane.b32.xlu1 %v9873_v43, %s6094_s5 }
 0x129   : > { %5251 = vrot.lane.b32.xlu0 %v9874_v52, %s6094_s5 }
 0x12a   : > { %v7356_v21 = vpop.permute.xlu1 %4976 }
 0x12b   : > { %v7358_v46 = vpop.permute.xlu0 %4971 }
 0x12c   : > { %5266 = vrot.lane.b32.xlu1 %v7016_v40, %s6094_s5 }
 0x12d   : > { %5261 = vrot.lane.b32.xlu0 %v9875_v11, %s6094_s5  ;;  %v7401_v11 = vld [vmem:[%s6325_s28 + $0x10] sm:$0xff] }
 0x12e   : > { %v7364_v58 = vpop.permute.xlu1 %4986  ;;  %v850_v34 = vsel %vm847_vm3, %v7401_v11, %v4838_v63  ;;  %v4924_v63 = vunpack.i.h.bf16 %v7318_v9 }
 0x12f   : > { %v7367_v37 = vpop.permute.xlu0 %4981 }
 0x130   : > { %5276 = vrot.lane.b32.xlu1 %v9876_v29, %s6094_s5  ;;  %v848_v29 = vsel %vm847_vm3, %v7378_v0, %v4833_v23 }
 0x131   : > { %5271 = vrot.lane.b32.xlu0 %v9877_v42, %s6094_s5  ;;  %v7385_v42 = vld [vmem:[%s6325_s28 + $0x8] sm:$0xff]  ;;  %v881_v23 = vsel %vm880_vm4, %v848_v29, %v4913_v31  ;;  %v4923_v31 = vunpack.i.l.bf16 %v7318_v9 }
 0x132   : > { %v4997_v44 = vpop.permute.xlu1 %4996  ;;  %v849_v18 = vsel %vm847_vm3, %v7385_v42, %v4834_v38 }
 0x133   : > { %v4992_v19 = vpop.permute.xlu0 %4991  ;;  %v4998_v53 = vunpack.i.l.bf16 %v4997_v44  ;;  %v882_v15 = vsel %vm880_vm4, %v849_v18, %v4914_v47  ;;  %v4999_v18 = vunpack.i.h.bf16 %v4997_v44 }
 0x134   : > { %v4994_v1 = vunpack.i.h.bf16 %v4992_v19  ;;  %v4993_v22 = vunpack.i.l.bf16 %v4992_v19  ;;  %5286 = vrot.lane.b32.xlu1 %v7092_v60, %s6094_s5  ;;  %v4919_v19 = vunpack.i.h.bf16 %v7310_v48  ;;  %v883_v48 = vsel %vm880_vm4, %v850_v34, %v4918_v27  ;;  %v7421_v27 = vld [vmem:[%s6325_s28 + $0x18] sm:$0xff] }
 0x135   : > { %5281 = vrot.lane.b32.xlu0 %v7096_v4, %s6094_s5  ;;  %v4844_v4 = vunpack.i.h.bf16 %v7196_v14 }
 0x136   : > { %v7396_v60 = vpop.permute.xlu1 %5006  ;;  %v914_v59 = vsel %vm913_vm5, %v881_v23, %v4993_v22  ;;  %v915_v38 = vsel %vm913_vm5, %v882_v15, %v4994_v1  ;;  %v916_v15 = vsel %vm913_vm5, %v883_v48, %v4998_v53  ;;  %v7412_v22 = vld [vmem:[%s6325_s28 + $0x20] sm:$0xff]  ;;  %v4849_v1 = vunpack.i.h.bf16 %v7212_v32  ;;  %v7430_v53 = vld [vmem:[%s6325_s28 + $0x30] sm:$0xff] }
 0x137   : > { %v5002_v47 = vpop.permute.xlu0 %5001  ;;  %4308 = vmatprep.mubr.f32.mxu0 %v914_v59  ;;  %9878 = vst [vmem:[#allocation122_spill] sm:$0xff] %v7412_v22  ;;  %v852_v14 = vsel %vm847_vm3, %v7412_v22, %v4843_v26  ;;  %v4928_v59 = vunpack.i.l.bf16 %v7316_v51  ;;  %9879 = vst [vmem:[#allocation129_spill] sm:$0xff] %v7430_v53  ;;  %v854_v32 = vsel %vm847_vm3, %v7430_v53, %v4848_v16  ;;  %v5008_v48 = vunpack.i.l.bf16 %v7396_v60 }
 0x138   : > { %v5003_v29 = vunpack.i.l.bf16 %v5002_v47  ;;  %4309 = vmatmul.mubr.f32.vlgmr.msra.gmra.mrb[0].mxu0 %v915_v38  ;;  %5296 = vrot.lane.b32.xlu1 %v7126_v24, %s6094_s5  ;;  %v851_v24 = vsel %vm847_vm3, %v7421_v27, %v4839_v50  ;;  %v5004_v23 = vunpack.i.h.bf16 %v5002_v47  ;;  %v885_v34 = vsel %vm880_vm4, %v852_v14, %v4923_v31  ;;  %v7439_v50 = vld [vmem:[%s6325_s28 + $0x28] sm:$0xff]  ;;  %v7456_v31 = vld [vmem:[%s6325_s28 + $0x38] sm:$0xff] }
 0x139   : > { %5291 = vrot.lane.b32.xlu0 %v7132_v5, %s6094_s5  ;;  %4311 = vmatprep.mubr.f32.mxu0 %v916_v15  ;;  %v884_v26 = vsel %vm880_vm4, %v851_v24, %v4919_v19  ;;  %9880 = vst [vmem:[#allocation134_spill] sm:$0xff] %v7439_v50  ;;  %v853_v9 = vsel %vm847_vm3, %v7439_v50, %v4844_v4  ;;  %v4929_v19 = vunpack.i.h.bf16 %v7316_v51  ;;  %9881 = vst [vmem:[#allocation140_spill] sm:$0xff] %v7456_v31 }
 0x13a   : > { %v7426_v44 = vpop.permute.xlu1 %5016  ;;  %v917_v38 = vsel %vm913_vm5, %v884_v26, %v4999_v18  ;;  %v918_v16 = vsel %vm913_vm5, %v885_v34, %v5003_v29  ;;  %v5315_v18 = vpack.i.bf16 %v7421_v27, %v7401_v11  ;;  %v5310_v4 = vpack.i.bf16 %v7385_v42, %v7378_v0 }
 0x13b   : > { %v7434_v5 = vpop.permute.xlu0 %5011  ;;  %v887_v51 = vsel %vm880_vm4, %v854_v32, %v4928_v59  ;;  %v855_v47 = vsel %vm847_vm3, %v7456_v31, %v4849_v1  ;;  %v4853_v29 = vunpack.i.l.bf16 %v7230_v3  ;;  %v886_v14 = vsel %vm880_vm4, %v853_v9, %v4924_v63 }
 0x13c   : > { %4312 = vmatmul.mubr.f32.gmra.mrb[2].mxu0 %v917_v38  ;;  %5306 = vrot.lane.b32.xlu1 %v7150_v28, %s6094_s5  ;;  %v4858_v28 = vunpack.i.l.bf16 %v7228_v62  ;;  %v5009_v24 = vunpack.i.h.bf16 %v7396_v60  ;;  %v919_v59 = vsel %vm913_vm5, %v886_v14, %v5004_v23  ;;  %v5013_v32 = vunpack.i.l.bf16 %v7434_v5  ;;  %v7501_v14 = vld [vmem:[%s6325_s28 + $0x58] sm:$0xff] }
 0x13d   : > { %5301 = vrot.lane.b32.xlu0 %v7156_v36, %s6094_s5  ;;  %4314 = vmatprep.mubr.f32.mxu0 %v918_v16  ;;  %v4933_v36 = vunpack.i.l.bf16 %v7326_v10  ;;  %v920_v1 = vsel %vm913_vm5, %v887_v51, %v5008_v48  ;;  %v888_v38 = vsel %vm880_vm4, %v855_v47, %v4929_v19  ;;  %v5325_v63 = vpack.i.bf16 %v7456_v31, %v7430_v53  ;;  %v7486_v19 = vld [vmem:[%s6325_s28 + $0x40] sm:$0xff] }
 0x13e   : > { %v7462_v15 = vpop.permute.xlu1 %5026  ;;  %v4859_v60 = vunpack.i.h.bf16 %v7228_v62  ;;  %v4854_v34 = vunpack.i.h.bf16 %v7230_v3  ;;  %v4938_v23 = vunpack.i.l.bf16 %v7324_v49  ;;  %v5320_v9 = vpack.i.bf16 %v7439_v50, %v7412_v22  ;;  %9882 = vst [vmem:[#allocation141_spill] sm:$0xff] %v7486_v19  ;;  %9884 = vst [vmem:[#allocation155_spill] sm:$0xff] %v7501_v14 }
 0x13f   : > { %v7467_v26 = vpop.permute.xlu0 %5021  ;;  %v4934_v48 = vunpack.i.h.bf16 %v7326_v10  ;;  %v856_v62 = vsel %vm847_vm3, %v7486_v19, %v4853_v29  ;;  %v921_v47 = vsel %vm913_vm5, %v888_v38, %v5009_v24  ;;  %v4939_v29 = vunpack.i.h.bf16 %v7324_v49 }
 0x140   : > { %4315 = vmatmul.mubr.f32.gmra.mrb[4].mxu0 %v919_v59  ;;  %5316 = vrot.lane.b32.xlu1 %v5315_v18, %s6094_s5  ;;  %v7491_v18 = vld [vmem:[%s6325_s28 + $0x50] sm:$0xff]  ;;  %v889_v10 = vsel %vm880_vm4, %v856_v62, %v4933_v36  ;;  %v859_v38 = vsel %vm847_vm3, %v7501_v14, %v4859_v60  ;;  %v5023_v60 = vunpack.i.l.bf16 %v7467_v26  ;;  %v4949_v31 = vunpack.i.h.bf16 %v7332_v35 }
 0x141   : > { %5311 = vrot.lane.b32.xlu0 %v5310_v4, %s6094_s5  ;;  %4317 = vmatprep.mubr.f32.mxu0 %v920_v1  ;;  %9883 = vst [vmem:[#allocation154_spill] sm:$0xff] %v7491_v18  ;;  %v858_v3 = vsel %vm847_vm3, %v7491_v18, %v4858_v28  ;;  %v5014_v4 = vunpack.i.h.bf16 %v7434_v5  ;;  %v5335_v59 = vpack.i.bf16 %v7501_v14, %v7491_v18  ;;  %v5018_v1 = vunpack.i.l.bf16 %v7426_v44  ;;  %v7510_v28 = vld [vmem:[%s6325_s28 + $0x48] sm:$0xff] }
 0x142   : > { %v7483_v16 = vpop.permute.xlu1 %5036  ;;  %v922_v5 = vsel %vm913_vm5, %v889_v10, %v5013_v32  ;;  %9885 = vst [vmem:[#allocation156_spill] sm:$0xff] %v7510_v28  ;;  %v5330_v24 = vpack.i.bf16 %v7510_v28, %v7486_v19  ;;  %v857_v36 = vsel %vm847_vm3, %v7510_v28, %v4854_v34  ;;  %v891_v49 = vsel %vm880_vm4, %v858_v3, %v4938_v23  ;;  %v5870_v28 = vld [vmem:[%s6325_s28 + $0x90] sm:$0xff] }
 0x143   : > { %v7496_v51 = vpop.permute.xlu0 %5031  ;;  %v4868_v32 = vunpack.i.l.bf16 %v7240_v56  ;;  %v5019_v10 = vunpack.i.h.bf16 %v7426_v44  ;;  %v924_v3 = vsel %vm913_vm5, %v891_v49, %v5018_v1  ;;  %v4869_v14 = vunpack.i.h.bf16 %v7240_v56  ;;  %v7547_v1 = vld [vmem:[%s6325_s28 + $0x68] sm:$0xff] }
 0x144   : > { %4318 = vmatmul.mubr.f32.gmra.mrb[6].mxu0 %v921_v47  ;;  %5326 = vrot.lane.b32.xlu1 %v5325_v63, %s6094_s5  ;;  %v4863_v63 = vunpack.i.l.bf16 %v7242_v17  ;;  %v890_v47 = vsel %vm880_vm4, %v857_v36, %v4934_v48  ;;  %v7535_v48 = vld [vmem:[%s6325_s28 + $0x70] sm:$0xff]  ;;  %v5867_v36 = vld [vmem:[%s6325_s28 + $0x78] sm:$0xff]  ;;  %v4864_v18 = vunpack.i.h.bf16 %v7242_v17  ;;  %9888 = vst [vmem:[#allocation159_spill] sm:$0xff] %v7547_v1  ;;  %v4944_v49 = vunpack.i.h.bf16 %v7334_v30 }
 0x145   : > { %5321 = vrot.lane.b32.xlu0 %v5320_v9, %s6094_s5  ;;  %4320 = vmatprep.mubr.f32.mxu0 %v922_v5  ;;  %v4943_v9 = vunpack.i.l.bf16 %v7334_v30  ;;  %v923_v23 = vsel %vm913_vm5, %v890_v47, %v5014_v4  ;;  %v892_v5 = vsel %vm880_vm4, %v859_v38, %v4939_v29  ;;  %9886 = vst [vmem:[#allocation157_spill] sm:$0xff] %v7535_v48  ;;  %v4948_v4 = vunpack.i.l.bf16 %v7332_v35  ;;  %v7565_v30 = vld [vmem:[%s6325_s28 + $0x98] sm:$0xff] }
 0x146   : > { %v7522_v62 = vpop.permute.xlu1 %5046  ;;  %v5345_v44 = vpack.i.bf16 %v5867_v36, %v7535_v48  ;;  %v5024_v38 = vunpack.i.h.bf16 %v7467_v26  ;;  %v5355_v19 = vpack.i.bf16 %v7565_v30, %v5870_v28  ;;  %v4959_v50 = vunpack.i.h.bf16 %v7340_v7 }
 0x147   : > { %v7527_v34 = vpop.permute.xlu0 %5041 }
 0x148   : > { %4321 = vmatmul.mubr.f32.gmra.mrb[8].mxu0 %v923_v23  ;;  %5336 = vrot.lane.b32.xlu1 %v5335_v59, %s6094_s5  ;;  %v7544_v59 = vld [vmem:[%s6325_s28 + $0x60] sm:$0xff]  ;;  %v925_v23 = vsel %vm913_vm5, %v892_v5, %v5019_v10  ;;  %v863_v5 = vsel %vm847_vm3, %v5867_v36, %v4869_v14  ;;  %v5033_v14 = vunpack.i.l.bf16 %v7496_v51 }
 0x149   : > { %5331 = vrot.lane.b32.xlu0 %v5330_v24, %s6094_s5  ;;  %4323 = vmatprep.mubr.f32.mxu0 %v924_v3  ;;  %9887 = vst [vmem:[#allocation158_spill] sm:$0xff] %v7544_v59  ;;  %v5340_v29 = vpack.i.bf16 %v7547_v1, %v7544_v59  ;;  %v860_v17 = vsel %vm847_vm3, %v7544_v59, %v4863_v63  ;;  %v5028_v63 = vunpack.i.l.bf16 %v7462_v15  ;;  %v7625_v59 = vld [vmem:[%s6325_s28 + $0xd0] sm:$0xff] }
 0x14a   : > { %v7552_v56 = vpop.permute.xlu1 %5056  ;;  %v862_v24 = vsel %vm847_vm3, %v7535_v48, %v4868_v32  ;;  %v893_v3 = vsel %vm880_vm4, %v860_v17, %v4943_v9  ;;  %v7573_v32 = vld [vmem:[%s6325_s28 + $0x80] sm:$0xff]  ;;  %v5873_v48 = vld [vmem:[%s6325_s28 + $0x88] sm:$0xff]  ;;  %v861_v9 = vsel %vm847_vm3, %v7547_v1, %v4864_v18 }
 0x14b   : > { %v7559_v47 = vpop.permute.xlu0 %5051  ;;  %v926_v26 = vsel %vm913_vm5, %v893_v3, %v5023_v60  ;;  %9889 = vst [vmem:[#allocation160_spill] sm:$0xff] %v7573_v32  ;;  %v5350_v10 = vpack.i.bf16 %v5873_v48, %v7573_v32  ;;  %v895_v35 = vsel %vm880_vm4, %v862_v24, %v4948_v4  ;;  %v4873_v60 = vunpack.i.l.bf16 %v7256_v54 }
 0x14c   : > { %4324 = vmatmul.mubr.f32.gmra.mrb[10].mxu0 %v925_v23  ;;  %5346 = vrot.lane.b32.xlu1 %v5345_v44, %s6094_s5  ;;  %v4878_v44 = vunpack.i.l.bf16 %v7254_v61  ;;  %v894_v23 = vsel %vm880_vm4, %v861_v9, %v4944_v49  ;;  %v5029_v3 = vunpack.i.h.bf16 %v7462_v15  ;;  %v928_v36 = vsel %vm913_vm5, %v895_v35, %v5028_v63  ;;  %v7597_v49 = vld [vmem:[%s6325_s28 + $0xb0] sm:$0xff] }
 0x14d   : > { %5341 = vrot.lane.b32.xlu0 %v5340_v29, %s6094_s5  ;;  %4326 = vmatprep.mubr.f32.mxu0 %v926_v26  ;;  %v4953_v29 = vunpack.i.l.bf16 %v7342_v12  ;;  %v927_v4 = vsel %vm913_vm5, %v894_v23, %v5024_v38  ;;  %v896_v24 = vsel %vm880_vm4, %v863_v5, %v4949_v31  ;;  %v7600_v26 = vld [vmem:[%s6325_s28 + $0xb8] sm:$0xff]  ;;  %v4879_v9 = vunpack.i.h.bf16 %v7254_v61  ;;  %v7610_v31 = vld [vmem:[%s6325_s28 + $0xa8] sm:$0xff] }
 0x14e   : > { %v7584_v17 = vpop.permute.xlu1 %5066  ;;  %v5365_v15 = vpack.i.bf16 %v7600_v26, %v7597_v49  ;;  %v4874_v38 = vunpack.i.h.bf16 %v7256_v54  ;;  %v4958_v23 = vunpack.i.l.bf16 %v7340_v7  ;;  %v4954_v35 = vunpack.i.h.bf16 %v7342_v12  ;;  %v7628_v12 = vld [vmem:[%s6325_s28 + $0xd8] sm:$0xff] }
 0x14f   : > { %v7589_v18 = vpop.permute.xlu0 %5061  ;;  %v864_v61 = vsel %vm847_vm3, %v7573_v32, %v4873_v60  ;;  %v866_v54 = vsel %vm847_vm3, %v5870_v28, %v4878_v44  ;;  %v5375_v53 = vpack.i.bf16 %v7628_v12, %v7625_v59  ;;  %v5038_v60 = vunpack.i.l.bf16 %v7483_v16  ;;  %v7637_v28 = vld [vmem:[%s6325_s28 + $0xc0] sm:$0xff]  ;;  %v7640_v44 = vld [vmem:[%s6325_s28 + $0xc8] sm:$0xff] }
 0x150   : > { %4327 = vmatmul.mubr.f32.gmra.mrb[12].mxu0 %v927_v4  ;;  %5356 = vrot.lane.b32.xlu1 %v5355_v19, %s6094_s5  ;;  %v5876_v19 = vld [vmem:[%s6325_s28 + $0xa0] sm:$0xff]  ;;  %v5034_v4 = vunpack.i.h.bf16 %v7496_v51  ;;  %v897_v1 = vsel %vm880_vm4, %v864_v61, %v4953_v29  ;;  %v5370_v29 = vpack.i.bf16 %v7640_v44, %v7637_v28  ;;  %v899_v7 = vsel %vm880_vm4, %v866_v54, %v4958_v23 }
 0x151   : > { %5351 = vrot.lane.b32.xlu0 %v5350_v10, %s6094_s5  ;;  %4329 = vmatprep.mubr.f32.mxu0 %v928_v36  ;;  %v5360_v63 = vpack.i.bf16 %v7610_v31, %v5876_v19  ;;  %v929_v36 = vsel %vm913_vm5, %v896_v24, %v5029_v3  ;;  %v930_v51 = vsel %vm913_vm5, %v897_v1, %v5033_v14  ;;  %v4041_v1 = vld [vmem:[%s9500_s2 + $0x100] sm:$0xff]  ;;  %v4042_v14 = vld [vmem:[%s9500_s2 + $0x108] sm:$0xff]  ;;  %v5044_v32 = vunpack.i.h.bf16 %v7527_v34 }
 0x152   : > { %v7614_v5 = vpop.permute.xlu1 %5076  ;;  %v865_v3 = vsel %vm847_vm3, %v5873_v48, %v4874_v38  ;;  %v867_v24 = vsel %vm847_vm3, %v7565_v30, %v4879_v9  ;;  %v4660_v23 = vpack.c.bf16 %v4042_v14, %v4041_v1  ;;  %v4963_v30 = vunpack.i.l.bf16 %v7350_v33  ;;  %v7673_v1 = vld [vmem:[%s6325_s28 + $0xf8] sm:$0xff] }
 0x153   : > { %v7620_v10 = vpop.permute.xlu0 %5071  ;;  %v898_v38 = vsel %vm880_vm4, %v865_v3, %v4954_v35  ;;  %v5039_v9 = vunpack.i.h.bf16 %v7483_v16  ;;  %v900_v35 = vsel %vm880_vm4, %v867_v24, %v4959_v50  ;;  %v7670_v3 = vld [vmem:[%s6325_s28 + $0xf0] sm:$0xff]  ;;  %v4889_v14 = vunpack.i.h.bf16 %v7268_v41 }
 0x154   : > { %4330 = vmatmul.mubr.f32.gmra.mrb[14].mxu0 %v929_v36  ;;  %5366 = vrot.lane.b32.xlu1 %v5365_v15, %s6094_s5  ;;  %v4888_v15 = vunpack.i.l.bf16 %v7268_v41  ;;  %v931_v54 = vsel %vm913_vm5, %v898_v38, %v5034_v4  ;;  %v5043_v36 = vunpack.i.l.bf16 %v7527_v34  ;;  %v5385_v16 = vpack.i.bf16 %v7673_v1, %v7670_v3  ;;  %v4044_v41 = vld [vmem:[%s9500_s2 + $0x118] sm:$0xff] }
 0x155   : > { %5361 = vrot.lane.b32.xlu0 %v5360_v63, %s6094_s5  ;;  %4332 = vmatprep.mubr.f32.mxu0 %v930_v51  ;;  %v4883_v63 = vunpack.i.l.bf16 %v7270_v45  ;;  %v932_v51 = vsel %vm913_vm5, %v899_v7, %v5038_v60  ;;  %v4884_v4 = vunpack.i.h.bf16 %v7270_v45  ;;  %v4968_v38 = vunpack.i.l.bf16 %v7348_v20  ;;  %v7685_v60 = vld [vmem:[%s6325_s28 + $0xe8] sm:$0xff]  ;;  %v4043_v7 = vld [vmem:[%s9500_s2 + $0x110] sm:$0xff] }
 0x156   : > { %v7657_v48 = vpop.permute.xlu1 %5086  ;;  %v4964_v45 = vunpack.i.h.bf16 %v7350_v33  ;;  %4661 = vmatprep.subr.bf16.mxu0 %v4660_v23  ;;  %v4969_v33 = vunpack.i.h.bf16 %v7348_v20  ;;  %v4045_v20 = vld [vmem:[%s9500_s2 + $0x120] sm:$0xff] }
 0x157   : > { %9890 = vst [vmem:[#allocation161_spill] sm:$0xff] %v7657_v48  ;;  %v7662_v61 = vpop.permute.xlu0 %5081  ;;  %v933_v48 = vsel %vm913_vm5, %v900_v35, %v5039_v9  ;;  %4663 = vmatpush3.bf16.msra.mxu0 %v4660_v23  ;;  %v869_v34 = vsel %vm847_vm3, %v7610_v31, %v4884_v4  ;;  %v5049_v9 = vunpack.i.h.bf16 %v7522_v62 }
 0x158   : > { %9891 = vst [vmem:[#allocation162_spill] sm:$0xff] %v7662_v61  ;;  %4333 = vmatmul.mubr.f32.gmra.mrb[16].mxu0 %v931_v54  ;;  %5376 = vrot.lane.b32.xlu1 %v5375_v53, %s6094_s5  ;;  %v7682_v53 = vld [vmem:[%s6325_s28 + $0xe0] sm:$0xff]  ;;  %v870_v54 = vsel %vm847_vm3, %v7597_v49, %v4888_v15  ;;  %v871_v15 = vsel %vm847_vm3, %v7600_v26, %v4889_v14  ;;  %v4973_v26 = vunpack.i.l.bf16 %v7358_v46  ;;  %v9893_v14 = vld [vmem:[#allocation31_spill] sm:$0xff] }
 0x159   : > { %5371 = vrot.lane.b32.xlu0 %v5370_v29, %s6094_s5  ;;  %4335 = vmatprep.mubr.f32.mxu0 %v932_v51  ;;  %v5380_v50 = vpack.i.bf16 %v7685_v60, %v7682_v53  ;;  %v868_v29 = vsel %vm847_vm3, %v5876_v19, %v4883_v63  ;;  %v4664_v51 = vpack.c.bf16 %v4044_v41, %v4043_v7  ;;  %v4046_v63 = vld [vmem:[%s9500_s2 + $0x128] sm:$0xff]  ;;  %v4894_v7 = vunpack.i.h.bf16 %v7284_v2  ;;  %v9894_v41 = vld [vmem:[#allocation25_spill] sm:$0xff] }
 0x15a   : > { %v7696_v24 = vpop.permute.xlu1 %5096  ;;  %v901_v22 = vsel %vm880_vm4, %v868_v29, %v4963_v30  ;;  %v903_v19 = vsel %vm880_vm4, %v870_v54, %v4968_v38  ;;  %v902_v31 = vsel %vm880_vm4, %v869_v34, %v4964_v45  ;;  %v4668_v30 = vpack.c.bf16 %v4046_v63, %v4045_v20  ;;  %v4048_v45 = vld [vmem:[%s9500_s2 + $0x138] sm:$0xff]  ;;  %v4049_v63 = vld [vmem:[%s9500_s2 + $0x140] sm:$0xff] }
 0x15b   : > { %9892 = vst [vmem:[#allocation163_spill] sm:$0xff] %v7696_v24  ;;  %v7702_v61 = vpop.permute.xlu0 %5091  ;;  %v5048_v24 = vunpack.i.l.bf16 %v7522_v62  ;;  %v934_v49 = vsel %vm913_vm5, %v901_v22, %v5043_v36  ;;  %v4898_v22 = vunpack.i.l.bf16 %v7282_v8  ;;  %4665 = vmatprep.subr.bf16.mxu0 %v4664_v51  ;;  %v935_v35 = vsel %vm913_vm5, %v902_v31, %v5044_v32  ;;  %v4047_v32 = vld [vmem:[%s9500_s2 + $0x130] sm:$0xff] }
 0x15c   : > { %4336 = vmatmul.mubr.f32.gmra.mrb[18].mxu0 %v933_v48  ;;  %5386 = vrot.lane.b32.xlu1 %v5385_v16, %s6094_s5  ;;  %v4893_v48 = vunpack.i.l.bf16 %v7284_v2  ;;  %v5053_v16 = vunpack.i.l.bf16 %v7559_v47  ;;  %v904_v38 = vsel %vm880_vm4, %v871_v15, %v4969_v33  ;;  %v4978_v62 = vunpack.i.l.bf16 %v7356_v21  ;;  %v9896_v15 = vld [vmem:[#allocation22_spill] sm:$0xff] }
 0x15d   : > { %5381 = vrot.lane.b32.xlu0 %v5380_v50, %s6094_s5  ;;  %4338 = vmatprep.mubr.f32.mxu0 %v934_v49  ;;  %v936_v4 = vsel %vm913_vm5, %v903_v19, %v5048_v24  ;;  %v4899_v50 = vunpack.i.h.bf16 %v7282_v8  ;;  %v4974_v24 = vunpack.i.h.bf16 %v7358_v46  ;;  %v874_v2 = vsel %vm847_vm3, %v7625_v59, %v4898_v22  ;;  %v4050_v22 = vld [vmem:[%s9500_s2 + $0x148] sm:$0xff] }
 0x15e   : > { %v7724_v23 = vpop.permute.xlu1 %5106  ;;  %4667 = vmatpush3.bf16.msra.mxu0 %v4664_v51  ;;  %v872_v8 = vsel %vm847_vm3, %v7637_v28, %v4893_v48  ;;  %v4672_v54 = vpack.c.bf16 %v4048_v45, %v4047_v32  ;;  %v5054_v51 = vunpack.i.h.bf16 %v7559_v47  ;;  %v937_v49 = vsel %vm913_vm5, %v904_v38, %v5049_v9  ;;  %v9895_v28 = vld [vmem:[#allocation28_spill] sm:$0xff]  ;;  %v9898_v45 = vld [vmem:[#allocation39_spill] sm:$0xff] }
 0x15f   : > { %v7729_v36 = vpop.permute.xlu0 %5101  ;;  %4669 = vmatprep.subr.bf16.mxu0 %v4668_v30  ;;  %v905_v34 = vsel %vm880_vm4, %v872_v8, %v4973_v26  ;;  %v4979_v46 = vunpack.i.h.bf16 %v7356_v21  ;;  %v5058_v19 = vunpack.i.l.bf16 %v7552_v56  ;;  %v873_v47 = vsel %vm847_vm3, %v7640_v44, %v4894_v7  ;;  %v9897_v38 = vld [vmem:[#allocation36_spill] sm:$0xff]  ;;  %v4052_v8 = vld [vmem:[%s9500_s2 + $0x158] sm:$0xff] }
 0x160   : > { %4339 = vmatmul.mubr.f32.gmra.mrb[20].mxu0 %v935_v35  ;;  %5396 = vrot.lane.b32.xlu1 %v9893_v14, %s6095_s10  ;;  %v938_v59 = vsel %vm913_vm5, %v905_v34, %v5053_v16  ;;  %v907_v20 = vsel %vm880_vm4, %v874_v2, %v4978_v62  ;;  %v875_v21 = vsel %vm847_vm3, %v7628_v12, %v4899_v50  ;;  %v4908_v48 = vunpack.i.l.bf16 %v7296_v13  ;;  %v4058_v34 = vld [vmem:[%s9500_s2 + $0x188] sm:$0xff] }
 0x161   : > { %5391 = vrot.lane.b32.xlu0 %v9894_v41, %s6095_s10  ;;  %4341 = vmatprep.mubr.f32.mxu0 %v936_v4  ;;  %v4903_v31 = vunpack.i.l.bf16 %v7298_v25  ;;  %v906_v44 = vsel %vm880_vm4, %v873_v47, %v4974_v24  ;;  %v4676_v26 = vpack.c.bf16 %v4050_v22, %v4049_v63  ;;  %v4983_v12 = vunpack.i.l.bf16 %v7367_v37  ;;  %v4051_v24 = vld [vmem:[%s9500_s2 + $0x150] sm:$0xff] }
 0x162   : > { %v7749_v29 = vpop.permute.xlu1 %5116  ;;  %4671 = vmatpush3.bf16.msra.mxu0 %v4668_v30  ;;  %v5059_v9 = vunpack.i.h.bf16 %v7552_v56  ;;  %v939_v16 = vsel %vm913_vm5, %v906_v44, %v5054_v51  ;;  %v5063_v4 = vunpack.i.l.bf16 %v7589_v18  ;;  %v940_v50 = vsel %vm913_vm5, %v907_v20, %v5058_v19  ;;  %v9899_v20 = vld [vmem:[#allocation42_spill] sm:$0xff] }
 0x163   : > { %v7756_v33 = vpop.permute.xlu0 %5111  ;;  %4673 = vmatprep.subr.bf16.mxu0 %v4672_v54  ;;  %v908_v7 = vsel %vm880_vm4, %v875_v21, %v4979_v46  ;;  %v4909_v62 = vunpack.i.h.bf16 %v7296_v13  ;;  %v4904_v32 = vunpack.i.h.bf16 %v7298_v25  ;;  %v4988_v56 = vunpack.i.l.bf16 %v7364_v58 }
 0x164   : > { %4342 = vmatmul.mubr.f32.gmra.mrb[22].mxu0 %v937_v49  ;;  %5406 = vrot.lane.b32.xlu1 %v9895_v28, %s6095_s10  ;;  %v4984_v2 = vunpack.i.h.bf16 %v7367_v37  ;;  %v876_v13 = vsel %vm847_vm3, %v7682_v53, %v4903_v31  ;;  %v878_v25 = vsel %vm847_vm3, %v7670_v3, %v4908_v48  ;;  %v4680_v51 = vpack.c.bf16 %v4052_v8, %v4051_v24  ;;  %v4057_v49 = vld [vmem:[%s9500_s2 + $0x180] sm:$0xff]  ;;  %v4054_v31 = vld [vmem:[%s9500_s2 + $0x168] sm:$0xff] }
 0x165   : > { %5401 = vrot.lane.b32.xlu0 %v9896_v15, %s6095_s10  ;;  %4344 = vmatprep.mubr.f32.mxu0 %v938_v59  ;;  %v5064_v37 = vunpack.i.h.bf16 %v7589_v18  ;;  %v941_v19 = vsel %vm913_vm5, %v908_v7, %v5059_v9  ;;  %v909_v53 = vsel %vm880_vm4, %v876_v13, %v4983_v12  ;;  %v7822_v3 = vpack.c.bf16 %v4058_v34, %v4057_v49  ;;  %v9900_v18 = vld [vmem:[#allocation43_spill] sm:$0xff]  ;;  %v4053_v48 = vld [vmem:[%s9500_s2 + $0x160] sm:$0xff]  ;;  %v9902_v7 = vld [vmem:[#allocation49_spill] sm:$0xff] }
 0x166   : > { %v7780_v30 = vpop.permute.xlu1 %5126  ;;  %4675 = vmatpush3.bf16.msra.mxu0 %v4672_v54  ;;  %v4989_v59 = vunpack.i.h.bf16 %v7364_v58  ;;  %v5068_v47 = vunpack.i.l.bf16 %v7584_v17  ;;  %v942_v21 = vsel %vm913_vm5, %v909_v53, %v5063_v4  ;;  %v877_v63 = vsel %vm847_vm3, %v7685_v60, %v4904_v32  ;;  %v9904_v13 = vld [vmem:[#allocation55_spill] sm:$0xff]  ;;  %v9905_v49 = vld [vmem:[#allocation60_spill] sm:$0xff]  ;;  %v9906_v34 = vld [vmem:[#allocation61_spill] sm:$0xff] }
 0x167   : > { %v7785_v35 = vpop.permute.xlu0 %5121  ;;  %4677 = vmatprep.subr.bf16.mxu0 %v4676_v26  ;;  %v911_v22 = vsel %vm880_vm4, %v878_v25, %v4988_v56  ;;  %v879_v58 = vsel %vm847_vm3, %v7673_v1, %v4909_v62  ;;  %4693 = vmatprep.subr.bf16.mxu1 %v7822_v3  ;;  %v4684_v60 = vpack.c.bf16 %v4054_v31, %v4053_v48  ;;  %v5069_v12 = vunpack.i.h.bf16 %v7584_v17  ;;  %v4055_v17 = vld [vmem:[%s9500_s2 + $0x170] sm:$0xff]  ;;  %v4056_v62 = vld [vmem:[%s9500_s2 + $0x178] sm:$0xff]  ;;  %v9907_v53 = vld [vmem:[#allocation66_spill] sm:$0xff] }
 0x168   : > { %4345 = vmatmul.mubr.f32.gmra.mrb[24].mxu0 %v939_v16  ;;  %5416 = vrot.lane.b32.xlu1 %v9897_v38, %s6095_s10  ;;  %v9901_v16 = vld [vmem:[#allocation48_spill] sm:$0xff]  ;;  %v944_v4 = vsel %vm913_vm5, %v911_v22, %v5068_v47  ;;  %v4688_v56 = vpack.c.bf16 %v4056_v62, %v4055_v17  ;;  %v9911_v62 = vld [vmem:[#allocation29_spill] sm:$0xff] }
 0x169   : > { %5411 = vrot.lane.b32.xlu0 %v9898_v45, %s6095_s10  ;;  %4347 = vmatprep.mubr.f32.mxu0 %v940_v50  ;;  %v912_v50 = vsel %vm880_vm4, %v879_v58, %v4989_v59  ;;  %v9908_v59 = vld [vmem:[#allocation69_spill] sm:$0xff] }
 0x16a   : > { %v7805_v54 = vpop.permute.xlu1 %5136  ;;  %4679 = vmatpush3.bf16.msra.mxu0 %v4676_v26  ;;  %v910_v26 = vsel %vm880_vm4, %v877_v63, %v4984_v2  ;;  %v945_v8 = vsel %vm913_vm5, %v912_v50, %v5069_v12  ;;  %v9903_v2 = vld [vmem:[#allocation54_spill] sm:$0xff] }
 0x16b   : > { %v7818_v46 = vpop.permute.xlu0 %5131  ;;  %4681 = vmatprep.subr.bf16.mxu0 %v4680_v51  ;;  %v943_v1 = vsel %vm913_vm5, %v910_v26, %v5064_v37  ;;  %v5078_v26 = vunpack.i.l.bf16 %v7614_v5 }
 0x16c   : > { %4348 = vmatmul.mubr.f32.gmra.mrb[26].mxu0 %v941_v19  ;;  %5426 = vrot.lane.b32.xlu1 %v9899_v20, %s6095_s10 }
 0x16d   : > { %5421 = vrot.lane.b32.xlu0 %v9900_v18, %s6095_s10  ;;  %4350 = vmatprep.mubr.f32.mxu0 %v942_v21 }
 0x16e   : > { %v7842_v44 = vpop.permute.xlu1 %5146  ;;  %4683 = vmatpush3.bf16.msra.mxu0 %v4680_v51 }
 0x16f   : > { %v7847_v9 = vpop.permute.xlu0 %5141  ;;  %4685 = vmatprep.subr.bf16.mxu0 %v4684_v60 }
 0x170   : > { %4351 = vmatmul.mubr.f32.gmra.mrb[28].mxu0 %v943_v1  ;;  %5436 = vrot.lane.b32.xlu1 %v9901_v16, %s6095_s10  ;;  %v5079_v1 = vunpack.i.h.bf16 %v7614_v5 }
 0x171   : > { %5431 = vrot.lane.b32.xlu0 %v9902_v7, %s6095_s10  ;;  %4353 = vmatprep.mubr.f32.mxu0 %v944_v4 }
 0x172   : > { %v7862_v32 = vpop.permute.xlu1 %5156  ;;  %4687 = vmatpush3.bf16.msra.mxu0 %v4684_v60 }
 0x173   : > { %v5152_v24 = vpop.permute.xlu0 %5151  ;;  %4689 = vmatprep.subr.bf16.mxu0 %v4688_v56  ;;  %v5159_v5 = vunpack.i.h.bf16 %v7862_v32 }
 0x174   : > { %4354 = vmatmul.mubr.f32.gmra.mrb[30].mxu0 %v945_v8  ;;  %5446 = vrot.lane.b32.xlu1 %v9903_v2, %s6095_s10  ;;  %v5154_v4 = vunpack.i.h.bf16 %v5152_v24  ;;  %v5153_v50 = vunpack.i.l.bf16 %v5152_v24  ;;  %v9912_v8 = vld [vmem:[#allocation23_spill] sm:$0xff] }
 0x175   : > { %5441 = vrot.lane.b32.xlu0 %v9904_v13, %s6095_s10 }
 0x176   : > { %v7869_v25 = vpop.permute.xlu1 %5166  ;;  %4691 = vmatpush3.bf16.msra.mxu0 %v4688_v56 }
 0x177   : > { %v7871_v51 = vpop.permute.xlu0 %5161 }
 0x178   : > { %5456 = vrot.lane.b32.xlu1 %v9905_v49, %s6095_s10 }
 0x179   : > { %5451 = vrot.lane.b32.xlu0 %v9906_v34, %s6095_s10 }
 0x17a   : > { %v7877_v37 = vpop.permute.xlu1 %5176 }
 0x17b   : > { %v7879_v19 = vpop.permute.xlu0 %5171 }
 0x17c   : > { %5466 = vrot.lane.b32.xlu1 %v9907_v53, %s6095_s10 }
 0x17d   : > { %5461 = vrot.lane.b32.xlu0 %v9908_v59, %s6095_s10 }
 0x17e   : > { %v7885_v47 = vpop.permute.xlu1 %5186 }
 0x17f   : > { %v7887_v21 = vpop.permute.xlu0 %5181 }
 0x180   : > { %5476 = vrot.lane.b32.xlu1 %v6908_v39, %s6093_s9 }
 0x181   : > { %5471 = vrot.lane.b32.xlu0 %v9872_v6, %s6093_s9 }
 0x182   : > { %v7893_v63 = vpop.permute.xlu1 %5196 }
 0x183   : > { %v7895_v22 = vpop.permute.xlu0 %5191 }
 0x184   : > { %5486 = vrot.lane.b32.xlu1 %v6948_v57, %s6093_s9  ;;  %v9909_v57 = vld [vmem:[#allocation135_spill] sm:$0xff] }
 0x185   : > { %5481 = vrot.lane.b32.xlu0 %v6972_v55, %s6093_s9  ;;  %v9910_v55 = vld [vmem:[#allocation138_spill] sm:$0xff] }
 0x186   : > { %v7901_v58 = vpop.permute.xlu1 %5206  ;;  %v5510_v31 = vpack.i.bf16 %v7378_v0, %v9910_v55  ;;  %v5158_v0 = vunpack.i.l.bf16 %v7862_v32 }
 0x187   : > { %v7903_v48 = vpop.permute.xlu0 %5201 }
 0x188   : > { %5496 = vrot.lane.b32.xlu1 %v9873_v43, %s6093_s9  ;;  %v5074_v43 = vunpack.i.h.bf16 %v7620_v10 }
 0x189   : > { %5491 = vrot.lane.b32.xlu0 %v9874_v52, %s6093_s9  ;;  %v5073_v52 = vunpack.i.l.bf16 %v7620_v10  ;;  %v1509_v10 = vsel %vm847_vm3, %v5078_v26, %v9911_v62  ;;  %v4059_v26 = vld [vmem:[%s9500_s2 + $0x190] sm:$0xff]  ;;  %v9916_v62 = vld [vmem:[#allocation30_spill] sm:$0xff] }
 0x18a   : > { %v7909_v39 = vpop.permute.xlu1 %5216 }
 0x18b   : > { %v7911_v6 = vpop.permute.xlu0 %5211 }
 0x18c   : > { %5506 = vrot.lane.b32.xlu1 %v7016_v40, %s6093_s9  ;;  %v5520_v40 = vpack.i.bf16 %v7401_v11, %v7385_v42  ;;  %v9914_v11 = vld [vmem:[#allocation122_spill] sm:$0xff] }
 0x18d   : > { %5501 = vrot.lane.b32.xlu0 %v9909_v57, %s6093_s9  ;;  %v1507_v57 = vsel %vm847_vm3, %v5073_v52, %v9912_v8  ;;  %v5535_v42 = vpack.i.bf16 %v9914_v11, %v7421_v27  ;;  %v4060_v52 = vld [vmem:[%s9500_s2 + $0x198] sm:$0xff]  ;;  %v9918_v11 = vld [vmem:[#allocation162_spill] sm:$0xff] }
 0x18e   : > { %v7920_v60 = vpop.permute.xlu1 %5226  ;;  %v1539_v27 = vsel %vm880_vm4, %v1507_v57, %v5153_v50  ;;  %v9917_v8 = vld [vmem:[#allocation161_spill] sm:$0xff] }
 0x18f   : > { %v7924_v12 = vpop.permute.xlu0 %5221 }
 0x190   : > { %5516 = vrot.lane.b32.xlu1 %v9894_v41, %s6094_s5  ;;  %v9913_v41 = vld [vmem:[#allocation24_spill] sm:$0xff] }
 0x191   : > { %5511 = vrot.lane.b32.xlu0 %v5510_v31, %s6093_s9  ;;  %v1508_v55 = vsel %vm847_vm3, %v5074_v43, %v9913_v41  ;;  %v9915_v31 = vld [vmem:[#allocation75_spill] sm:$0xff]  ;;  %v1541_v43 = vsel %vm880_vm4, %v1509_v10, %v5158_v0  ;;  %v5088_v41 = vunpack.i.l.bf16 %v9917_v8 }
 0x192   : > { %v5237_v17 = vpop.permute.xlu1 %5236  ;;  %v1540_v32 = vsel %vm880_vm4, %v1508_v55, %v5154_v4  ;;  %v4696_v55 = vpack.c.bf16 %v4060_v52, %v4059_v26  ;;  %v4062_v10 = vld [vmem:[%s9500_s2 + $0x1a8] sm:$0xff]  ;;  %v9920_v26 = vld [vmem:[#allocation26_spill] sm:$0xff] }
 0x193   : > { %v5232_v56 = vpop.permute.xlu0 %5231  ;;  %v5238_v53 = vunpack.i.l.bf16 %v5237_v17  ;;  %v5239_v50 = vunpack.i.h.bf16 %v5237_v17  ;;  %v5089_v17 = vunpack.i.h.bf16 %v9917_v8  ;;  %v1513_v52 = vsel %vm847_vm3, %v5088_v41, %v9920_v26  ;;  %v9922_v41 = vld [vmem:[#allocation129_spill] sm:$0xff] }
 0x194   : > { %v5234_v24 = vunpack.i.h.bf16 %v5232_v56  ;;  %v5233_v59 = vunpack.i.l.bf16 %v5232_v56  ;;  %5526 = vrot.lane.b32.xlu1 %v9915_v31, %s6095_s10  ;;  %v1510_v56 = vsel %vm847_vm3, %v5079_v1, %v9916_v62  ;;  %v5083_v31 = vunpack.i.l.bf16 %v9918_v11 }
 0x195   : > { %5521 = vrot.lane.b32.xlu0 %v5520_v40, %s6093_s9  ;;  %v5163_v40 = vunpack.i.l.bf16 %v7871_v51  ;;  %v1573_v1 = vsel %vm913_vm5, %v1541_v43, %v5238_v53  ;;  %v1542_v4 = vsel %vm880_vm4, %v1510_v56, %v5159_v5  ;;  %v5164_v53 = vunpack.i.h.bf16 %v7871_v51  ;;  %v9919_v5 = vld [vmem:[#allocation20_spill] sm:$0xff] }
 0x196   : > { %v7958_v49 = vpop.permute.xlu1 %5246  ;;  %v1571_v34 = vsel %vm913_vm5, %v1539_v27, %v5233_v59  ;;  %v1572_v2 = vsel %vm913_vm5, %v1540_v32, %v5234_v24  ;;  %v4061_v59 = vld [vmem:[%s9500_s2 + $0x1a0] sm:$0xff]  ;;  %v1511_v24 = vsel %vm847_vm3, %v5083_v31, %v9919_v5  ;;  %v1574_v43 = vsel %vm913_vm5, %v1542_v4, %v5239_v50  ;;  %v4063_v31 = vld [vmem:[%s9500_s2 + $0x1b0] sm:$0xff]  ;;  %v9924_v50 = vld [vmem:[#allocation21_spill] sm:$0xff] }
 0x197   : > { %v5242_v57 = vpop.permute.xlu0 %5241  ;;  %4388 = vmatprep.mubr.f32.mxu1 %v1571_v34  ;;  %v5084_v34 = vunpack.i.h.bf16 %v9918_v11  ;;  %v4700_v62 = vpack.c.bf16 %v4062_v10, %v4061_v59  ;;  %v5169_v51 = vunpack.i.h.bf16 %v7869_v25  ;;  %v5248_v56 = vunpack.i.l.bf16 %v7958_v49  ;;  %v9926_v4 = vld [vmem:[#allocation163_spill] sm:$0xff] }
 0x198   : > { %v5243_v0 = vunpack.i.l.bf16 %v5242_v57  ;;  %4389 = vmatmul.mubr.f32.vlgmr.msra.gmra.mrb[0].mxu1 %v1572_v2  ;;  %5536 = vrot.lane.b32.xlu1 %v5535_v42, %s6093_s9  ;;  %v5168_v2 = vunpack.i.l.bf16 %v7869_v25  ;;  %v5244_v27 = vunpack.i.h.bf16 %v5242_v57  ;;  %v9923_v25 = vld [vmem:[#allocation72_spill] sm:$0xff]  ;;  %v5098_v59 = vunpack.i.l.bf16 %v9926_v4 }
 0x199   : > { %5531 = vrot.lane.b32.xlu0 %v9893_v14, %s6094_s5  ;;  %4391 = vmatprep.mubr.f32.mxu1 %v1573_v1  ;;  %v1543_v14 = vsel %vm880_vm4, %v1511_v24, %v5163_v40  ;;  %v4064_v40 = vld [vmem:[%s9500_s2 + $0x1b8] sm:$0xff]  ;;  %v5093_v10 = vunpack.i.l.bf16 %v7702_v61  ;;  %v5173_v26 = vunpack.i.l.bf16 %v7879_v19 }
 0x19a   : > { %v7978_v42 = vpop.permute.xlu1 %5256  ;;  %4695 = vmatpush3.bf16.msra.mxu1 %v7822_v3  ;;  %v1575_v8 = vsel %vm913_vm5, %v1543_v14, %v5243_v0  ;;  %v9921_v3 = vld [vmem:[#allocation134_spill] sm:$0xff]  ;;  %v1545_v57 = vsel %vm880_vm4, %v1513_v52, %v5168_v2  ;;  %v9925_v0 = vld [vmem:[#allocation27_spill] sm:$0xff]  ;;  %v4704_v2 = vpack.c.bf16 %v4064_v40, %v4063_v31  ;;  %v9927_v52 = vld [vmem:[#allocation81_spill] sm:$0xff]  ;;  %v5099_v31 = vunpack.i.h.bf16 %v9926_v4 }
 0x19b   : > { %v7985_v32 = vpop.permute.xlu0 %5251  ;;  %4697 = vmatprep.subr.bf16.mxu1 %v4696_v55  ;;  %v5550_v11 = vpack.i.bf16 %v9922_v41, %v9921_v3  ;;  %v1514_v1 = vsel %vm847_vm3, %v5089_v17, %v9925_v0  ;;  %v9929_v3 = vld [vmem:[#allocation141_spill] sm:$0xff]  ;;  %v5094_v40 = vunpack.i.h.bf16 %v7702_v61 }
 0x19c   : > { %4392 = vmatmul.mubr.f32.gmra.mrb[2].mxu1 %v1574_v43  ;;  %5546 = vrot.lane.b32.xlu1 %v9896_v15, %s6094_s5  ;;  %v1512_v15 = vsel %vm847_vm3, %v5084_v34, %v9924_v50  ;;  %v5249_v43 = vunpack.i.h.bf16 %v7958_v49  ;;  %v5253_v17 = vunpack.i.l.bf16 %v7985_v32  ;;  %v4065_v49 = vld [vmem:[%s9500_s2 + $0x1c0] sm:$0xff] }
 0x19d   : > { %5541 = vrot.lane.b32.xlu0 %v9923_v25, %s6095_s10  ;;  %4394 = vmatprep.mubr.f32.mxu1 %v1575_v8  ;;  %v1544_v24 = vsel %vm880_vm4, %v1512_v15, %v5164_v53  ;;  %v1577_v8 = vsel %vm913_vm5, %v1545_v57, %v5248_v56  ;;  %v9928_v53 = vld [vmem:[#allocation140_spill] sm:$0xff]  ;;  %v5178_v25 = vunpack.i.l.bf16 %v7877_v37  ;;  %v9930_v50 = vld [vmem:[#allocation34_spill] sm:$0xff] }
 0x19e   : > { %v8011_v5 = vpop.permute.xlu1 %5266  ;;  %4699 = vmatpush3.bf16.msra.mxu1 %v4696_v55  ;;  %v1576_v34 = vsel %vm913_vm5, %v1544_v24, %v5244_v27  ;;  %v1546_v55 = vsel %vm880_vm4, %v1514_v1, %v5169_v51  ;;  %v5565_v41 = vpack.i.bf16 %v9929_v3, %v9928_v53  ;;  %v4066_v27 = vld [vmem:[%s9500_s2 + $0x1c8] sm:$0xff]  ;;  %v5174_v51 = vunpack.i.h.bf16 %v7879_v19  ;;  %v9931_v57 = vld [vmem:[#allocation32_spill] sm:$0xff] }
 0x19f   : > { %v8016_v14 = vpop.permute.xlu0 %5261  ;;  %4701 = vmatprep.subr.bf16.mxu1 %v4700_v62  ;;  %v1515_v15 = vsel %vm847_vm3, %v5093_v10, %v9930_v50  ;;  %v1517_v0 = vsel %vm847_vm3, %v5098_v59, %v9931_v57  ;;  %v5254_v1 = vunpack.i.h.bf16 %v7985_v32  ;;  %v1578_v61 = vsel %vm913_vm5, %v1546_v55, %v5249_v43  ;;  %v4067_v32 = vld [vmem:[%s9500_s2 + $0x1d0] sm:$0xff]  ;;  %v9933_v43 = vld [vmem:[#allocation33_spill] sm:$0xff] }
 0x1a0   : > { %4395 = vmatmul.mubr.f32.gmra.mrb[4].mxu1 %v1576_v34  ;;  %5556 = vrot.lane.b32.xlu1 %v9927_v52, %s6095_s10  ;;  %v4708_v24 = vpack.c.bf16 %v4066_v27, %v4065_v49  ;;  %v5179_v19 = vunpack.i.h.bf16 %v7877_v37  ;;  %v5258_v34 = vunpack.i.l.bf16 %v7978_v42  ;;  %v9932_v37 = vld [vmem:[#allocation35_spill] sm:$0xff]  ;;  %v5108_v52 = vunpack.i.l.bf16 %v7724_v23  ;;  %v9935_v57 = vld [vmem:[#allocation156_spill] sm:$0xff] }
 0x1a1   : > { %5551 = vrot.lane.b32.xlu0 %v5550_v11, %s6093_s9  ;;  %4397 = vmatprep.mubr.f32.mxu1 %v1577_v8  ;;  %v1547_v11 = vsel %vm880_vm4, %v1515_v15, %v5173_v26  ;;  %v1516_v10 = vsel %vm847_vm3, %v5094_v40, %v9932_v37  ;;  %v1549_v26 = vsel %vm880_vm4, %v1517_v0, %v5178_v25  ;;  %v5103_v8 = vunpack.i.l.bf16 %v7729_v36  ;;  %v4070_v25 = vld [vmem:[%s9500_s2 + $0x1e8] sm:$0xff]  ;;  %v9936_v0 = vld [vmem:[#allocation154_spill] sm:$0xff] }
 0x1a2   : > { %v8037_v56 = vpop.permute.xlu1 %5276  ;;  %4703 = vmatpush3.bf16.msra.mxu1 %v4700_v62  ;;  %v1579_v59 = vsel %vm913_vm5, %v1547_v11, %v5253_v17  ;;  %v4068_v62 = vld [vmem:[%s9500_s2 + $0x1d8] sm:$0xff]  ;;  %v1518_v17 = vsel %vm847_vm3, %v5099_v31, %v9933_v43  ;;  %v1548_v53 = vsel %vm880_vm4, %v1516_v10, %v5174_v51  ;;  %v5259_v3 = vunpack.i.h.bf16 %v7978_v42  ;;  %v4069_v42 = vld [vmem:[%s9500_s2 + $0x1e0] sm:$0xff] }
 0x1a3   : > { %v8044_v4 = vpop.permute.xlu0 %5271  ;;  %4705 = vmatprep.subr.bf16.mxu1 %v4704_v2  ;;  %v1580_v49 = vsel %vm913_vm5, %v1548_v53, %v5254_v1  ;;  %v4712_v27 = vpack.c.bf16 %v4068_v62, %v4067_v32  ;;  %v5263_v31 = vunpack.i.l.bf16 %v8016_v14  ;;  %v1581_v40 = vsel %vm913_vm5, %v1549_v26, %v5258_v34  ;;  %v9941_v53 = vld [vmem:[#allocation85_spill] sm:$0xff] }
 0x1a4   : > { %4398 = vmatmul.mubr.f32.gmra.mrb[6].mxu1 %v1578_v61  ;;  %5566 = vrot.lane.b32.xlu1 %v5565_v41, %s6093_s9  ;;  %v5109_v51 = vunpack.i.h.bf16 %v7724_v23  ;;  %v5104_v50 = vunpack.i.h.bf16 %v7729_v36  ;;  %v5188_v15 = vunpack.i.l.bf16 %v7885_v47  ;;  %v5580_v1 = vpack.i.bf16 %v9936_v0, %v9935_v57  ;;  %v9939_v23 = vld [vmem:[#allocation158_spill] sm:$0xff]  ;;  %v9940_v36 = vld [vmem:[#allocation37_spill] sm:$0xff] }
 0x1a5   : > { %5561 = vrot.lane.b32.xlu0 %v9895_v28, %s6094_s5  ;;  %4400 = vmatprep.mubr.f32.mxu1 %v1579_v59  ;;  %v5183_v28 = vunpack.i.l.bf16 %v7887_v21  ;;  %v5184_v61 = vunpack.i.h.bf16 %v7887_v21  ;;  %v9938_v59 = vld [vmem:[#allocation155_spill] sm:$0xff]  ;;  %v1521_v62 = vsel %vm847_vm3, %v5108_v52, %v9940_v36  ;;  %v5264_v37 = vunpack.i.h.bf16 %v8016_v14  ;;  %v4071_v14 = vld [vmem:[%s9500_s2 + $0x1f0] sm:$0xff]  ;;  %v4072_v52 = vld [vmem:[%s9500_s2 + $0x1f8] sm:$0xff] }
 0x1a6   : > { %v8067_v55 = vpop.permute.xlu1 %5286  ;;  %4707 = vmatpush3.bf16.msra.mxu1 %v4704_v2  ;;  %v1550_v2 = vsel %vm880_vm4, %v1518_v17, %v5179_v19  ;;  %v9937_v19 = vld [vmem:[#allocation40_spill] sm:$0xff]  ;;  %v5595_v32 = vpack.i.bf16 %v9939_v23, %v9938_v59  ;;  %v4716_v43 = vpack.c.bf16 %v4070_v25, %v4069_v42  ;;  %v5189_v17 = vunpack.i.h.bf16 %v7885_v47  ;;  %v9942_v47 = vld [vmem:[#allocation41_spill] sm:$0xff]  ;;  %v9944_v23 = vld [vmem:[#allocation46_spill] sm:$0xff] }
 0x1a7   : > { %v8072_v41 = vpop.permute.xlu0 %5281  ;;  %4709 = vmatprep.subr.bf16.mxu1 %v4708_v24  ;;  %v1519_v34 = vsel %vm847_vm3, %v5103_v8, %v9937_v19  ;;  %v1582_v26 = vsel %vm913_vm5, %v1550_v2, %v5259_v3  ;;  %v5268_v8 = vunpack.i.l.bf16 %v8011_v5  ;;  %v1553_v3 = vsel %vm880_vm4, %v1521_v62, %v5188_v15  ;;  %v9945_v36 = vld [vmem:[#allocation44_spill] sm:$0xff] }
 0x1a8   : > { %4401 = vmatmul.mubr.f32.gmra.mrb[8].mxu1 %v1580_v49  ;;  %5576 = vrot.lane.b32.xlu1 %v9898_v45, %s6094_s5  ;;  %v9934_v45 = vld [vmem:[#allocation78_spill] sm:$0xff]  ;;  %v1551_v21 = vsel %vm880_vm4, %v1519_v34, %v5183_v28  ;;  %v1520_v28 = vsel %vm847_vm3, %v5104_v50, %v9942_v47  ;;  %v5113_v2 = vunpack.i.l.bf16 %v7756_v33  ;;  %v5269_v57 = vunpack.i.h.bf16 %v8011_v5 }
 0x1a9   : > { %5571 = vrot.lane.b32.xlu0 %v9934_v45, %s6095_s10  ;;  %4403 = vmatprep.mubr.f32.mxu1 %v1581_v40  ;;  %v9943_v49 = vld [vmem:[#allocation38_spill] sm:$0xff]  ;;  %v1552_v25 = vsel %vm880_vm4, %v1520_v28, %v5184_v61  ;;  %v5193_v45 = vunpack.i.l.bf16 %v7895_v22  ;;  %v4720_v15 = vpack.c.bf16 %v4072_v52, %v4071_v14  ;;  %v5114_v19 = vunpack.i.h.bf16 %v7756_v33  ;;  %v9950_v14 = vld [vmem:[#allocation45_spill] sm:$0xff] }
 0x1aa   : > { %v8094_v11 = vpop.permute.xlu1 %5296  ;;  %4711 = vmatpush3.bf16.msra.mxu1 %v4708_v24  ;;  %v1583_v24 = vsel %vm913_vm5, %v1551_v21, %v5263_v31  ;;  %v1522_v40 = vsel %vm847_vm3, %v5109_v51, %v9943_v49  ;;  %v5118_v31 = vunpack.i.l.bf16 %v7749_v29  ;;  %v1584_v50 = vsel %vm913_vm5, %v1552_v25, %v5264_v37 }
 0x1ab   : > { %v8103_v10 = vpop.permute.xlu0 %5291  ;;  %4713 = vmatprep.subr.bf16.mxu1 %v4712_v27  ;;  %v5273_v51 = vunpack.i.l.bf16 %v8044_v4  ;;  %v1554_v61 = vsel %vm880_vm4, %v1522_v40, %v5189_v17  ;;  %v5198_v5 = vunpack.i.l.bf16 %v7893_v63  ;;  %v5194_v34 = vunpack.i.h.bf16 %v7895_v22  ;;  %v9947_v17 = vld [vmem:[#allocation157_spill] sm:$0xff] }
 0x1ac   : > { %4404 = vmatmul.mubr.f32.gmra.mrb[10].mxu1 %v1582_v26  ;;  %5586 = vrot.lane.b32.xlu1 %v9941_v53, %s6095_s10  ;;  %v1525_v62 = vsel %vm847_vm3, %v5118_v31, %v9945_v36  ;;  %v1586_v37 = vsel %vm913_vm5, %v1554_v61, %v5269_v57  ;;  %v5199_v22 = vunpack.i.h.bf16 %v7893_v63  ;;  %v5278_v26 = vunpack.i.l.bf16 %v8037_v56  ;;  %v9949_v53 = vld [vmem:[#allocation47_spill] sm:$0xff] }
 0x1ad   : > { %5581 = vrot.lane.b32.xlu0 %v5580_v1, %s6093_s9  ;;  %4406 = vmatprep.mubr.f32.mxu1 %v1583_v24  ;;  %v1585_v1 = vsel %vm913_vm5, %v1553_v3, %v5268_v8  ;;  %v9948_v8 = vld [vmem:[#allocation84_spill] sm:$0xff]  ;;  %v1524_v24 = vsel %vm847_vm3, %v5114_v19, %v9949_v53  ;;  %v1557_v63 = vsel %vm880_vm4, %v1525_v62, %v5198_v5  ;;  %v5123_v47 = vunpack.i.l.bf16 %v7785_v35 }
 0x1ae   : > { %v8126_v42 = vpop.permute.xlu1 %5306  ;;  %4715 = vmatpush3.bf16.msra.mxu1 %v4712_v27  ;;  %v5119_v27 = vunpack.i.h.bf16 %v7749_v29  ;;  %v5274_v29 = vunpack.i.h.bf16 %v8044_v4  ;;  %v1556_v3 = vsel %vm880_vm4, %v1524_v24, %v5194_v34  ;;  %v5203_v49 = vunpack.i.l.bf16 %v7903_v48  ;;  %v9953_v34 = vld [vmem:[#allocation52_spill] sm:$0xff] }
 0x1af   : > { %v8131_v0 = vpop.permute.xlu0 %5301  ;;  %4717 = vmatprep.subr.bf16.mxu1 %v4716_v43  ;;  %v5279_v40 = vunpack.i.h.bf16 %v8037_v56  ;;  %v5283_v25 = vunpack.i.l.bf16 %v8072_v41  ;;  %v1589_v57 = vsel %vm913_vm5, %v1557_v63, %v5278_v26  ;;  %v5129_v61 = vunpack.i.h.bf16 %v7780_v30 }
 0x1b0   : > { %4407 = vmatmul.mubr.f32.gmra.mrb[12].mxu1 %v1584_v50  ;;  %5596 = vrot.lane.b32.xlu1 %v5595_v32, %s6093_s9  ;;  %v1523_v32 = vsel %vm847_vm3, %v5113_v2, %v9944_v23  ;;  %v1526_v52 = vsel %vm847_vm3, %v5119_v27, %v9950_v14  ;;  %v1588_v2 = vsel %vm913_vm5, %v1556_v3, %v5274_v29  ;;  %v5124_v56 = vunpack.i.h.bf16 %v7785_v35 }
 0x1b1   : > { %5591 = vrot.lane.b32.xlu0 %v9897_v38, %s6094_s5  ;;  %4409 = vmatprep.mubr.f32.mxu1 %v1585_v1  ;;  %v1555_v38 = vsel %vm880_vm4, %v1523_v32, %v5193_v45  ;;  %v9951_v45 = vld [vmem:[#allocation91_spill] sm:$0xff]  ;;  %v1558_v50 = vsel %vm880_vm4, %v1526_v52, %v5199_v22  ;;  %v5208_v27 = vunpack.i.l.bf16 %v7901_v58  ;;  %v5204_v19 = vunpack.i.h.bf16 %v7903_v48  ;;  %v9954_v32 = vld [vmem:[#allocation50_spill] sm:$0xff] }
 0x1b2   : > { %v8144_v59 = vpop.permute.xlu1 %5316  ;;  %4719 = vmatpush3.bf16.msra.mxu1 %v4716_v43  ;;  %v1587_v21 = vsel %vm913_vm5, %v1555_v38, %v5273_v51  ;;  %v9946_v43 = vld [vmem:[#allocation159_spill] sm:$0xff]  ;;  %v5886_v51 = vld [vmem:[%s6325_s28 + $0x78] sm:$0xff]  ;;  %v1527_v23 = vsel %vm847_vm3, %v5123_v47, %v9953_v34  ;;  %v5284_v62 = vunpack.i.h.bf16 %v8072_v41  ;;  %v1590_v35 = vsel %vm913_vm5, %v1558_v50, %v5279_v40  ;;  %v5888_v34 = vld [vmem:[%s6325_s28 + $0x90] sm:$0xff] }
 0x1b3   : > { %v8151_v33 = vpop.permute.xlu0 %5311  ;;  %4721 = vmatprep.subr.bf16.mxu1 %v4720_v15  ;;  %v5610_v4 = vpack.i.bf16 %v9947_v17, %v9946_v43  ;;  %v1559_v29 = vsel %vm880_vm4, %v1527_v23, %v5203_v49  ;;  %v5288_v48 = vunpack.i.l.bf16 %v8067_v55  ;;  %v9955_v41 = vld [vmem:[#allocation53_spill] sm:$0xff]  ;;  %v5133_v17 = vunpack.i.l.bf16 %v7818_v46  ;;  %v9957_v49 = vld [vmem:[#allocation90_spill] sm:$0xff]  ;;  %v5887_v40 = vld [vmem:[%s6325_s28 + $0x88] sm:$0xff] }
 0x1b4   : > { %4410 = vmatmul.mubr.f32.gmra.mrb[14].mxu1 %v1586_v37  ;;  %5606 = vrot.lane.b32.xlu1 %v9900_v18, %s6094_s5  ;;  %v5128_v18 = vunpack.i.l.bf16 %v7780_v30  ;;  %v5209_v37 = vunpack.i.h.bf16 %v7901_v58  ;;  %v1591_v38 = vsel %vm913_vm5, %v1559_v29, %v5283_v25  ;;  %v1528_v22 = vsel %vm847_vm3, %v5124_v56, %v9955_v41  ;;  %v9962_v23 = vld [vmem:[#allocation136_spill] sm:$0xff] }
 0x1b5   : > { %5601 = vrot.lane.b32.xlu0 %v9948_v8, %s6095_s10  ;;  %4412 = vmatprep.mubr.f32.mxu1 %v1587_v21  ;;  %v9956_v21 = vld [vmem:[#allocation51_spill] sm:$0xff]  ;;  %v5138_v58 = vunpack.i.l.bf16 %v7805_v54  ;;  %v1560_v8 = vsel %vm880_vm4, %v1528_v22, %v5204_v19  ;;  %v5289_v53 = vunpack.i.h.bf16 %v8067_v55  ;;  %v5293_v14 = vunpack.i.l.bf16 %v8103_v10 }
 0x1b6   : > { %v8171_v28 = vpop.permute.xlu1 %5326  ;;  %4723 = vmatpush3.bf16.msra.mxu1 %v4720_v15  ;;  %v9952_v15 = vld [vmem:[#allocation160_spill] sm:$0xff]  ;;  %v1529_v36 = vsel %vm847_vm3, %v5128_v18, %v9954_v32  ;;  %v1530_v43 = vsel %vm847_vm3, %v5129_v61, %v9956_v21  ;;  %v1592_v63 = vsel %vm913_vm5, %v1560_v8, %v5284_v62  ;;  %v5139_v47 = vunpack.i.h.bf16 %v7805_v54 }
 0x1b7   : > { %v8176_v31 = vpop.permute.xlu0 %5321  ;;  %v5625_v1 = vpack.i.bf16 %v9952_v15, %v5886_v51  ;;  %v1561_v26 = vsel %vm880_vm4, %v1529_v36, %v5208_v27  ;;  %v1562_v18 = vsel %vm880_vm4, %v1530_v43, %v5209_v37  ;;  %v5134_v3 = vunpack.i.h.bf16 %v7818_v46  ;;  %v9960_v54 = vld [vmem:[#allocation56_spill] sm:$0xff]  ;;  %v9961_v27 = vld [vmem:[#allocation97_spill] sm:$0xff] }
 0x1b8   : > { %4413 = vmatmul.mubr.f32.gmra.mrb[16].mxu1 %v1588_v2  ;;  %5616 = vrot.lane.b32.xlu1 %v9951_v45, %s6095_s10  ;;  %v1593_v52 = vsel %vm913_vm5, %v1561_v26, %v5288_v48  ;;  %v5218_v55 = vunpack.i.l.bf16 %v7909_v39  ;;  %v9958_v2 = vld [vmem:[#allocation139_spill] sm:$0xff]  ;;  %v1533_v46 = vsel %vm847_vm3, %v5138_v58, %v9960_v54  ;;  %v5294_v51 = vunpack.i.h.bf16 %v8103_v10  ;;  %v9969_v54 = vld [vmem:[#allocation144_spill] sm:$0xff] }
 0x1b9   : > { %5611 = vrot.lane.b32.xlu0 %v5610_v4, %s6093_s9  ;;  %4415 = vmatprep.mubr.f32.mxu1 %v1589_v57  ;;  %v5640_v25 = vpack.i.bf16 %v9958_v2, %v5887_v40  ;;  %v9959_v57 = vld [vmem:[#allocation58_spill] sm:$0xff]  ;;  %v5219_v56 = vunpack.i.h.bf16 %v7909_v39  ;;  %v5650_v32 = vpack.i.bf16 %v9962_v23, %v5888_v34  ;;  %v9963_v10 = vld [vmem:[#allocation59_spill] sm:$0xff]  ;;  %v9964_v39 = vld [vmem:[#allocation57_spill] sm:$0xff]  ;;  %v5148_v29 = vunpack.i.l.bf16 %v7842_v44 }
 0x1ba   : > { %v8191_v5 = vpop.permute.xlu1 %5336  ;;  %v1531_v50 = vsel %vm847_vm3, %v5133_v17, %v9959_v57  ;;  %v1532_v36 = vsel %vm847_vm3, %v5134_v3, %v9963_v10  ;;  %v1565_v62 = vsel %vm880_vm4, %v1533_v46, %v5218_v55  ;;  %v5143_v37 = vunpack.i.l.bf16 %v7847_v9  ;;  %v9967_v3 = vld [vmem:[#allocation62_spill] sm:$0xff] }
 0x1bb   : > { %v8198_v30 = vpop.permute.xlu0 %5331  ;;  %v5223_v41 = vunpack.i.l.bf16 %v7924_v12  ;;  %v5299_v22 = vunpack.i.h.bf16 %v8094_v11  ;;  %v5303_v43 = vunpack.i.l.bf16 %v8131_v0  ;;  %v5149_v8 = vunpack.i.h.bf16 %v7842_v44 }
 0x1bc   : > { %4416 = vmatmul.mubr.f32.gmra.mrb[18].mxu1 %v1590_v35  ;;  %5626 = vrot.lane.b32.xlu1 %v5625_v1, %s6093_s9  ;;  %v1594_v1 = vsel %vm913_vm5, %v1562_v18, %v5289_v53  ;;  %v1534_v35 = vsel %vm847_vm3, %v5139_v47, %v9964_v39  ;;  %v5889_v53 = vld [vmem:[%s6325_s28 + $0x98] sm:$0xff]  ;;  %v9966_v18 = vld [vmem:[#allocation64_spill] sm:$0xff]  ;;  %v1537_v44 = vsel %vm847_vm3, %v5148_v29, %v9967_v3 }
 0x1bd   : > { %5621 = vrot.lane.b32.xlu0 %v9899_v20, %s6094_s5  ;;  %4418 = vmatprep.mubr.f32.mxu1 %v1591_v38  ;;  %v5213_v20 = vunpack.i.l.bf16 %v7911_v6  ;;  %v1566_v17 = vsel %vm880_vm4, %v1534_v35, %v5219_v56  ;;  %v1535_v47 = vsel %vm847_vm3, %v5143_v37, %v9966_v18  ;;  %v5892_v37 = vld [vmem:[%s6325_s28 + $0xb0] sm:$0xff] }
 0x1be   : > { %v8215_v4 = vpop.permute.xlu1 %5346  ;;  %v1567_v40 = vsel %vm880_vm4, %v1535_v47, %v5223_v41 }
 0x1bf   : > { %v8220_v24 = vpop.permute.xlu0 %5341  ;;  %v1563_v61 = vsel %vm880_vm4, %v1531_v50, %v5213_v20  ;;  %v5144_v20 = vunpack.i.h.bf16 %v7847_v9  ;;  %v5304_v9 = vunpack.i.h.bf16 %v8131_v0  ;;  %v1599_v57 = vsel %vm913_vm5, %v1567_v40, %v5303_v43  ;;  %v5890_v50 = vld [vmem:[%s6325_s28 + $0xa0] sm:$0xff]  ;;  %v9970_v0 = vld [vmem:[#allocation65_spill] sm:$0xff] }
 0x1c0   : > { %4419 = vmatmul.mubr.f32.gmra.mrb[20].mxu1 %v1592_v63  ;;  %5636 = vrot.lane.b32.xlu1 %v9902_v7, %s6094_s5  ;;  %v5214_v7 = vunpack.i.h.bf16 %v7911_v6  ;;  %v5298_v6 = vunpack.i.l.bf16 %v8094_v11  ;;  %v1595_v19 = vsel %vm913_vm5, %v1563_v61, %v5293_v14  ;;  %v5228_v11 = vunpack.i.l.bf16 %v7920_v60  ;;  %v9965_v63 = vld [vmem:[#allocation137_spill] sm:$0xff]  ;;  %v9975_v43 = vld [vmem:[#allocation54_spill] sm:$0xff] }
 0x1c1   : > { %5631 = vrot.lane.b32.xlu0 %v9957_v49, %s6095_s10  ;;  %4421 = vmatprep.mubr.f32.mxu1 %v1593_v52  ;;  %v5660_v14 = vpack.i.bf16 %v9965_v63, %v5889_v53  ;;  %v5224_v52 = vunpack.i.h.bf16 %v7924_v12  ;;  %v1598_v49 = vsel %vm913_vm5, %v1566_v17, %v5299_v22  ;;  %v5308_v12 = vunpack.i.l.bf16 %v8126_v42  ;;  %v9976_v17 = vld [vmem:[#allocation143_spill] sm:$0xff]  ;;  %v9977_v53 = vld [vmem:[#allocation102_spill] sm:$0xff] }
 0x1c2   : > { %v8236_v45 = vpop.permute.xlu1 %5356  ;;  %v1564_v38 = vsel %vm880_vm4, %v1532_v36, %v5214_v7  ;;  %v1597_v58 = vsel %vm913_vm5, %v1565_v62, %v5298_v6  ;;  %v9968_v7 = vld [vmem:[#allocation96_spill] sm:$0xff]  ;;  %v5670_v46 = vpack.i.bf16 %v9969_v54, %v5890_v50  ;;  %v5891_v36 = vld [vmem:[%s6325_s28 + $0xa8] sm:$0xff]  ;;  %v9972_v62 = vld [vmem:[#allocation145_spill] sm:$0xff] }
 0x1c3   : > { %v8243_v15 = vpop.permute.xlu0 %5351  ;;  %v1596_v21 = vsel %vm913_vm5, %v1564_v38, %v5294_v51  ;;  %v1536_v51 = vsel %vm847_vm3, %v5144_v20, %v9970_v0  ;;  %v9974_v38 = vld [vmem:[#allocation142_spill] sm:$0xff] }
 0x1c4   : > { %4422 = vmatmul.mubr.f32.gmra.mrb[22].mxu1 %v1594_v1  ;;  %5646 = vrot.lane.b32.xlu1 %v9961_v27, %s6095_s10  ;;  %v9971_v1 = vld [vmem:[#allocation63_spill] sm:$0xff]  ;;  %v1568_v6 = vsel %vm880_vm4, %v1536_v51, %v5224_v52  ;;  %v5309_v27 = vunpack.i.h.bf16 %v8126_v42  ;;  %v5680_v42 = vpack.i.bf16 %v9972_v62, %v5891_v36  ;;  %v5690_v41 = vpack.i.bf16 %v9974_v38, %v5892_v37  ;;  %v9978_v52 = vld [vmem:[#allocation148_spill] sm:$0xff]  ;;  %v9982_v50 = vld [vmem:[#allocation146_spill] sm:$0xff] }
 0x1c5   : > { %5641 = vrot.lane.b32.xlu0 %v5640_v25, %s6093_s9  ;;  %4424 = vmatprep.mubr.f32.mxu1 %v1595_v19  ;;  %v5229_v25 = vunpack.i.h.bf16 %v7920_v60  ;;  %v1569_v60 = vsel %vm880_vm4, %v1537_v44, %v5228_v11  ;;  %v1538_v61 = vsel %vm847_vm3, %v5149_v8, %v9971_v1  ;;  %v1600_v34 = vsel %vm913_vm5, %v1568_v6, %v5304_v9  ;;  %v9979_v44 = vld [vmem:[#allocation61_spill] sm:$0xff]  ;;  %v5895_v9 = vld [vmem:[%s6325_s28 + $0xc8] sm:$0xff]  ;;  %v9986_v36 = vld [vmem:[#allocation152_spill] sm:$0xff] }
 0x1c6   : > { %v8262_v48 = vpop.permute.xlu1 %5366  ;;  %v5897_v1 = vld [vmem:[%s6325_s28 + $0xd8] sm:$0xff] }
 0x1c7   : > { %v8267_v26 = vpop.permute.xlu0 %5361  ;;  %v1570_v10 = vsel %vm880_vm4, %v1538_v61, %v5229_v25  ;;  %v9984_v61 = vld [vmem:[#allocation147_spill] sm:$0xff] }
 0x1c8   : > { %4425 = vmatmul.mubr.f32.gmra.mrb[24].mxu1 %v1596_v21  ;;  %5656 = vrot.lane.b32.xlu1 %v9901_v16, %s6094_s5  ;;  %v1602_v29 = vsel %vm913_vm5, %v1570_v10, %v5309_v27  ;;  %v5740_v6 = vpack.i.bf16 %v9984_v61, %v5897_v1  ;;  %v5898_v10 = vld [vmem:[%s6325_s28 + $0xe0] sm:$0xff] }
 0x1c9   : > { %5651 = vrot.lane.b32.xlu0 %v5650_v32, %s6093_s9  ;;  %4427 = vmatprep.mubr.f32.mxu1 %v1597_v58  ;;  %v1601_v32 = vsel %vm913_vm5, %v1569_v60, %v5308_v12  ;;  %v5893_v58 = vld [vmem:[%s6325_s28 + $0xb8] sm:$0xff]  ;;  %v9983_v60 = vld [vmem:[#allocation60_spill] sm:$0xff] }
 0x1ca   : > { %v8282_v16 = vpop.permute.xlu1 %5376  ;;  %v5700_v8 = vpack.i.bf16 %v9976_v17, %v5893_v58 }
 0x1cb   : > { %v8289_v55 = vpop.permute.xlu0 %5371 }
 0x1cc   : > { %4428 = vmatmul.mubr.f32.gmra.mrb[26].mxu1 %v1598_v49  ;;  %5666 = vrot.lane.b32.xlu1 %v9968_v7, %s6095_s10  ;;  %v9980_v49 = vld [vmem:[#allocation149_spill] sm:$0xff]  ;;  %v9981_v7 = vld [vmem:[#allocation111_spill] sm:$0xff] }
 0x1cd   : > { %5661 = vrot.lane.b32.xlu0 %v5660_v14, %s6093_s9  ;;  %4430 = vmatprep.mubr.f32.mxu1 %v1599_v57  ;;  %v5894_v14 = vld [vmem:[%s6325_s28 + $0xc0] sm:$0xff]  ;;  %v5720_v40 = vpack.i.bf16 %v9980_v49, %v5895_v9  ;;  %v5896_v57 = vld [vmem:[%s6325_s28 + $0xd0] sm:$0xff]  ;;  %v5899_v9 = vld [vmem:[%s6325_s28 + $0xe8] sm:$0xff] }
 0x1ce   : > { %v8306_v56 = vpop.permute.xlu1 %5386  ;;  %v5710_v18 = vpack.i.bf16 %v9978_v52, %v5894_v14  ;;  %v9987_v14 = vld [vmem:[#allocation69_spill] sm:$0xff] }
 0x1cf   : > { %v8310_v19 = vpop.permute.xlu0 %5381 }
 0x1d0   : > { %4431 = vmatmul.mubr.f32.gmra.mrb[28].mxu1 %v1600_v34  ;;  %5676 = vrot.lane.b32.xlu1 %v9904_v13, %s6094_s5  ;;  %v9973_v13 = vld [vmem:[#allocation105_spill] sm:$0xff] }
 0x1d1   : > { %5671 = vrot.lane.b32.xlu0 %v5670_v46, %s6093_s9  ;;  %4433 = vmatprep.mubr.f32.mxu1 %v1601_v32  ;;  %v5730_v46 = vpack.i.bf16 %v9982_v50, %v5896_v57  ;;  %v9985_v32 = vld [vmem:[#allocation108_spill] sm:$0xff] }
 0x1d2   : > { %v8320_v39 = vpop.permute.xlu1 %5396 }
 0x1d3   : > { %v5392_v35 = vpop.permute.xlu0 %5391 }
 0x1d4   : > { %4434 = vmatmul.mubr.f32.gmra.mrb[30].mxu1 %v1602_v29  ;;  %5686 = vrot.lane.b32.xlu1 %v9973_v13, %s6095_s10  ;;  %v5318_v29 = vunpack.i.l.bf16 %v8144_v59  ;;  %v5398_v13 = vunpack.i.l.bf16 %v8320_v39  ;;  %v5394_v37 = vunpack.i.h.bf16 %v5392_v35 }
 0x1d5   : > { %5681 = vrot.lane.b32.xlu0 %v5680_v42, %s6093_s9  ;;  %v5750_v42 = vpack.i.bf16 %v9986_v36, %v5898_v10 }
 0x1d6   : > { %v8328_v22 = vpop.permute.xlu1 %5406 }
 0x1d7   : > { %v8330_v21 = vpop.permute.xlu0 %5401 }
 0x1d8   : > { %5696 = vrot.lane.b32.xlu1 %v9975_v43, %s6094_s5 }
 0x1d9   : > { %5691 = vrot.lane.b32.xlu0 %v5690_v41, %s6093_s9  ;;  %v5393_v41 = vunpack.i.l.bf16 %v5392_v35  ;;  %v9988_v35 = vld [vmem:[#allocation153_spill] sm:$0xff] }
 0x1da   : > { %v8337_v20 = vpop.permute.xlu1 %5416 }
 0x1db   : > { %v8339_v11 = vpop.permute.xlu0 %5411 }
 0x1dc   : > { %5706 = vrot.lane.b32.xlu1 %v9977_v53, %s6095_s10  ;;  %v5313_v53 = vunpack.i.l.bf16 %v8151_v33 }
 0x1dd   : > { %5701 = vrot.lane.b32.xlu0 %v5700_v8, %s6093_s9  ;;  %v5314_v8 = vunpack.i.h.bf16 %v8151_v33  ;;  %v5328_v33 = vunpack.i.l.bf16 %v8171_v28 }
 0x1de   : > { %v8346_v47 = vpop.permute.xlu1 %5426 }
 0x1df   : > { %v8348_v3 = vpop.permute.xlu0 %5421 }
 0x1e0   : > { %5716 = vrot.lane.b32.xlu1 %v9979_v44, %s6094_s5  ;;  %v5399_v44 = vunpack.i.h.bf16 %v8320_v39  ;;  %v5403_v39 = vunpack.i.l.bf16 %v8330_v21 }
 0x1e1   : > { %5711 = vrot.lane.b32.xlu0 %v5710_v18, %s6093_s9  ;;  %v5319_v18 = vunpack.i.h.bf16 %v8144_v59 }
 0x1e2   : > { %v8355_v25 = vpop.permute.xlu1 %5436 }
 0x1e3   : > { %v8357_v12 = vpop.permute.xlu0 %5431 }
 0x1e4   : > { %5726 = vrot.lane.b32.xlu1 %v9981_v7, %s6095_s10  ;;  %v2166_v7 = vsel %vm847_vm3, %v5314_v8, %v5394_v37  ;;  %v9991_v37 = vld [vmem:[#allocation70_spill] sm:$0xff]  ;;  %v9993_v8 = vld [vmem:[#allocation67_spill] sm:$0xff] }
 0x1e5   : > { %5721 = vrot.lane.b32.xlu0 %v5720_v40, %s6093_s9  ;;  %v5760_v40 = vpack.i.bf16 %v9988_v35, %v5899_v9  ;;  %v9990_v9 = vld [vmem:[#allocation117_spill] sm:$0xff] }
 0x1e6   : > { %v8364_v0 = vpop.permute.xlu1 %5446 }
 0x1e7   : > { %v8366_v51 = vpop.permute.xlu0 %5441 }
 0x1e8   : > { %5736 = vrot.lane.b32.xlu1 %v9983_v60, %s6094_s5  ;;  %v2167_v60 = vsel %vm847_vm3, %v5318_v29, %v5398_v13  ;;  %v9992_v29 = vld [vmem:[#allocation71_spill] sm:$0xff] }
 0x1e9   : > { %5731 = vrot.lane.b32.xlu0 %v5730_v46, %s6093_s9  ;;  %v2165_v46 = vsel %vm847_vm3, %v5313_v53, %v5393_v41  ;;  %v2198_v13 = vsel %vm880_vm4, %v2166_v7, %v9992_v29  ;;  %v2199_v53 = vsel %vm880_vm4, %v2167_v60, %v9993_v8  ;;  %v9995_v60 = vld [vmem:[#allocation68_spill] sm:$0xff] }
 0x1ea   : > { %v8373_v27 = vpop.permute.xlu1 %5456  ;;  %v2197_v41 = vsel %vm880_vm4, %v2165_v46, %v9991_v37  ;;  %v5404_v46 = vunpack.i.h.bf16 %v8330_v21  ;;  %v5409_v21 = vunpack.i.h.bf16 %v8328_v22 }
 0x1eb   : > { %v8375_v34 = vpop.permute.xlu0 %5451 }
 0x1ec   : > { %5746 = vrot.lane.b32.xlu1 %v9985_v32, %s6095_s10  ;;  %v9989_v32 = vld [vmem:[#allocation150_spill] sm:$0xff] }
 0x1ed   : > { %5741 = vrot.lane.b32.xlu0 %v5740_v6, %s6093_s9  ;;  %v5900_v6 = vld [vmem:[%s6325_s28 + $0xf0] sm:$0xff] }
 0x1ee   : > { %v8384_v43 = vpop.permute.xlu1 %5466  ;;  %v5770_v59 = vpack.i.bf16 %v9989_v32, %v5900_v6  ;;  %v2168_v6 = vsel %vm847_vm3, %v5319_v18, %v5399_v44  ;;  %v5323_v32 = vunpack.i.l.bf16 %v8176_v31  ;;  %v9994_v18 = vld [vmem:[#allocation66_spill] sm:$0xff] }
 0x1ef   : > { %v8386_v58 = vpop.permute.xlu0 %5461  ;;  %v2200_v8 = vsel %vm880_vm4, %v2168_v6, %v9995_v60  ;;  %v5333_v60 = vunpack.i.l.bf16 %v8198_v30 }
 0x1f0   : > { %5756 = vrot.lane.b32.xlu1 %v9987_v14, %s6094_s5 }
 0x1f1   : > { %5751 = vrot.lane.b32.xlu0 %v5750_v42, %s6093_s9 }
 0x1f2   : > { %v5477_v57 = vpop.permute.xlu1 %5476 }
 0x1f3   : > { %v5472_v1 = vpop.permute.xlu0 %5471  ;;  %v5478_v10 = vunpack.i.l.bf16 %v5477_v57  ;;  %v5479_v37 = vunpack.i.h.bf16 %v5477_v57  ;;  %v5901_v57 = vld [vmem:[%s6325_s28 + $0xf8] sm:$0xff] }
 0x1f4   : > { %v5474_v42 = vunpack.i.h.bf16 %v5472_v1  ;;  %v5473_v14 = vunpack.i.l.bf16 %v5472_v1  ;;  %5766 = vrot.lane.b32.xlu1 %v9990_v9, %s6095_s10  ;;  %v5408_v1 = vunpack.i.l.bf16 %v8328_v22 }
 0x1f5   : > { %5761 = vrot.lane.b32.xlu0 %v5760_v40, %s6093_s9  ;;  %v2231_v44 = vsel %vm913_vm5, %v2199_v53, %v5478_v10 }
 0x1f6   : > { %v8416_v35 = vpop.permute.xlu1 %5486  ;;  %v2229_v9 = vsel %vm913_vm5, %v2197_v41, %v5473_v14  ;;  %v2230_v40 = vsel %vm913_vm5, %v2198_v13, %v5474_v42  ;;  %v2169_v14 = vsel %vm847_vm3, %v5323_v32, %v5403_v39  ;;  %v5329_v42 = vunpack.i.h.bf16 %v8171_v28  ;;  %v9996_v13 = vld [vmem:[#allocation151_spill] sm:$0xff]  ;;  %v9997_v28 = vld [vmem:[#allocation76_spill] sm:$0xff] }
 0x1f7   : > { %v5482_v7 = vpop.permute.xlu0 %5481  ;;  %4468 = vmatprep.mubr.f32.mxu0 %v2229_v9  ;;  %v5324_v41 = vunpack.i.h.bf16 %v8176_v31  ;;  %v5780_v9 = vpack.i.bf16 %v9996_v13, %v5901_v57  ;;  %v2171_v10 = vsel %vm847_vm3, %v5328_v33, %v5408_v1  ;;  %v2232_v32 = vsel %vm913_vm5, %v2200_v8, %v5479_v37  ;;  %v9999_v37 = vld [vmem:[#allocation73_spill] sm:$0xff] }
 0x1f8   : > { %v5483_v29 = vunpack.i.l.bf16 %v5482_v7  ;;  %4469 = vmatmul.mubr.f32.vlgmr.msra.gmra.mrb[32].mxu0 %v2230_v40  ;;  %5776 = vrot.lane.b32.xlu1 %v9994_v18, %s6094_s5  ;;  %v5484_v53 = vunpack.i.h.bf16 %v5482_v7  ;;  %v2201_v31 = vsel %vm880_vm4, %v2169_v14, %v9997_v28  ;;  %v5488_v39 = vunpack.i.l.bf16 %v8416_v35  ;;  %v9998_v18 = vld [vmem:[#allocation114_spill] sm:$0xff] }
 0x1f9   : > { %5771 = vrot.lane.b32.xlu0 %v5770_v59, %s6093_s9  ;;  %4471 = vmatprep.mubr.f32.mxu0 %v2231_v44  ;;  %v2170_v22 = vsel %vm847_vm3, %v5324_v41, %v5404_v46  ;;  %v5413_v59 = vunpack.i.l.bf16 %v8339_v11  ;;  %v5339_v1 = vunpack.i.h.bf16 %v8191_v5  ;;  %v5338_v7 = vunpack.i.l.bf16 %v8191_v5  ;;  %v10001_v28 = vld [vmem:[#allocation74_spill] sm:$0xff] }
 0x1fa   : > { %v8433_v40 = vpop.permute.xlu1 %5496  ;;  %v2233_v33 = vsel %vm913_vm5, %v2201_v31, %v5483_v29  ;;  %v2203_v46 = vsel %vm880_vm4, %v2171_v10, %v9999_v37  ;;  %v2172_v44 = vsel %vm847_vm3, %v5329_v42, %v5409_v21  ;;  %v5419_v8 = vunpack.i.h.bf16 %v8337_v20  ;;  %v10000_v29 = vld [vmem:[#allocation77_spill] sm:$0xff] }
 0x1fb   : > { %v8436_v6 = vpop.permute.xlu0 %5491  ;;  %v5418_v14 = vunpack.i.l.bf16 %v8337_v20  ;;  %v2202_v57 = vsel %vm880_vm4, %v2170_v22, %v10000_v29  ;;  %v5414_v5 = vunpack.i.h.bf16 %v8339_v11  ;;  %v2235_v21 = vsel %vm913_vm5, %v2203_v46, %v5488_v39 }
 0x1fc   : > { %4472 = vmatmul.mubr.f32.gmra.mrb[34].mxu0 %v2232_v32  ;;  %5786 = vrot.lane.b32.xlu1 %v9998_v18, %s6095_s10  ;;  %v2234_v10 = vsel %vm913_vm5, %v2202_v57, %v5484_v53  ;;  %v5493_v42 = vunpack.i.l.bf16 %v8436_v6  ;;  %v2204_v20 = vsel %vm880_vm4, %v2172_v44, %v10001_v28  ;;  %v2173_v31 = vsel %vm847_vm3, %v5333_v60, %v5413_v59  ;;  %v10002_v60 = vld [vmem:[#allocation82_spill] sm:$0xff] }
 0x1fd   : > { %5781 = vrot.lane.b32.xlu0 %v5780_v9, %s6093_s9  ;;  %4474 = vmatprep.mubr.f32.mxu0 %v2233_v33  ;;  %v5489_v9 = vunpack.i.h.bf16 %v8416_v35  ;;  %v5334_v22 = vunpack.i.h.bf16 %v8198_v30  ;;  %v5349_v11 = vunpack.i.h.bf16 %v8215_v4  ;;  %v5348_v35 = vunpack.i.l.bf16 %v8215_v4 }
 0x1fe   : > { %v8456_v41 = vpop.permute.xlu1 %5506  ;;  %v5344_v18 = vunpack.i.h.bf16 %v8220_v24  ;;  %v5343_v53 = vunpack.i.l.bf16 %v8220_v24  ;;  %v5423_v33 = vunpack.i.l.bf16 %v8348_v3  ;;  %v2175_v39 = vsel %vm847_vm3, %v5338_v7, %v5418_v14 }
 0x1ff   : > { %v8462_v32 = vpop.permute.xlu0 %5501  ;;  %v2176_v46 = vsel %vm847_vm3, %v5339_v1, %v5419_v8  ;;  %v5494_v59 = vunpack.i.h.bf16 %v8436_v6  ;;  %v2236_v30 = vsel %vm913_vm5, %v2204_v20, %v5489_v9  ;;  %v2205_v4 = vsel %vm880_vm4, %v2173_v31, %v10002_v60  ;;  %v10003_v8 = vld [vmem:[#allocation79_spill] sm:$0xff]  ;;  %v10004_v9 = vld [vmem:[#allocation80_spill] sm:$0xff] }
 0x200   : > { %4475 = vmatmul.mubr.f32.gmra.mrb[36].mxu0 %v2234_v10  ;;  %v2174_v29 = vsel %vm847_vm3, %v5334_v22, %v5414_v5  ;;  %v5498_v24 = vunpack.i.l.bf16 %v8433_v40  ;;  %v2237_v7 = vsel %vm913_vm5, %v2205_v4, %v5493_v42  ;;  %v5429_v1 = vunpack.i.h.bf16 %v8346_v47  ;;  %v10005_v31 = vld [vmem:[#allocation83_spill] sm:$0xff] }
 0x201   : > { %4477 = vmatprep.mubr.f32.mxu0 %v2235_v21  ;;  %v5428_v6 = vunpack.i.l.bf16 %v8346_v47  ;;  %v2207_v14 = vsel %vm880_vm4, %v2175_v39, %v10003_v8  ;;  %v2208_v21 = vsel %vm880_vm4, %v2176_v46, %v10004_v9  ;;  %v5424_v5 = vunpack.i.h.bf16 %v8348_v3 }
 0x202   : > { %v5517_v37 = vpop.permute.xlu1 %5516  ;;  %v2206_v22 = vsel %vm880_vm4, %v2174_v29, %v10005_v31  ;;  %v2177_v42 = vsel %vm847_vm3, %v5343_v53, %v5423_v33  ;;  %v5503_v39 = vunpack.i.l.bf16 %v8462_v32  ;;  %v2239_v3 = vsel %vm913_vm5, %v2207_v14, %v5498_v24 }
 0x203   : > { %v8479_v44 = vpop.permute.xlu0 %5511  ;;  %v5518_v57 = vunpack.i.l.bf16 %v5517_v37  ;;  %v5519_v28 = vunpack.i.h.bf16 %v5517_v37  ;;  %v5353_v46 = vunpack.i.l.bf16 %v8243_v15  ;;  %v2180_v33 = vsel %vm847_vm3, %v5349_v11, %v5429_v1 }
 0x204   : > { %v5514_v10 = vunpack.i.h.bf16 %v8479_v44  ;;  %4478 = vmatmul.mubr.f32.gmra.mrb[38].mxu0 %v2236_v30  ;;  %v5499_v30 = vunpack.i.h.bf16 %v8433_v40  ;;  %v2179_v40 = vsel %vm847_vm3, %v5348_v35, %v5428_v6  ;;  %v5433_v29 = vunpack.i.l.bf16 %v8357_v12  ;;  %v10007_v35 = vld [vmem:[#allocation88_spill] sm:$0xff] }
 0x205   : > { %4480 = vmatprep.mubr.f32.mxu0 %v2237_v7  ;;  %v2238_v7 = vsel %vm913_vm5, %v2206_v22, %v5494_v59  ;;  %v2178_v24 = vsel %vm847_vm3, %v5344_v18, %v5424_v5  ;;  %v2209_v11 = vsel %vm880_vm4, %v2177_v42, %v10007_v35  ;;  %v5508_v6 = vunpack.i.l.bf16 %v8456_v41  ;;  %v10008_v5 = vld [vmem:[#allocation119_spill] sm:$0xff] }
 0x206   : > { %v5527_v20 = vpop.permute.xlu1 %5526  ;;  %v2823_v37 = vsel %vm847_vm3, %v5514_v10, %v5518_v57  ;;  %v5504_v57 = vunpack.i.h.bf16 %v8462_v32  ;;  %v2240_v22 = vsel %vm913_vm5, %v2208_v21, %v5499_v30  ;;  %v2241_v18 = vsel %vm913_vm5, %v2209_v11, %v5503_v39 }
 0x207   : > { %v5529_v60 = vunpack.i.h.bf16 %v5527_v20  ;;  %v5528_v47 = vunpack.i.l.bf16 %v5527_v20  ;;  %v5522_v4 = vpop.permute.xlu0 %5521  ;;  %v10006_v20 = vld [vmem:[#allocation118_spill] sm:$0xff]  ;;  %v5509_v21 = vunpack.i.h.bf16 %v8456_v41 }
 0x208   : > { %v5523_v8 = vunpack.i.l.bf16 %v5522_v4  ;;  %4481 = vmatmul.mubr.f32.gmra.mrb[40].mxu0 %v2238_v7 }
 0x209   : > { %4483 = vmatprep.mubr.f32.mxu0 %v2239_v3  ;;  %v2855_v53 = vsel %vm880_vm4, %v2823_v37, %v5528_v47  ;;  %v10009_v47 = vld [vmem:[#allocation86_spill] sm:$0xff]  ;;  %v10010_v37 = vld [vmem:[#allocation89_spill] sm:$0xff] }
 0x20a   : > { %v2824_v59 = vsel %vm847_vm3, %v5523_v8, %v5519_v28  ;;  %v5537_v9 = vpop.permute.xlu1 %5536  ;;  %v2887_v31 = vsel %vm913_vm5, %v2855_v53, %v10006_v20  ;;  %v2211_v7 = vsel %vm880_vm4, %v2179_v40, %v10009_v47  ;;  %v2210_v53 = vsel %vm880_vm4, %v2178_v24, %v10010_v37 }
 0x20b   : > { %v5532_v10 = vpop.permute.xlu0 %5531  ;;  %v8513_v14 = vpop.f32.mrb[0].mxu0  ;;  %4548 = vmatprep.mubr.f32.mxu1 %v2887_v31  ;;  %v2856_v1 = vsel %vm880_vm4, %v2824_v59, %v5529_v60  ;;  %v5538_v30 = vunpack.i.l.bf16 %v5537_v9  ;;  %v5539_v60 = vunpack.i.h.bf16 %v5537_v9  ;;  %v10011_v59 = vld [vmem:[#allocation87_spill] sm:$0xff]  ;;  %v2181_v20 = vsel %vm847_vm3, %v5353_v46, %v5433_v29  ;;  %v10012_v46 = vld [vmem:[#allocation94_spill] sm:$0xff] }
 0x20c   : > { %v8520_v28 = vpop.f32.mrb[1].mxu0  ;;  %4484 = vmatmul.mubr.f32.gmra.mrb[42].mxu0 %v2240_v22  ;;  %v2888_v32 = vsel %vm913_vm5, %v2856_v1, %v10008_v5  ;;  %v5534_v8 = vunpack.i.h.bf16 %v5532_v10  ;;  %v5533_v42 = vunpack.i.l.bf16 %v5532_v10  ;;  %v2212_v39 = vsel %vm880_vm4, %v2180_v33, %v10011_v59  ;;  %v10014_v59 = vld [vmem:[#allocation116_spill] sm:$0xff] }
 0x20d   : > { %4486 = vmatprep.mubr.f32.mxu0 %v2241_v18  ;;  %4549 = vmatmul.mubr.f32.vlgmr.msra.gmra.mrb[32].mxu1 %v2888_v32  ;;  %v5524_v31 = vunpack.i.h.bf16 %v5522_v4  ;;  %v2242_v41 = vsel %vm913_vm5, %v2210_v53, %v5504_v57  ;;  %v5513_v10 = vunpack.i.l.bf16 %v8479_v44  ;;  %v2243_v24 = vsel %vm913_vm5, %v2211_v7, %v5508_v6 }
 0x20e   : > { %v5547_v3 = vpop.permute.xlu1 %5546  ;;  %v2244_v33 = vsel %vm913_vm5, %v2212_v39, %v5509_v21  ;;  %v2213_v29 = vsel %vm880_vm4, %v2181_v20, %v10012_v46  ;;  %v2826_v18 = vsel %vm847_vm3, %v5538_v30, %v5534_v8  ;;  %v10013_v21 = vld [vmem:[#allocation115_spill] sm:$0xff] }
 0x20f   : > { %v5548_v22 = vunpack.i.l.bf16 %v5547_v3  ;;  %v5542_v40 = vpop.permute.xlu0 %5541  ;;  %v8533_v35 = vpop.f32.mrb[2].mxu0  ;;  %v2825_v4 = vsel %vm847_vm3, %v5524_v31, %v5533_v42  ;;  %v5549_v57 = vunpack.i.h.bf16 %v5547_v3  ;;  %v2245_v3 = vsel %vm913_vm5, %v2213_v29, %v5513_v10  ;;  %v10015_v31 = vld [vmem:[#allocation123_spill] sm:$0xff] }
 0x210   : > { %v5544_v11 = vunpack.i.h.bf16 %v5542_v40  ;;  %v5543_v9 = vunpack.i.l.bf16 %v5542_v40  ;;  %v8537_v1 = vpop.f32.mrb[3].mxu0  ;;  %4487 = vmatmul.mubr.f32.gmra.mrb[44].mxu0 %v2242_v41 }
 0x211   : > { %4489 = vmatprep.mubr.f32.mxu0 %v2243_v24  ;;  %v2827_v47 = vsel %vm847_vm3, %v5539_v60, %v5548_v22 }
 0x212   : > { %v5557_v5 = vpop.permute.xlu1 %5556  ;;  %v2857_v44 = vsel %vm880_vm4, %v2825_v4, %v5543_v9  ;;  %v2858_v32 = vsel %vm880_vm4, %v2826_v18, %v5544_v11 }
 0x213   : > { %v5559_v37 = vunpack.i.h.bf16 %v5557_v5  ;;  %v5558_v6 = vunpack.i.l.bf16 %v5557_v5  ;;  %v5552_v7 = vpop.permute.xlu0 %5551  ;;  %v8548_v53 = vpop.f32.mrb[4].mxu0  ;;  %v2889_v42 = vsel %vm913_vm5, %v2857_v44, %v10013_v21  ;;  %v2890_v39 = vsel %vm913_vm5, %v2858_v32, %v10014_v59 }
 0x214   : > { %v5553_v30 = vunpack.i.l.bf16 %v5552_v7  ;;  %v8554_v8 = vpop.f32.mrb[5].mxu0  ;;  %4490 = vmatmul.mubr.f32.gmra.mrb[46].mxu0 %v2244_v33  ;;  %4551 = vmatprep.mubr.f32.mxu1 %v2889_v42  ;;  %v10016_v33 = vld [vmem:[#allocation124_spill] sm:$0xff]  ;;  %v5554_v44 = vunpack.i.h.bf16 %v5552_v7 }
 0x215   : > { %4492 = vmatprep.mubr.f32.mxu0 %v2245_v3  ;;  %4552 = vmatmul.mubr.f32.gmra.mrb[34].mxu1 %v2890_v39  ;;  %v2859_v60 = vsel %vm880_vm4, %v2827_v47, %v5558_v6 }
 0x216   : > { %v5567_v20 = vpop.permute.xlu1 %5566  ;;  %v2891_v22 = vsel %vm913_vm5, %v2859_v60, %v10015_v31  ;;  %v2828_v40 = vsel %vm847_vm3, %v5553_v30, %v5549_v57 }
 0x217   : > { %v5562_v41 = vpop.permute.xlu0 %5561  ;;  %v8561_v11 = vpop.f32.mrb[6].mxu0  ;;  %4554 = vmatprep.mubr.f32.mxu1 %v2891_v22  ;;  %v2860_v9 = vsel %vm880_vm4, %v2828_v40, %v5559_v37  ;;  %v5568_v4 = vunpack.i.l.bf16 %v5567_v20  ;;  %v5569_v18 = vunpack.i.h.bf16 %v5567_v20 }
 0x218   : > { %v8564_v24 = vpop.f32.mrb[7].mxu0  ;;  %v2892_v10 = vsel %vm913_vm5, %v2860_v9, %v10016_v33  ;;  %v5564_v46 = vunpack.i.h.bf16 %v5562_v41  ;;  %v5563_v29 = vunpack.i.l.bf16 %v5562_v41  ;;  %v10017_v41 = vld [vmem:[#allocation120_spill] sm:$0xff]  ;;  %v10018_v33 = vld [vmem:[#allocation121_spill] sm:$0xff] }
 0x219   : > { %4555 = vmatmul.mubr.f32.gmra.mrb[36].mxu1 %v2892_v10 }
 0x21a   : > { %v5577_v5 = vpop.permute.xlu1 %5576  ;;  %v2829_v37 = vsel %vm847_vm3, %v5554_v44, %v5563_v29  ;;  %v2830_v59 = vsel %vm847_vm3, %v5568_v4, %v5564_v46 }
 0x21b   : > { %v5578_v32 = vunpack.i.l.bf16 %v5577_v5  ;;  %v5572_v57 = vpop.permute.xlu0 %5571  ;;  %v8568_v47 = vpop.f32.mrb[8].mxu0  ;;  %v5579_v39 = vunpack.i.h.bf16 %v5577_v5 }
 0x21c   : > { %v5574_v6 = vunpack.i.h.bf16 %v5572_v57  ;;  %v5573_v21 = vunpack.i.l.bf16 %v5572_v57  ;;  %v8570_v42 = vpop.f32.mrb[9].mxu0 }
 0x21d   : > { %v2831_v7 = vsel %vm847_vm3, %v5569_v18, %v5578_v32  ;;  %v10020_v18 = vld [vmem:[#allocation127_spill] sm:$0xff] }
 0x21e   : > { %v5587_v30 = vpop.permute.xlu1 %5586  ;;  %v2861_v3 = vsel %vm880_vm4, %v2829_v37, %v5573_v21  ;;  %v2862_v60 = vsel %vm880_vm4, %v2830_v59, %v5574_v6  ;;  %v10023_v59 = vld [vmem:[#allocation128_spill] sm:$0xff] }
 0x21f   : > { %v5589_v20 = vunpack.i.h.bf16 %v5587_v30  ;;  %v5588_v31 = vunpack.i.l.bf16 %v5587_v30  ;;  %v5582_v22 = vpop.permute.xlu0 %5581  ;;  %v8577_v40 = vpop.f32.mrb[10].mxu0  ;;  %v2893_v9 = vsel %vm913_vm5, %v2861_v3, %v10017_v41  ;;  %v2894_v10 = vsel %vm913_vm5, %v2862_v60, %v10018_v33 }
 0x220   : > { %v5583_v4 = vunpack.i.l.bf16 %v5582_v22  ;;  %v8583_v46 = vpop.f32.mrb[11].mxu0  ;;  %4557 = vmatprep.mubr.f32.mxu1 %v2893_v9  ;;  %v5584_v9 = vunpack.i.h.bf16 %v5582_v22 }
 0x221   : > { %10019 = vst [vmem:[#allocation31_spill] sm:$0xff] %v8583_v46  ;;  %4558 = vmatmul.mubr.f32.gmra.mrb[38].mxu1 %v2894_v10  ;;  %v2863_v29 = vsel %vm880_vm4, %v2831_v7, %v5588_v31  ;;  %v10036_v46 = vld [vmem:[#allocation130_spill] sm:$0xff] }
 0x222   : > { %v5597_v5 = vpop.permute.xlu1 %5596  ;;  %v2895_v44 = vsel %vm913_vm5, %v2863_v29, %v10020_v18  ;;  %v2832_v32 = vsel %vm847_vm3, %v5583_v4, %v5579_v39 }
 0x223   : > { %v5592_v57 = vpop.permute.xlu0 %5591  ;;  %v8589_v6 = vpop.f32.mrb[12].mxu0  ;;  %4560 = vmatprep.mubr.f32.mxu1 %v2895_v44  ;;  %v2864_v21 = vsel %vm880_vm4, %v2832_v32, %v5589_v20  ;;  %v5598_v3 = vunpack.i.l.bf16 %v5597_v5  ;;  %v5599_v31 = vunpack.i.h.bf16 %v5597_v5 }
 0x224   : > { %10021 = vst [vmem:[#allocation25_spill] sm:$0xff] %v8589_v6  ;;  %v8592_v37 = vpop.f32.mrb[13].mxu0  ;;  %v2896_v30 = vsel %vm913_vm5, %v2864_v21, %v10023_v59  ;;  %v5594_v60 = vunpack.i.h.bf16 %v5592_v57  ;;  %v5593_v7 = vunpack.i.l.bf16 %v5592_v57  ;;  %v10028_v6 = vld [vmem:[#allocation126_spill] sm:$0xff] }
 0x225   : > { %10022 = vst [vmem:[#allocation28_spill] sm:$0xff] %v8592_v37  ;;  %4561 = vmatmul.mubr.f32.gmra.mrb[40].mxu1 %v2896_v30 }
 0x226   : > { %v5607_v41 = vpop.permute.xlu1 %5606  ;;  %v2833_v20 = vsel %vm847_vm3, %v5584_v9, %v5593_v7  ;;  %v2834_v44 = vsel %vm847_vm3, %v5598_v3, %v5594_v60 }
 0x227   : > { %v5608_v33 = vunpack.i.l.bf16 %v5607_v41  ;;  %v5602_v39 = vpop.permute.xlu0 %5601  ;;  %v8596_v10 = vpop.f32.mrb[14].mxu0  ;;  %v5609_v32 = vunpack.i.h.bf16 %v5607_v41 }
 0x228   : > { %10024 = vst [vmem:[#allocation22_spill] sm:$0xff] %v8596_v10  ;;  %v5604_v4 = vunpack.i.h.bf16 %v5602_v39  ;;  %v5603_v29 = vunpack.i.l.bf16 %v5602_v39  ;;  %v8598_v18 = vpop.f32.mrb[15].mxu0  ;;  %v10027_v39 = vld [vmem:[#allocation125_spill] sm:$0xff] }
 0x229   : > { %10025 = vst [vmem:[#allocation36_spill] sm:$0xff] %v8598_v18  ;;  %v2835_v22 = vsel %vm847_vm3, %v5599_v31, %v5608_v33  ;;  %v10030_v31 = vld [vmem:[#allocation132_spill] sm:$0xff] }
 0x22a   : > { %v5617_v21 = vpop.permute.xlu1 %5616  ;;  %v2865_v57 = vsel %vm880_vm4, %v2833_v20, %v5603_v29  ;;  %v2866_v5 = vsel %vm880_vm4, %v2834_v44, %v5604_v4 }
 0x22b   : > { %v5619_v59 = vunpack.i.h.bf16 %v5617_v21  ;;  %v5618_v30 = vunpack.i.l.bf16 %v5617_v21  ;;  %v5612_v37 = vpop.permute.xlu0 %5611  ;;  %v8605_v10 = vpop.f32.mrb[16].mxu0  ;;  %v2897_v18 = vsel %vm913_vm5, %v2865_v57, %v10027_v39  ;;  %v2898_v7 = vsel %vm913_vm5, %v2866_v5, %v10028_v6  ;;  %v10033_v21 = vld [vmem:[#allocation133_spill] sm:$0xff] }
 0x22c   : > { %10026 = vst [vmem:[#allocation39_spill] sm:$0xff] %v8605_v10  ;;  %v5613_v3 = vunpack.i.l.bf16 %v5612_v37  ;;  %v8611_v60 = vpop.f32.mrb[17].mxu0  ;;  %4563 = vmatprep.mubr.f32.mxu1 %v2897_v18  ;;  %v5434_v57 = vunpack.i.h.bf16 %v8357_v12  ;;  %v5438_v12 = vunpack.i.l.bf16 %v8355_v25 }
 0x22d   : > { %10029 = vst [vmem:[#allocation42_spill] sm:$0xff] %v8611_v60  ;;  %4564 = vmatmul.mubr.f32.gmra.mrb[42].mxu1 %v2898_v7  ;;  %v2867_v41 = vsel %vm880_vm4, %v2835_v22, %v5618_v30 }
 0x22e   : > { %v5627_v9 = vpop.permute.xlu1 %5626  ;;  %v2899_v33 = vsel %vm913_vm5, %v2867_v41, %v10030_v31  ;;  %v2836_v4 = vsel %vm847_vm3, %v5613_v3, %v5609_v32  ;;  %v5354_v32 = vunpack.i.h.bf16 %v8243_v15  ;;  %v5614_v3 = vunpack.i.h.bf16 %v5612_v37 }
 0x22f   : > { %v5622_v29 = vpop.permute.xlu0 %5621  ;;  %v8617_v20 = vpop.f32.mrb[18].mxu0  ;;  %4566 = vmatprep.mubr.f32.mxu1 %v2899_v33  ;;  %v2868_v44 = vsel %vm880_vm4, %v2836_v4, %v5619_v59  ;;  %v5628_v5 = vunpack.i.l.bf16 %v5627_v9  ;;  %v5629_v39 = vunpack.i.h.bf16 %v5627_v9  ;;  %v5358_v59 = vunpack.i.l.bf16 %v8236_v45 }
 0x230   : > { %10031 = vst [vmem:[#allocation43_spill] sm:$0xff] %v8617_v20  ;;  %v8620_v6 = vpop.f32.mrb[19].mxu0  ;;  %v2900_v18 = vsel %vm913_vm5, %v2868_v44, %v10033_v21  ;;  %v5624_v22 = vunpack.i.h.bf16 %v5622_v29  ;;  %v5623_v30 = vunpack.i.l.bf16 %v5622_v29  ;;  %v2182_v21 = vsel %vm847_vm3, %v5354_v32, %v5434_v57  ;;  %v10038_v32 = vld [vmem:[#allocation95_spill] sm:$0xff] }
 0x231   : > { %10032 = vst [vmem:[#allocation48_spill] sm:$0xff] %v8620_v6  ;;  %4567 = vmatmul.mubr.f32.gmra.mrb[44].mxu1 %v2900_v18 }
 0x232   : > { %v5637_v7 = vpop.permute.xlu1 %5636  ;;  %v2837_v29 = vsel %vm847_vm3, %v5614_v3, %v5623_v30  ;;  %v2838_v9 = vsel %vm847_vm3, %v5628_v5, %v5624_v22  ;;  %v10037_v3 = vld [vmem:[#allocation131_spill] sm:$0xff] }
 0x233   : > { %v5638_v41 = vunpack.i.l.bf16 %v5637_v7  ;;  %v5632_v31 = vpop.permute.xlu0 %5631  ;;  %v8626_v33 = vpop.f32.mrb[20].mxu0  ;;  %v5639_v15 = vunpack.i.h.bf16 %v5637_v7 }
 0x234   : > { %10034 = vst [vmem:[#allocation49_spill] sm:$0xff] %v8626_v33  ;;  %v5634_v4 = vunpack.i.h.bf16 %v5632_v31  ;;  %v5633_v6 = vunpack.i.l.bf16 %v5632_v31  ;;  %v8629_v44 = vpop.f32.mrb[21].mxu0 }
 0x235   : > { %10035 = vst [vmem:[#allocation55_spill] sm:$0xff] %v8629_v44  ;;  %v2839_v20 = vsel %vm847_vm3, %v5629_v39, %v5638_v41  ;;  %v5439_v39 = vunpack.i.h.bf16 %v8355_v25  ;;  %v2214_v41 = vsel %vm880_vm4, %v2182_v21, %v10038_v32 }
 0x236   : > { %v5647_v37 = vpop.permute.xlu1 %5646  ;;  %v2869_v18 = vsel %vm880_vm4, %v2837_v29, %v5633_v6  ;;  %v2870_v33 = vsel %vm880_vm4, %v2838_v9, %v5634_v4  ;;  %v5359_v6 = vunpack.i.h.bf16 %v8236_v45  ;;  %v10039_v9 = vld [vmem:[#allocation138_spill] sm:$0xff] }
 0x237   : > { %v5649_v60 = vunpack.i.h.bf16 %v5647_v37  ;;  %v5648_v31 = vunpack.i.l.bf16 %v5647_v37  ;;  %v5642_v10 = vpop.permute.xlu0 %5641  ;;  %v8638_v44 = vpop.f32.mrb[22].mxu0  ;;  %v2901_v30 = vsel %vm913_vm5, %v2869_v18, %v10036_v46  ;;  %v2902_v5 = vsel %vm913_vm5, %v2870_v33, %v10037_v3 }
 0x238   : > { %v5644_v57 = vunpack.i.h.bf16 %v5642_v10  ;;  %v5643_v22 = vunpack.i.l.bf16 %v5642_v10  ;;  %v8644_v7 = vpop.f32.mrb[23].mxu0  ;;  %4569 = vmatprep.mubr.f32.mxu1 %v2901_v30  ;;  %v2183_v37 = vsel %vm847_vm3, %v5358_v59, %v5438_v12  ;;  %v5443_v59 = vunpack.i.l.bf16 %v8366_v51 }
 0x239   : > { %4570 = vmatmul.mubr.f32.gmra.mrb[46].mxu1 %v2902_v5  ;;  %v2871_v4 = vsel %vm880_vm4, %v2839_v20, %v5648_v31  ;;  %v10040_v5 = vld [vmem:[#allocation92_spill] sm:$0xff] }
 0x23a   : > { %v5657_v29 = vpop.permute.xlu1 %5656  ;;  %v2246_v46 = vsel %vm913_vm5, %v2214_v41, %v5644_v57  ;;  %v2903_v33 = vsel %vm913_vm5, %v2871_v4, %v10039_v9  ;;  %v2840_v10 = vsel %vm847_vm3, %v5643_v22, %v5639_v15  ;;  %v2215_v15 = vsel %vm880_vm4, %v2183_v37, %v10040_v5 }
 0x23b   : > { %v5652_v18 = vpop.permute.xlu0 %5651  ;;  %v8656_v45 = vpop.f32.mrb[24].mxu0  ;;  %4493 = vmatmul.mubr.f32.gmra.mrb[48].mxu0 %v2246_v46  ;;  %4572 = vmatprep.mubr.f32.mxu1 %v2903_v33  ;;  %v2872_v25 = vsel %vm880_vm4, %v2840_v10, %v5649_v60  ;;  %v5658_v21 = vunpack.i.l.bf16 %v5657_v29  ;;  %v5659_v12 = vunpack.i.h.bf16 %v5657_v29  ;;  %v2184_v60 = vsel %vm847_vm3, %v5359_v6, %v5439_v39 }
 0x23c   : > { %v5654_v30 = vunpack.i.h.bf16 %v5652_v18  ;;  %v5653_v20 = vunpack.i.l.bf16 %v5652_v18  ;;  %v8659_v31 = vpop.f32.mrb[25].mxu0  ;;  %v2904_v3 = vsel %vm913_vm5, %v2872_v25, %v9958_v2  ;;  %v5363_v2 = vunpack.i.l.bf16 %v8267_v26  ;;  %v10041_v18 = vld [vmem:[#allocation93_spill] sm:$0xff] }
 0x23d   : > { %4573 = vmatmul.mubr.f32.gmra.mrb[48].mxu1 %v2904_v3  ;;  %v5444_v29 = vunpack.i.h.bf16 %v8366_v51  ;;  %v2216_v25 = vsel %vm880_vm4, %v2184_v60, %v10041_v18 }
 0x23e   : > { %v5667_v57 = vpop.permute.xlu1 %5666  ;;  %v2247_v22 = vsel %vm913_vm5, %v2215_v15, %v5654_v30  ;;  %v2841_v37 = vsel %vm847_vm3, %v5653_v20, %v5658_v21  ;;  %v2185_v15 = vsel %vm847_vm3, %v5363_v2, %v5443_v59  ;;  %v10042_v59 = vld [vmem:[#allocation100_spill] sm:$0xff]  ;;  %v5448_v2 = vunpack.i.l.bf16 %v8364_v0 }
 0x23f   : > { %v5669_v32 = vunpack.i.h.bf16 %v5667_v57  ;;  %v5668_v41 = vunpack.i.l.bf16 %v5667_v57  ;;  %v5662_v4 = vpop.permute.xlu0 %5661  ;;  %v8668_v46 = vpop.f32.mrb[26].mxu0  ;;  %4495 = vmatprep.mubr.f32.mxu0 %v2247_v22  ;;  %v5364_v57 = vunpack.i.h.bf16 %v8267_v26  ;;  %v2217_v26 = vsel %vm880_vm4, %v2185_v15, %v10042_v59 }
 0x240   : > { %v5664_v9 = vunpack.i.h.bf16 %v5662_v4  ;;  %v5663_v33 = vunpack.i.l.bf16 %v5662_v4  ;;  %v8671_v10 = vpop.f32.mrb[27].mxu0 }
 0x241   : > { %v2873_v6 = vsel %vm880_vm4, %v2841_v37, %v5668_v41  ;;  %v2186_v37 = vsel %vm847_vm3, %v5364_v57, %v5444_v29 }
 0x242   : > { %v5677_v39 = vpop.permute.xlu1 %5676  ;;  %v2248_v30 = vsel %vm913_vm5, %v2216_v25, %v5664_v9  ;;  %v2905_v3 = vsel %vm913_vm5, %v2873_v6, %v9962_v23  ;;  %v2842_v5 = vsel %vm847_vm3, %v5663_v33, %v5659_v12  ;;  %v5368_v12 = vunpack.i.l.bf16 %v8262_v48 }
 0x243   : > { %v5672_v21 = vpop.permute.xlu0 %5671  ;;  %v8684_v20 = vpop.f32.mrb[28].mxu0  ;;  %4496 = vmatmul.mubr.f32.gmra.mrb[50].mxu0 %v2248_v30  ;;  %4575 = vmatprep.mubr.f32.mxu1 %v2905_v3  ;;  %v2874_v51 = vsel %vm880_vm4, %v2842_v5, %v5669_v32  ;;  %v5678_v22 = vunpack.i.l.bf16 %v5677_v39  ;;  %v5679_v9 = vunpack.i.h.bf16 %v5677_v39  ;;  %v5449_v39 = vunpack.i.h.bf16 %v8364_v0 }
 0x244   : > { %v5674_v60 = vunpack.i.h.bf16 %v5672_v21  ;;  %v5673_v41 = vunpack.i.l.bf16 %v5672_v21  ;;  %v8687_v4 = vpop.f32.mrb[29].mxu0  ;;  %v2906_v23 = vsel %vm913_vm5, %v2874_v51, %v9965_v63  ;;  %v5369_v21 = vunpack.i.h.bf16 %v8262_v48  ;;  %v10043_v51 = vld [vmem:[#allocation101_spill] sm:$0xff] }
 0x245   : > { %4576 = vmatmul.mubr.f32.gmra.mrb[50].mxu1 %v2906_v23 }
 0x246   : > { %v5687_v33 = vpop.permute.xlu1 %5686  ;;  %v2249_v32 = vsel %vm913_vm5, %v2217_v26, %v5674_v60  ;;  %v2843_v15 = vsel %vm847_vm3, %v5673_v41, %v5678_v22  ;;  %v2218_v60 = vsel %vm880_vm4, %v2186_v37, %v10043_v51  ;;  %v5373_v51 = vunpack.i.l.bf16 %v8289_v55 }
 0x247   : > { %v5689_v18 = vunpack.i.h.bf16 %v5687_v33  ;;  %v5688_v25 = vunpack.i.l.bf16 %v5687_v33  ;;  %v5682_v6 = vpop.permute.xlu0 %5681  ;;  %v8697_v30 = vpop.f32.mrb[30].mxu0  ;;  %4498 = vmatprep.mubr.f32.mxu0 %v2249_v32  ;;  %v2187_v33 = vsel %vm847_vm3, %v5368_v12, %v5448_v2  ;;  %v2188_v2 = vsel %vm847_vm3, %v5369_v21, %v5449_v39 }
 0x248   : > { %v5684_v63 = vunpack.i.h.bf16 %v5682_v6  ;;  %v5683_v3 = vunpack.i.l.bf16 %v5682_v6  ;;  %v8699_v5 = vpop.f32.mrb[31].mxu0 }
 0x249   : > { %v2875_v29 = vsel %vm880_vm4, %v2843_v15, %v5688_v25  ;;  %v10044_v25 = vld [vmem:[#allocation98_spill] sm:$0xff] }
 0x24a   : > { %v5697_v57 = vpop.permute.xlu1 %5696  ;;  %v2250_v23 = vsel %vm913_vm5, %v2218_v60, %v5684_v63  ;;  %v2907_v59 = vsel %vm913_vm5, %v2875_v29, %v9969_v54  ;;  %v2844_v26 = vsel %vm847_vm3, %v5683_v3, %v5679_v9  ;;  %v2219_v6 = vsel %vm880_vm4, %v2187_v33, %v10044_v25 }
 0x24b   : > { %v5692_v22 = vpop.permute.xlu0 %5691  ;;  %4499 = vmatmul.mubr.f32.gmra.mrb[52].mxu0 %v2250_v23  ;;  %4578 = vmatprep.mubr.f32.mxu1 %v2907_v59  ;;  %v2876_v48 = vsel %vm880_vm4, %v2844_v26, %v5689_v18  ;;  %v5698_v0 = vunpack.i.l.bf16 %v5697_v57  ;;  %v5453_v54 = vunpack.i.l.bf16 %v8375_v34  ;;  %v5699_v9 = vunpack.i.h.bf16 %v5697_v57  ;;  %v10045_v59 = vld [vmem:[#allocation99_spill] sm:$0xff] }
 0x24c   : > { %v5694_v41 = vunpack.i.h.bf16 %v5692_v22  ;;  %v5693_v32 = vunpack.i.l.bf16 %v5692_v22  ;;  %v2908_v37 = vsel %vm913_vm5, %v2876_v48, %v9972_v62  ;;  %v5454_v23 = vunpack.i.h.bf16 %v8375_v34 }
 0x24d   : > { %4579 = vmatmul.mubr.f32.gmra.mrb[52].mxu1 %v2908_v37  ;;  %v2220_v57 = vsel %vm880_vm4, %v2188_v2, %v10045_v59  ;;  %v2189_v48 = vsel %vm847_vm3, %v5373_v51, %v5453_v54  ;;  %v5458_v54 = vunpack.i.l.bf16 %v8373_v27  ;;  %v5459_v59 = vunpack.i.h.bf16 %v8373_v27 }
 0x24e   : > { %v5707_v63 = vpop.permute.xlu1 %5706  ;;  %v2251_v12 = vsel %vm913_vm5, %v2219_v6, %v5694_v41  ;;  %v2845_v29 = vsel %vm847_vm3, %v5693_v32, %v5698_v0  ;;  %v5374_v41 = vunpack.i.h.bf16 %v8289_v55 }
 0x24f   : > { %v5709_v3 = vunpack.i.h.bf16 %v5707_v63  ;;  %v5708_v18 = vunpack.i.l.bf16 %v5707_v63  ;;  %v5702_v15 = vpop.permute.xlu0 %5701  ;;  %4501 = vmatprep.mubr.f32.mxu0 %v2251_v12  ;;  %v5378_v63 = vunpack.i.l.bf16 %v8282_v16 }
 0x250   : > { %v5704_v60 = vunpack.i.h.bf16 %v5702_v15  ;;  %v5703_v62 = vunpack.i.l.bf16 %v5702_v15 }
 0x251   : > { %v2877_v26 = vsel %vm880_vm4, %v2845_v29, %v5708_v18  ;;  %v5379_v29 = vunpack.i.h.bf16 %v8282_v16 }
 0x252   : > { %v5717_v33 = vpop.permute.xlu1 %5716  ;;  %v2252_v21 = vsel %vm913_vm5, %v2220_v57, %v5704_v60  ;;  %v2909_v39 = vsel %vm913_vm5, %v2877_v26, %v9974_v38  ;;  %v2846_v22 = vsel %vm847_vm3, %v5703_v62, %v5699_v9  ;;  %v10046_v38 = vld [vmem:[#allocation106_spill] sm:$0xff]  ;;  %v10047_v57 = vld [vmem:[#allocation107_spill] sm:$0xff] }
 0x253   : > { %v5712_v0 = vpop.permute.xlu0 %5711  ;;  %4502 = vmatmul.mubr.f32.gmra.mrb[54].mxu0 %v2252_v21  ;;  %4581 = vmatprep.mubr.f32.mxu1 %v2909_v39  ;;  %v2878_v34 = vsel %vm880_vm4, %v2846_v22, %v5709_v3  ;;  %v5718_v32 = vunpack.i.l.bf16 %v5717_v33  ;;  %v2221_v9 = vsel %vm880_vm4, %v2189_v48, %v10046_v38  ;;  %v5719_v55 = vunpack.i.h.bf16 %v5717_v33 }
 0x254   : > { %v5714_v37 = vunpack.i.h.bf16 %v5712_v0  ;;  %v5713_v25 = vunpack.i.l.bf16 %v5712_v0  ;;  %v2910_v6 = vsel %vm913_vm5, %v2878_v34, %v9976_v17  ;;  %v2190_v3 = vsel %vm847_vm3, %v5374_v41, %v5454_v23 }
 0x255   : > { %4582 = vmatmul.mubr.f32.gmra.mrb[54].mxu1 %v2910_v6  ;;  %v2222_v26 = vsel %vm880_vm4, %v2190_v3, %v10047_v57  ;;  %v2191_v48 = vsel %vm847_vm3, %v5378_v63, %v5458_v54 }
 0x256   : > { %v5727_v12 = vpop.permute.xlu1 %5726  ;;  %v2253_v2 = vsel %vm913_vm5, %v2221_v9, %v5714_v37  ;;  %v2847_v62 = vsel %vm847_vm3, %v5713_v25, %v5718_v32  ;;  %v10048_v37 = vld [vmem:[#allocation103_spill] sm:$0xff]  ;;  %v2192_v9 = vsel %vm847_vm3, %v5379_v29, %v5459_v59 }
 0x257   : > { %v5729_v18 = vunpack.i.h.bf16 %v5727_v12  ;;  %v5728_v15 = vunpack.i.l.bf16 %v5727_v12  ;;  %v5722_v51 = vpop.permute.xlu0 %5721  ;;  %4504 = vmatprep.mubr.f32.mxu0 %v2253_v2  ;;  %v2223_v25 = vsel %vm880_vm4, %v2191_v48, %v10048_v37  ;;  %v5383_v2 = vunpack.i.l.bf16 %v8310_v19 }
 0x258   : > { %v5724_v60 = vunpack.i.h.bf16 %v5722_v51  ;;  %v5723_v17 = vunpack.i.l.bf16 %v5722_v51  ;;  %v10049_v51 = vld [vmem:[#allocation104_spill] sm:$0xff] }
 0x259   : > { %v2879_v33 = vsel %vm880_vm4, %v2847_v62, %v5728_v15  ;;  %v5464_v15 = vunpack.i.h.bf16 %v8386_v58 }
 0x25a   : > { %v5737_v21 = vpop.permute.xlu1 %5736  ;;  %v2254_v23 = vsel %vm913_vm5, %v2222_v26, %v5724_v60  ;;  %v2911_v39 = vsel %vm913_vm5, %v2879_v33, %v9978_v52  ;;  %v2848_v22 = vsel %vm847_vm3, %v5723_v17, %v5719_v55  ;;  %v5463_v52 = vunpack.i.l.bf16 %v8386_v58 }
 0x25b   : > { %v5732_v41 = vpop.permute.xlu0 %5731  ;;  %4505 = vmatmul.mubr.f32.gmra.mrb[56].mxu0 %v2254_v23  ;;  %4584 = vmatprep.mubr.f32.mxu1 %v2911_v39  ;;  %v2880_v16 = vsel %vm880_vm4, %v2848_v22, %v5729_v18  ;;  %v5738_v27 = vunpack.i.l.bf16 %v5737_v21  ;;  %v5739_v6 = vunpack.i.h.bf16 %v5737_v21  ;;  %v2224_v60 = vsel %vm880_vm4, %v2192_v9, %v10049_v51 }
 0x25c   : > { %v5734_v0 = vunpack.i.h.bf16 %v5732_v41  ;;  %v5733_v34 = vunpack.i.l.bf16 %v5732_v41  ;;  %v2912_v32 = vsel %vm913_vm5, %v2880_v16, %v9980_v49  ;;  %v2193_v26 = vsel %vm847_vm3, %v5383_v2, %v5463_v52 }
 0x25d   : > { %4585 = vmatmul.mubr.f32.gmra.mrb[56].mxu1 %v2912_v32  ;;  %v5384_v33 = vunpack.i.h.bf16 %v8310_v19  ;;  %v5388_v41 = vunpack.i.l.bf16 %v8306_v56  ;;  %v5469_v9 = vunpack.i.h.bf16 %v8384_v43 }
 0x25e   : > { %v5747_v38 = vpop.permute.xlu1 %5746  ;;  %v2255_v63 = vsel %vm913_vm5, %v2223_v25, %v5734_v0  ;;  %v2849_v18 = vsel %vm847_vm3, %v5733_v34, %v5738_v27  ;;  %v5468_v27 = vunpack.i.l.bf16 %v8384_v43 }
 0x25f   : > { %v5749_v54 = vunpack.i.h.bf16 %v5747_v38  ;;  %v5748_v55 = vunpack.i.l.bf16 %v5747_v38  ;;  %v5742_v12 = vpop.permute.xlu0 %5741  ;;  %4507 = vmatprep.mubr.f32.mxu0 %v2255_v63  ;;  %v2194_v32 = vsel %vm847_vm3, %v5384_v33, %v5464_v15  ;;  %v5389_v63 = vunpack.i.h.bf16 %v8306_v56 }
 0x260   : > { %v5744_v3 = vunpack.i.h.bf16 %v5742_v12  ;;  %v5743_v49 = vunpack.i.l.bf16 %v5742_v12  ;;  %v2195_v15 = vsel %vm847_vm3, %v5388_v41, %v5468_v27 }
 0x261   : > { %v2881_v17 = vsel %vm880_vm4, %v2849_v18, %v5748_v55 }
 0x262   : > { %v5757_v62 = vpop.permute.xlu1 %5756  ;;  %v2256_v29 = vsel %vm913_vm5, %v2224_v60, %v5744_v3  ;;  %v2913_v59 = vsel %vm913_vm5, %v2881_v17, %v9982_v50  ;;  %v2850_v57 = vsel %vm847_vm3, %v5743_v49, %v5739_v6  ;;  %v10050_v50 = vld [vmem:[#allocation112_spill] sm:$0xff] }
 0x263   : > { %v5752_v21 = vpop.permute.xlu0 %5751  ;;  %4508 = vmatmul.mubr.f32.gmra.mrb[58].mxu0 %v2256_v29  ;;  %4587 = vmatprep.mubr.f32.mxu1 %v2913_v59  ;;  %v2882_v58 = vsel %vm880_vm4, %v2850_v57, %v5749_v54  ;;  %v5758_v23 = vunpack.i.l.bf16 %v5757_v62  ;;  %v2225_v16 = vsel %vm880_vm4, %v2193_v26, %v10050_v50  ;;  %v5759_v19 = vunpack.i.h.bf16 %v5757_v62  ;;  %v10051_v54 = vld [vmem:[#allocation113_spill] sm:$0xff] }
 0x264   : > { %v5754_v39 = vunpack.i.h.bf16 %v5752_v21  ;;  %v5753_v22 = vunpack.i.l.bf16 %v5752_v21  ;;  %v2914_v48 = vsel %vm913_vm5, %v2882_v58, %v9984_v61  ;;  %v2226_v55 = vsel %vm880_vm4, %v2194_v32, %v10051_v54  ;;  %v10052_v59 = vld [vmem:[#allocation153_spill] sm:$0xff] }
 0x265   : > { %4588 = vmatmul.mubr.f32.gmra.mrb[58].mxu1 %v2914_v48 }
 0x266   : > { %v5767_v0 = vpop.permute.xlu1 %5766  ;;  %v2257_v34 = vsel %vm913_vm5, %v2225_v16, %v5754_v39  ;;  %v2851_v38 = vsel %vm847_vm3, %v5753_v22, %v5758_v23  ;;  %v2196_v23 = vsel %vm847_vm3, %v5389_v63, %v5469_v9 }
 0x267   : > { %v5769_v37 = vunpack.i.h.bf16 %v5767_v0  ;;  %v5768_v25 = vunpack.i.l.bf16 %v5767_v0  ;;  %v5762_v52 = vpop.permute.xlu0 %5761  ;;  %4510 = vmatprep.mubr.f32.mxu0 %v2257_v34  ;;  %v10054_v0 = vld [vmem:[#allocation110_spill] sm:$0xff] }
 0x268   : > { %v5764_v6 = vunpack.i.h.bf16 %v5762_v52  ;;  %v5763_v61 = vunpack.i.l.bf16 %v5762_v52  ;;  %v2228_v34 = vsel %vm880_vm4, %v2196_v23, %v10054_v0 }
 0x269   : > { %v2883_v12 = vsel %vm880_vm4, %v2851_v38, %v5768_v25  ;;  %v10055_v25 = vld [vmem:[#allocation150_spill] sm:$0xff] }
 0x26a   : > { %v5777_v2 = vpop.permute.xlu1 %5776  ;;  %v2258_v3 = vsel %vm913_vm5, %v2226_v55, %v5764_v6  ;;  %v2915_v49 = vsel %vm913_vm5, %v2883_v12, %v9986_v36  ;;  %v2852_v18 = vsel %vm847_vm3, %v5763_v61, %v5759_v19  ;;  %v10053_v36 = vld [vmem:[#allocation109_spill] sm:$0xff] }
 0x26b   : > { %v5772_v51 = vpop.permute.xlu0 %5771  ;;  %v4390_v60 = vpop.f32.mrb[0].mxu1  ;;  %4511 = vmatmul.mubr.f32.gmra.mrb[60].mxu0 %v2258_v3  ;;  %4590 = vmatprep.mubr.f32.mxu1 %v2915_v49  ;;  %v2884_v56 = vsel %vm880_vm4, %v2852_v18, %v5769_v37  ;;  %v5778_v43 = vunpack.i.l.bf16 %v5777_v2  ;;  %v2227_v26 = vsel %vm880_vm4, %v2195_v15, %v10053_v36  ;;  %v5779_v33 = vunpack.i.h.bf16 %v5777_v2 }
 0x26c   : > { %v5774_v17 = vunpack.i.h.bf16 %v5772_v51  ;;  %v5773_v62 = vunpack.i.l.bf16 %v5772_v51  ;;  %3195 = vrot.lane.b32.xlu1 %v4390_v60, %s6093_s9  ;;  %v1686_v29 = vpop.f32.mrb[1].mxu1  ;;  %v2916_v57 = vsel %vm913_vm5, %v2884_v56, %v10052_v59 }
 0x26d   : > { %4591 = vmatmul.mubr.f32.gmra.mrb[60].mxu1 %v2916_v57  ;;  %3193 = vrot.lane.b32.xlu0 %v1686_v29, %s6093_s9 }
 0x26e   : > { %v5787_v21 = vpop.permute.xlu1 %5786  ;;  %v2259_v58 = vsel %vm913_vm5, %v2227_v26, %v5774_v17  ;;  %v2853_v19 = vsel %vm847_vm3, %v5773_v62, %v5778_v43 }
 0x26f   : > { %v5789_v39 = vunpack.i.h.bf16 %v5787_v21  ;;  %v5788_v22 = vunpack.i.l.bf16 %v5787_v21  ;;  %v5782_v48 = vpop.permute.xlu0 %5781  ;;  %v4393_v41 = vpop.f32.mrb[2].mxu1  ;;  %4513 = vmatprep.mubr.f32.mxu0 %v2259_v58 }
 0x270   : > { %v5784_v50 = vunpack.i.h.bf16 %v5782_v48  ;;  %v5783_v16 = vunpack.i.l.bf16 %v5782_v48  ;;  %3199 = vrot.lane.b32.xlu1 %v4393_v41, %s6093_s9  ;;  %v1696_v27 = vpop.f32.mrb[3].mxu1 }
 0x271   : > { %3197 = vrot.lane.b32.xlu0 %v1696_v27, %s6093_s9  ;;  %v2885_v32 = vsel %vm880_vm4, %v2853_v19, %v5788_v22 }
 0x272   : > { %v2260_v37 = vsel %vm913_vm5, %v2228_v34, %v5784_v50  ;;  %v2917_v52 = vsel %vm913_vm5, %v2885_v32, %v10055_v25  ;;  %v2854_v6 = vsel %vm847_vm3, %v5783_v16, %v5779_v33 }
 0x273   : > { %v4396_v61 = vpop.f32.mrb[4].mxu1  ;;  %4514 = vmatmul.mubr.f32.gmra.mrb[62].mxu0 %v2260_v37  ;;  %4593 = vmatprep.mubr.f32.mxu1 %v2917_v52  ;;  %v2886_v38 = vsel %vm880_vm4, %v2854_v6, %v5789_v39 }
 0x274   : > { %3203 = vrot.lane.b32.xlu1 %v4396_v61, %s6093_s9  ;;  %v1706_v63 = vpop.f32.mrb[5].mxu1  ;;  %v2918_v9 = vsel %vm913_vm5, %v2886_v38, %v9996_v13 }
 0x275   : > { %4594 = vmatmul.mubr.f32.gmra.mrb[62].mxu1 %v2918_v9  ;;  %3201 = vrot.lane.b32.xlu0 %v1706_v63, %s6093_s9 }
 0x277   : > { %v4399_v54 = vpop.f32.mrb[6].mxu1 }
 0x278   : > { %3207 = vrot.lane.b32.xlu1 %v4399_v54, %s6093_s9  ;;  %v1716_v55 = vpop.f32.mrb[7].mxu1 }
 0x279   : > { %3205 = vrot.lane.b32.xlu0 %v1716_v55, %s6093_s9 }
 0x27b   : > { %v4402_v12 = vpop.f32.mrb[8].mxu1 }
 0x27c   : > { %3211 = vrot.lane.b32.xlu1 %v4402_v12, %s6093_s9  ;;  %v1726_v2 = vpop.f32.mrb[9].mxu1 }
 0x27d   : > { %3209 = vrot.lane.b32.xlu0 %v1726_v2, %s6093_s9 }
 0x27f   : > { %v4405_v3 = vpop.f32.mrb[10].mxu1 }
 0x280   : > { %3215 = vrot.lane.b32.xlu1 %v4405_v3, %s6093_s9  ;;  %v1736_v49 = vpop.f32.mrb[11].mxu1 }
 0x281   : > { %3213 = vrot.lane.b32.xlu0 %v1736_v49, %s6093_s9 }
 0x283   : > { %v4408_v13 = vpop.f32.mrb[12].mxu1 }
 0x284   : > { %3219 = vrot.lane.b32.xlu1 %v4408_v13, %s6093_s9  ;;  %v1746_v18 = vpop.f32.mrb[13].mxu1 }
 0x285   : > { %3217 = vrot.lane.b32.xlu0 %v1746_v18, %s6093_s9 }
 0x287   : > { %v4411_v15 = vpop.f32.mrb[14].mxu1 }
 0x288   : > { %3223 = vrot.lane.b32.xlu1 %v4411_v15, %s6093_s9  ;;  %v1756_v51 = vpop.f32.mrb[15].mxu1 }
 0x289   : > { %3221 = vrot.lane.b32.xlu0 %v1756_v51, %s6093_s9 }
 0x28b   : > { %v4414_v60 = vpop.f32.mrb[16].mxu1 }
 0x28c   : > { %3227 = vrot.lane.b32.xlu1 %v4414_v60, %s6093_s9  ;;  %v1766_v56 = vpop.f32.mrb[17].mxu1 }
 0x28d   : > { %3225 = vrot.lane.b32.xlu0 %v1766_v56, %s6093_s9 }
 0x28f   : > { %v4417_v43 = vpop.f32.mrb[18].mxu1 }
 0x290   : > { %3231 = vrot.lane.b32.xlu1 %v4417_v43, %s6093_s9  ;;  %v1776_v17 = vpop.f32.mrb[19].mxu1 }
 0x291   : > { %3229 = vrot.lane.b32.xlu0 %v1776_v17, %s6093_s9 }
 0x293   : > { %v4420_v62 = vpop.f32.mrb[20].mxu1 }
 0x294   : > { %3235 = vrot.lane.b32.xlu1 %v4420_v62, %s6093_s9  ;;  %v1786_v29 = vpop.f32.mrb[21].mxu1 }
 0x295   : > { %3233 = vrot.lane.b32.xlu0 %v1786_v29, %s6093_s9 }
 0x297   : > { %v4423_v59 = vpop.f32.mrb[22].mxu1 }
 0x298   : > { %3239 = vrot.lane.b32.xlu1 %v4423_v59, %s6093_s9  ;;  %v1796_v57 = vpop.f32.mrb[23].mxu1 }
 0x299   : > { %3237 = vrot.lane.b32.xlu0 %v1796_v57, %s6093_s9 }
 0x29b   : > { %v4426_v36 = vpop.f32.mrb[24].mxu1 }
 0x29c   : > { %3243 = vrot.lane.b32.xlu1 %v4426_v36, %s6093_s9  ;;  %v1806_v26 = vpop.f32.mrb[25].mxu1 }
 0x29d   : > { %3241 = vrot.lane.b32.xlu0 %v1806_v26, %s6093_s9 }
 0x29f   : > { %v4429_v33 = vpop.f32.mrb[26].mxu1 }
 0x2a0   : > { %3247 = vrot.lane.b32.xlu1 %v4429_v33, %s6093_s9  ;;  %v1816_v21 = vpop.f32.mrb[27].mxu1  ;;  %v10056_v33 = vld [vmem:[#allocation31_spill] sm:$0xff] }
 0x2a1   : > { %3245 = vrot.lane.b32.xlu0 %v1816_v21, %s6093_s9 }
 0x2a3   : > { %v4432_v58 = vpop.f32.mrb[28].mxu1 }
 0x2a4   : > { %3251 = vrot.lane.b32.xlu1 %v4432_v58, %s6093_s9  ;;  %v1826_v23 = vpop.f32.mrb[29].mxu1 }
 0x2a5   : > { %3249 = vrot.lane.b32.xlu0 %v1826_v23, %s6093_s9 }
 0x2a7   : > { %v4435_v39 = vpop.f32.mrb[30].mxu1 }
 0x2a8   : > { %3255 = vrot.lane.b32.xlu1 %v4435_v39, %s6093_s9  ;;  %v1836_v22 = vpop.f32.mrb[31].mxu1  ;;  %v10057_v39 = vld [vmem:[#allocation25_spill] sm:$0xff] }
 0x2a9   : > { %3253 = vrot.lane.b32.xlu0 %v1836_v22, %s6093_s9 }
 0x2cb   : > { %v4470_v48 = vpop.f32.mrb[32].mxu0 }
 0x2cc   : > { %3323 = vrot.lane.b32.xlu1 %v4470_v48, %s6094_s5  ;;  %v2344_v41 = vpop.f32.mrb[33].mxu0  ;;  %v10058_v48 = vld [vmem:[#allocation28_spill] sm:$0xff] }
 0x2cd   : > { %3321 = vrot.lane.b32.xlu0 %v2344_v41, %s6094_s5 }
 0x2cf   : > { %v4473_v50 = vpop.f32.mrb[34].mxu0 }
 0x2d0   : > { %3327 = vrot.lane.b32.xlu1 %v4473_v50, %s6094_s5  ;;  %v2354_v16 = vpop.f32.mrb[35].mxu0 }
 0x2d1   : > { %3325 = vrot.lane.b32.xlu0 %v2354_v16, %s6094_s5 }
 0x2d3   : > { %v4476_v27 = vpop.f32.mrb[36].mxu0 }
 0x2d4   : > { %3331 = vrot.lane.b32.xlu1 %v4476_v27, %s6094_s5  ;;  %v2364_v19 = vpop.f32.mrb[37].mxu0  ;;  %v10059_v27 = vld [vmem:[#allocation22_spill] sm:$0xff] }
 0x2d5   : > { %3329 = vrot.lane.b32.xlu0 %v2364_v19, %s6094_s5 }
 0x2d7   : > { %v4479_v0 = vpop.f32.mrb[38].mxu0 }
 0x2d8   : > { %3335 = vrot.lane.b32.xlu1 %v4479_v0, %s6094_s5  ;;  %v2374_v34 = vpop.f32.mrb[39].mxu0 }
 0x2d9   : > { %3333 = vrot.lane.b32.xlu0 %v2374_v34, %s6094_s5  ;;  %v10060_v34 = vld [vmem:[#allocation36_spill] sm:$0xff] }
 0x2db   : > { %v4482_v32 = vpop.f32.mrb[40].mxu0 }
 0x2dc   : > { %3339 = vrot.lane.b32.xlu1 %v4482_v32, %s6094_s5  ;;  %v2384_v37 = vpop.f32.mrb[41].mxu0 }
 0x2dd   : > { %3337 = vrot.lane.b32.xlu0 %v2384_v37, %s6094_s5 }
 0x2de   : > { %v3196_v25 = vpop.permute.xlu1 %3195 }
 0x2df   : > { %v8854_v52 = vsel %vm847_vm3, %v8513_v14, %v3196_v25  ;;  %v3194_v6 = vpop.permute.xlu0 %3193  ;;  %v4485_v61 = vpop.f32.mrb[42].mxu0  ;;  %v10061_v25 = vld [vmem:[#allocation39_spill] sm:$0xff] }
 0x2e0   : > { %v8858_v38 = vsel %vm847_vm3, %v8520_v28, %v3194_v6  ;;  %v8860_v63 = vpop.f32.mrb[32].mxu1  ;;  %3343 = vrot.lane.b32.xlu1 %v4485_v61, %s6094_s5  ;;  %v2394_v9 = vpop.f32.mrb[43].mxu0 }
 0x2e1   : > { %v8863_v54 = vpop.f32.mrb[33].mxu1  ;;  %3341 = vrot.lane.b32.xlu0 %v2394_v9, %s6094_s5  ;;  %v10062_v9 = vld [vmem:[#allocation42_spill] sm:$0xff] }
 0x2e2   : > { %v3200_v55 = vpop.permute.xlu1 %3199 }
 0x2e3   : > { %v8868_v14 = vsel %vm847_vm3, %v8533_v35, %v3200_v55  ;;  %v3198_v12 = vpop.permute.xlu0 %3197  ;;  %v4488_v2 = vpop.f32.mrb[44].mxu0 }
 0x2e4   : > { %v8872_v28 = vsel %vm847_vm3, %v8537_v1, %v3198_v12  ;;  %3347 = vrot.lane.b32.xlu1 %v4488_v2, %s6094_s5  ;;  %v2404_v3 = vpop.f32.mrb[45].mxu0 }
 0x2e5   : > { %3345 = vrot.lane.b32.xlu0 %v2404_v3, %s6094_s5 }
 0x2e6   : > { %v3204_v49 = vpop.permute.xlu1 %3203 }
 0x2e7   : > { %v8878_v13 = vsel %vm847_vm3, %v8548_v53, %v3204_v49  ;;  %v3202_v18 = vpop.permute.xlu0 %3201  ;;  %v4491_v15 = vpop.f32.mrb[46].mxu0  ;;  %v10063_v49 = vld [vmem:[#allocation43_spill] sm:$0xff] }
 0x2e8   : > { %v8882_v35 = vsel %vm847_vm3, %v8554_v8, %v3202_v18  ;;  %v8884_v51 = vpop.f32.mrb[34].mxu1  ;;  %3351 = vrot.lane.b32.xlu1 %v4491_v15, %s6094_s5  ;;  %v2414_v1 = vpop.f32.mrb[47].mxu0 }
 0x2e9   : > { %v8887_v60 = vpop.f32.mrb[35].mxu1  ;;  %3349 = vrot.lane.b32.xlu0 %v2414_v1, %s6094_s5  ;;  %v10064_v1 = vld [vmem:[#allocation48_spill] sm:$0xff] }
 0x2ea   : > { %v3208_v56 = vpop.permute.xlu1 %3207 }
 0x2eb   : > { %v8892_v53 = vsel %vm847_vm3, %v8561_v11, %v3208_v56  ;;  %v3206_v43 = vpop.permute.xlu0 %3205 }
 0x2ec   : > { %v8896_v17 = vsel %vm847_vm3, %v8564_v24, %v3206_v43  ;;  %v8898_v8 = vpop.f32.mrb[36].mxu1 }
 0x2ed   : > { %v8900_v62 = vpop.f32.mrb[37].mxu1 }
 0x2ee   : > { %v3212_v29 = vpop.permute.xlu1 %3211 }
 0x2ef   : > { %v8904_v59 = vsel %vm847_vm3, %v8568_v47, %v3212_v29  ;;  %v3210_v57 = vpop.permute.xlu0 %3209 }
 0x2f0   : > { %v8908_v36 = vsel %vm847_vm3, %v8570_v42, %v3210_v57 }
 0x2f2   : > { %v3216_v11 = vpop.permute.xlu1 %3215 }
 0x2f3   : > { %v8912_v26 = vsel %vm847_vm3, %v8577_v40, %v3216_v11  ;;  %v3214_v24 = vpop.permute.xlu0 %3213  ;;  %v10065_v11 = vld [vmem:[#allocation49_spill] sm:$0xff] }
 0x2f4   : > { %v8916_v21 = vsel %vm847_vm3, %v10056_v33, %v3214_v24  ;;  %v8918_v58 = vpop.f32.mrb[38].mxu1 }
 0x2f5   : > { %v8920_v23 = vpop.f32.mrb[39].mxu1 }
 0x2f6   : > { %v3220_v47 = vpop.permute.xlu1 %3219 }
 0x2f7   : > { %v8924_v22 = vsel %vm847_vm3, %v10057_v39, %v3220_v47  ;;  %v3218_v42 = vpop.permute.xlu0 %3217  ;;  %v10066_v47 = vld [vmem:[#allocation55_spill] sm:$0xff] }
 0x2f8   : > { %v8928_v41 = vsel %vm847_vm3, %v10058_v48, %v3218_v42  ;;  %v8930_v40 = vpop.f32.mrb[40].mxu1 }
 0x2f9   : > { %v8932_v50 = vpop.f32.mrb[41].mxu1 }
 0x2fa   : > { %v3224_v16 = vpop.permute.xlu1 %3223 }
 0x2fb   : > { %v8936_v19 = vsel %vm847_vm3, %v10059_v27, %v3224_v16  ;;  %v3222_v0 = vpop.permute.xlu0 %3221 }
 0x2fc   : > { %v8940_v32 = vsel %vm847_vm3, %v10060_v34, %v3222_v0 }
 0x2fe   : > { %v3228_v37 = vpop.permute.xlu1 %3227 }
 0x2ff   : > { %v8944_v6 = vsel %vm847_vm3, %v10061_v25, %v3228_v37  ;;  %v3226_v61 = vpop.permute.xlu0 %3225 }
 0x300   : > { %v8948_v55 = vsel %vm847_vm3, %v10062_v9, %v3226_v61  ;;  %v8950_v12 = vpop.f32.mrb[42].mxu1 }
 0x301   : > { %v8952_v2 = vpop.f32.mrb[43].mxu1 }
 0x302   : > { %v3232_v3 = vpop.permute.xlu1 %3231 }
 0x303   : > { %v8956_v18 = vsel %vm847_vm3, %v10063_v49, %v3232_v3  ;;  %v3230_v15 = vpop.permute.xlu0 %3229 }
 0x304   : > { %v8960_v56 = vsel %vm847_vm3, %v10064_v1, %v3230_v15  ;;  %v8962_v43 = vpop.f32.mrb[44].mxu1 }
 0x305   : > { %v8964_v29 = vpop.f32.mrb[45].mxu1 }
 0x306   : > { %v3236_v57 = vpop.permute.xlu1 %3235 }
 0x307   : > { %v8968_v24 = vsel %vm847_vm3, %v10065_v11, %v3236_v57  ;;  %v3234_v33 = vpop.permute.xlu0 %3233 }
 0x308   : > { %v8972_v39 = vsel %vm847_vm3, %v10066_v47, %v3234_v33 }
 0x30a   : > { %v3240_v42 = vpop.permute.xlu1 %3239 }
 0x30b   : > { %v8976_v48 = vsel %vm847_vm3, %v8638_v44, %v3240_v42  ;;  %v3238_v16 = vpop.permute.xlu0 %3237 }
 0x30c   : > { %v8980_v27 = vsel %vm847_vm3, %v8644_v7, %v3238_v16  ;;  %v8982_v0 = vpop.f32.mrb[46].mxu1 }
 0x30d   : > { %v8984_v34 = vpop.f32.mrb[47].mxu1 }
 0x30e   : > { %v3244_v37 = vpop.permute.xlu1 %3243  ;;  %v4494_v25 = vpop.f32.mrb[48].mxu0 }
 0x30f   : > { %v8988_v61 = vsel %vm847_vm3, %v8656_v45, %v3244_v37  ;;  %v3242_v9 = vpop.permute.xlu0 %3241  ;;  %3355 = vrot.lane.b32.xlu1 %v4494_v25, %s6094_s5  ;;  %v2424_v44 = vpop.f32.mrb[49].mxu0 }
 0x310   : > { %v8993_v3 = vsel %vm847_vm3, %v8659_v31, %v3242_v9  ;;  %v8995_v7 = vpop.f32.mrb[48].mxu1  ;;  %3353 = vrot.lane.b32.xlu0 %v2424_v44, %s6094_s5 }
 0x311   : > { %v8998_v49 = vpop.f32.mrb[49].mxu1 }
 0x312   : > { %v3248_v15 = vpop.permute.xlu1 %3247 }
 0x313   : > { %v9002_v1 = vsel %vm847_vm3, %v8668_v46, %v3248_v15  ;;  %v3246_v45 = vpop.permute.xlu0 %3245 }
 0x314   : > { %10067 = vst [vmem:[#allocation135_spill] sm:$0xff] %v9002_v1  ;;  %v9006_v57 = vsel %vm847_vm3, %v8671_v10, %v3246_v45 }
 0x315   : > { %10068 = vst [vmem:[#allocation29_spill] sm:$0xff] %v9006_v57 }
 0x316   : > { %v3252_v11 = vpop.permute.xlu1 %3251  ;;  %v4497_v33 = vpop.f32.mrb[50].mxu0 }
 0x317   : > { %v9010_v31 = vsel %vm847_vm3, %v8684_v20, %v3252_v11  ;;  %v3250_v47 = vpop.permute.xlu0 %3249  ;;  %3359 = vrot.lane.b32.xlu1 %v4497_v33, %s6094_s5  ;;  %v2434_v42 = vpop.f32.mrb[51].mxu0 }
 0x318   : > { %10069 = vst [vmem:[#allocation23_spill] sm:$0xff] %v9010_v31  ;;  %v9015_v16 = vsel %vm847_vm3, %v8687_v4, %v3250_v47  ;;  %v4577_v46 = vpop.f32.mrb[50].mxu1  ;;  %3357 = vrot.lane.b32.xlu0 %v2434_v42, %s6094_s5 }
 0x319   : > { %10070 = vst [vmem:[#allocation24_spill] sm:$0xff] %v9015_v16  ;;  %v3092_v37 = vpop.f32.mrb[51].mxu1 }
 0x31a   : > { %v3256_v10 = vpop.permute.xlu1 %3255 }
 0x31b   : > { %v9020_v25 = vsel %vm847_vm3, %v8697_v30, %v3256_v10  ;;  %v3254_v9 = vpop.permute.xlu0 %3253 }
 0x31c   : > { %10071 = vst [vmem:[#allocation122_spill] sm:$0xff] %v9020_v25  ;;  %v9024_v20 = vsel %vm847_vm3, %v8699_v5, %v3254_v9 }
 0x31d   : > { %10072 = vst [vmem:[#allocation75_spill] sm:$0xff] %v9024_v20 }
 0x31e   : > { %v4500_v44 = vpop.f32.mrb[52].mxu0 }
 0x31f   : > { %3363 = vrot.lane.b32.xlu1 %v4500_v44, %s6094_s5  ;;  %v2444_v15 = vpop.f32.mrb[53].mxu0 }
 0x320   : > { %v4580_v4 = vpop.f32.mrb[52].mxu1  ;;  %3361 = vrot.lane.b32.xlu0 %v2444_v15, %s6094_s5 }
 0x321   : > { %v3102_v45 = vpop.f32.mrb[53].mxu1 }
 0x326   : > { %v4503_v11 = vpop.f32.mrb[54].mxu0 }
 0x327   : > { %3367 = vrot.lane.b32.xlu1 %v4503_v11, %s6094_s5  ;;  %v2454_v33 = vpop.f32.mrb[55].mxu0 }
 0x328   : > { %v4583_v47 = vpop.f32.mrb[54].mxu1  ;;  %3365 = vrot.lane.b32.xlu0 %v2454_v33, %s6094_s5 }
 0x329   : > { %v3112_v30 = vpop.f32.mrb[55].mxu1 }
 0x32e   : > { %v4506_v42 = vpop.f32.mrb[56].mxu0 }
 0x32f   : > { %3371 = vrot.lane.b32.xlu1 %v4506_v42, %s6094_s5  ;;  %v2464_v5 = vpop.f32.mrb[57].mxu0 }
 0x330   : > { %v4586_v10 = vpop.f32.mrb[56].mxu1  ;;  %3369 = vrot.lane.b32.xlu0 %v2464_v5, %s6094_s5 }
 0x331   : > { %v3122_v9 = vpop.f32.mrb[57].mxu1 }
 0x336   : > { %v4509_v44 = vpop.f32.mrb[58].mxu0 }
 0x337   : > { %3375 = vrot.lane.b32.xlu1 %v4509_v44, %s6094_s5  ;;  %v2474_v15 = vpop.f32.mrb[59].mxu0 }
 0x338   : > { %v4589_v20 = vpop.f32.mrb[58].mxu1  ;;  %3373 = vrot.lane.b32.xlu0 %v2474_v15, %s6094_s5 }
 0x339   : > { %v3132_v11 = vpop.f32.mrb[59].mxu1 }
 0x33e   : > { %v4512_v25 = vpop.f32.mrb[60].mxu0 }
 0x33f   : > { %3379 = vrot.lane.b32.xlu1 %v4512_v25, %s6094_s5  ;;  %v2484_v33 = vpop.f32.mrb[61].mxu0 }
 0x340   : > { %v4592_v16 = vpop.f32.mrb[60].mxu1  ;;  %3377 = vrot.lane.b32.xlu0 %v2484_v33, %s6094_s5 }
 0x341   : > { %v3142_v42 = vpop.f32.mrb[61].mxu1 }
 0x346   : > { %v4515_v31 = vpop.f32.mrb[62].mxu0 }
 0x347   : > { %3383 = vrot.lane.b32.xlu1 %v4515_v31, %s6094_s5  ;;  %v2494_v5 = vpop.f32.mrb[63].mxu0 }
 0x348   : > { %v4595_v57 = vpop.f32.mrb[62].mxu1  ;;  %3381 = vrot.lane.b32.xlu0 %v2494_v5, %s6094_s5  ;;  %s9211_s5 = scalar_lea.vmem [#allocation7], %s4022_s26  ;;  %s10091_s26 = sld [smem:[#allocation13_spill]] }
 0x349   : > { %v3152_v44 = vpop.f32.mrb[63].mxu1  ;;  %s3888_s20 = sshll.u32 %s9211_s5, 4  ;;  %s9433_s20 = int_to_ptr.vmem [resolvable:$true] %s3888_s20 }
 0x34a   : > { %s5959_s7 = scalar_lea.vmem %s9433_s20, 4096  ;;  %p5966_p8 = scmp.lt.s32.totalorder %s9433_s20, %s5964_s29 }
 0x34b   : > { %3451 = vrot.lane.b32.xlu1 %v8860_v63, %s6095_s10  ;;  %v3324_v63 = vpop.permute.xlu1 %3323  ;;  %p5960_p7 = scmp.ne.s32.totalorder %s9433_s20, %s5959_s7  ;;  %p5967_p2 = scmp.lt.s32.totalorder %s5965_s4, %s5959_s7 }
 0x34c   : > { %3449 = vrot.lane.b32.xlu0 %v8863_v54, %s6095_s10  ;;  %v3322_v54 = vpop.permute.xlu0 %3321  ;;  %v3578_v33 = vsel %vm880_vm4, %v8854_v52, %v3324_v63 }
 0x34d   : > { %v3577_v5 = vsel %vm880_vm4, %v8858_v38, %v3322_v54  ;;  %p5961_p11 = pnand %p5960_p7, %p10093_p10  ;;  %p5968_p0 = por %p5967_p2, %p5966_p8 }
 0x34e   : > { %s4076_s18 = sshll.u32 %s10091_s26, 6 }
 0x34f   : > { %3455 = vrot.lane.b32.xlu1 %v8884_v51, %s6095_s10  ;;  %v3328_v51 = vpop.permute.xlu1 %3327  ;;  %p5962_p12 = pneg %p5961_p11 }
 0x350   : > { %3453 = vrot.lane.b32.xlu0 %v8887_v60, %s6095_s10  ;;  %v3326_v60 = vpop.permute.xlu0 %3325 }
 0x351   : > { %v3579_v52 = vsel %vm880_vm4, %v8872_v28, %v3326_v60  ;;  %p5969_p4 = pnand %p5968_p0, %p5962_p12 }
 0x353   : > { %3459 = vrot.lane.b32.xlu1 %v8898_v8, %s6095_s10  ;;  %v3332_v8 = vpop.permute.xlu1 %3331 }
 0x354   : > { %3457 = vrot.lane.b32.xlu0 %v8900_v62, %s6095_s10  ;;  %v3330_v62 = vpop.permute.xlu0 %3329 }
 0x355   : > { %v3581_v28 = vsel %vm880_vm4, %v8882_v35, %v3330_v62 }
 0x357   : > { %3463 = vrot.lane.b32.xlu1 %v8918_v58, %s6095_s10  ;;  %v9084_v58 = vpop.permute.xlu1 %3335 }
 0x358   : > { %3461 = vrot.lane.b32.xlu0 %v8920_v23, %s6095_s10  ;;  %v9086_v23 = vpop.permute.xlu0 %3333 }
 0x359   : > { %v3583_v35 = vsel %vm880_vm4, %v8896_v17, %v9086_v23 }
 0x35b   : > { %3467 = vrot.lane.b32.xlu1 %v8930_v40, %s6095_s10  ;;  %v9090_v40 = vpop.permute.xlu1 %3339 }
 0x35c   : > { %3465 = vrot.lane.b32.xlu0 %v8932_v50, %s6095_s10  ;;  %v9093_v50 = vpop.permute.xlu0 %3337  ;;  %v3586_v17 = vsel %vm880_vm4, %v8904_v59, %v9090_v40 }
 0x35d   : > { %v3585_v23 = vsel %vm880_vm4, %v8908_v36, %v9093_v50 }
 0x35f   : > { %3471 = vrot.lane.b32.xlu1 %v8950_v12, %s6095_s10  ;;  %v9096_v12 = vpop.permute.xlu1 %3343 }
 0x360   : > { %3469 = vrot.lane.b32.xlu0 %v8952_v2, %s6095_s10  ;;  %v9098_v2 = vpop.permute.xlu0 %3341  ;;  %v3588_v40 = vsel %vm880_vm4, %v8912_v26, %v9096_v12 }
 0x363   : > { %3475 = vrot.lane.b32.xlu1 %v8962_v43, %s6095_s10  ;;  %v9100_v43 = vpop.permute.xlu1 %3347 }
 0x364   : > { %3473 = vrot.lane.b32.xlu0 %v8964_v29, %s6095_s10  ;;  %v9102_v29 = vpop.permute.xlu0 %3345 }
 0x367   : > { %3479 = vrot.lane.b32.xlu1 %v8982_v0, %s6095_s10  ;;  %v9104_v0 = vpop.permute.xlu1 %3351 }
 0x368   : > { %3477 = vrot.lane.b32.xlu0 %v8984_v34, %s6095_s10  ;;  %v9106_v34 = vpop.permute.xlu0 %3349 }
 0x36b   : > { %3483 = vrot.lane.b32.xlu1 %v8995_v7, %s6095_s10 }
 0x36c   : > { %3481 = vrot.lane.b32.xlu0 %v8998_v49, %s6095_s10 }
 0x36f   : > { %3487 = vrot.lane.b32.xlu1 %v4577_v46, %s6095_s10 }
 0x370   : > { %3485 = vrot.lane.b32.xlu0 %v3092_v37, %s6095_s10 }
 0x373   : > { %3491 = vrot.lane.b32.xlu1 %v4580_v4, %s6095_s10 }
 0x374   : > { %3489 = vrot.lane.b32.xlu0 %v3102_v45, %s6095_s10 }
 0x377   : > { %3495 = vrot.lane.b32.xlu1 %v4583_v47, %s6095_s10 }
 0x378   : > { %3493 = vrot.lane.b32.xlu0 %v3112_v30, %s6095_s10 }
 0x37b   : > { %3499 = vrot.lane.b32.xlu1 %v4586_v10, %s6095_s10 }
 0x37c   : > { %3497 = vrot.lane.b32.xlu0 %v3122_v9, %s6095_s10 }
 0x37f   : > { %3503 = vrot.lane.b32.xlu1 %v4589_v20, %s6095_s10 }
 0x380   : > { %3501 = vrot.lane.b32.xlu0 %v3132_v11, %s6095_s10  ;;  %v9143_v11 = vld [vmem:[%s9501_s3] ss:$0 sm:$0xff] }
 0x381   : > { %v9108_v7 = vpop.permute.xlu1 %3355 }
 0x382   : > { %v9110_v49 = vpop.permute.xlu0 %3353 }
 0x383   : > { %3507 = vrot.lane.b32.xlu1 %v4592_v16, %s6095_s10 }
 0x384   : > { %3505 = vrot.lane.b32.xlu0 %v3142_v42, %s6095_s10 }
 0x387   : > { %3511 = vrot.lane.b32.xlu1 %v4595_v57, %s6095_s10 }
 0x388   : > { %3509 = vrot.lane.b32.xlu0 %v3152_v44, %s6095_s10  ;;  %s4075_s10 = sshll.u32 %s6071_s21, 5 }
 0x389   : > { %v9112_v57 = vpop.permute.xlu1 %3359  ;;  %s3885_s8 = sadd.s32 %s4076_s18, %s4075_s10 }
 0x38a   : > { %v9114_v31 = vpop.permute.xlu0 %3357  ;;  %s4077_s21 = sshll.u32 %s3885_s8, 7 }
 0x38b   : > { %s9431_s14 = scalar_lea.hbm %s10092_s13, %s4077_s21 }
 0x391   : > { %v9116_v16 = vpop.permute.xlu1 %3363 }
 0x392   : > { %v9118_v46 = vpop.permute.xlu0 %3361 }
 0x399   : > { %v9120_v37 = vpop.permute.xlu1 %3367 }
 0x39a   : > { %v9122_v25 = vpop.permute.xlu0 %3365 }
 0x3a1   : > { %v9124_v20 = vpop.permute.xlu1 %3371 }
 0x3a2   : > { %v9126_v4 = vpop.permute.xlu0 %3369 }
 0x3a9   : > { %v9128_v45 = vpop.permute.xlu1 %3375 }
 0x3aa   : > { %10073 = vst [vmem:[#allocation30_spill] sm:$0xff] %v9128_v45  ;;  %v9130_v47 = vpop.permute.xlu0 %3373 }
 0x3ab   : > { %10074 = vst [vmem:[#allocation161_spill] sm:$0xff] %v9130_v47  ;;  %v3580_v47 = vsel %vm880_vm4, %v8868_v14, %v3328_v51  ;;  %v3582_v14 = vsel %vm880_vm4, %v8878_v13, %v3332_v8  ;;  %v3584_v13 = vsel %vm880_vm4, %v8892_v53, %v9084_v58 }
 0x3b1   : > { %v9132_v30 = vpop.permute.xlu1 %3379 }
 0x3b2   : > { %10075 = vst [vmem:[#allocation162_spill] sm:$0xff] %v9132_v30  ;;  %v9134_v10 = vpop.permute.xlu0 %3377 }
 0x3b3   : > { %10076 = vst [vmem:[#allocation20_spill] sm:$0xff] %v9134_v10 }
 0x3b9   : > { %v9136_v9 = vpop.permute.xlu1 %3383 }
 0x3ba   : > { %10077 = vst [vmem:[#allocation26_spill] sm:$0xff] %v9136_v9  ;;  %v9138_v15 = vpop.permute.xlu0 %3381 }
 0x3bb   : > { %10078 = vst [vmem:[#allocation134_spill] sm:$0xff] %v9138_v15 }
 0x3bd   : > { %v3452_v42 = vpop.permute.xlu1 %3451 }
 0x3be   : > { %v3610_v44 = vsel %vm913_vm5, %v3578_v33, %v3452_v42  ;;  %v3450_v30 = vpop.permute.xlu0 %3449 }
 0x3bf   : > { %v3649_v10 = vadd.f32 %v9143_v11, %v3610_v44  ;;  %v3609_v9 = vsel %vm913_vm5, %v3577_v5, %v3450_v30 }
 0x3c0   : > { %v3648_v15 = vadd.f32 %v9143_v11, %v3609_v9 }
 0x3c1   : > { %v3713_v1 = vmul.f32 0.70710677, %v3649_v10  ;;  %v3456_v45 = vpop.permute.xlu1 %3455 }
 0x3c2   : > { %v3712_v63 = vmul.f32 0.70710677, %v3648_v15  ;;  %v3612_v38 = vsel %vm913_vm5, %v3580_v47, %v3456_v45  ;;  %v3454_v54 = vpop.permute.xlu0 %3453 }
 0x3c3   : > { %5790 = verf.f32 %v3713_v1  ;;  %v3651_v33 = vadd.f32 %v9143_v11, %v3612_v38  ;;  %v3611_v42 = vsel %vm913_vm5, %v3579_v52, %v3454_v54 }
 0x3c4   : > { %5792 = verf.f32 %v3712_v63  ;;  %v3650_v30 = vadd.f32 %v9143_v11, %v3611_v42 }
 0x3c5   : > { %v3715_v51 = vmul.f32 0.70710677, %v3651_v33  ;;  %v3460_v9 = vpop.permute.xlu1 %3459 }
 0x3c6   : > { %v3714_v60 = vmul.f32 0.70710677, %v3650_v30  ;;  %v3614_v45 = vsel %vm913_vm5, %v3582_v14, %v3460_v9  ;;  %v3458_v47 = vpop.permute.xlu0 %3457  ;;  %v3681_v14 = vmul.f32 0.5, %v3649_v10  ;;  %v3682_v12 = vmul.f32 0.5, %v3650_v30 }
 0x3c7   : > { %5794 = verf.f32 %v3715_v51  ;;  %v3653_v1 = vadd.f32 %v9143_v11, %v3614_v45  ;;  %v3613_v5 = vsel %vm913_vm5, %v3581_v28, %v3458_v47  ;;  %v3680_v45 = vmul.f32 0.5, %v3648_v15 }
 0x3c8   : > { %5796 = verf.f32 %v3714_v60  ;;  %v9169_v44 = vadd.f32 %v9143_v11, %v3613_v5 }
 0x3c9   : > { %v3717_v8 = vmul.f32 0.70710677, %v3653_v1  ;;  %v3464_v52 = vpop.permute.xlu1 %3463 }
 0x3ca   : > { %v3716_v62 = vmul.f32 0.70710677, %v9169_v44  ;;  %v3616_v63 = vsel %vm913_vm5, %v3584_v13, %v3464_v52  ;;  %v3462_v38 = vpop.permute.xlu0 %3461  ;;  %v3587_v52 = vsel %vm880_vm4, %v8916_v21, %v9098_v2 }
 0x3cb   : > { %5798 = verf.f32 %v3717_v8  ;;  %v9180_v54 = vadd.f32 %v9143_v11, %v3616_v63  ;;  %v3615_v42 = vsel %vm913_vm5, %v3583_v35, %v3462_v38 }
 0x3cc   : > { %5800 = verf.f32 %v3716_v62  ;;  %v9184_v53 = vadd.f32 %v9143_v11, %v3615_v42  ;;  %v3683_v62 = vmul.f32 0.5, %v3651_v33 }
 0x3cd   : > { %v5791_v58 = vpop.eup %5790  ;;  %v3719_v51 = vmul.f32 0.70710677, %v9180_v54  ;;  %v3468_v9 = vpop.permute.xlu1 %3467 }
 0x3ce   : > { %v5793_v28 = vpop.eup %5792  ;;  %v3777_v60 = vadd.f32 1.0, %v5791_v58  ;;  %v3718_v47 = vmul.f32 0.70710677, %v9184_v53  ;;  %v3618_v5 = vsel %vm913_vm5, %v3586_v17, %v3468_v9  ;;  %v3466_v13 = vpop.permute.xlu0 %3465 }
 0x3cf   : > { %v3776_v8 = vadd.f32 1.0, %v5793_v28  ;;  %5802 = verf.f32 %v3719_v51  ;;  %v9196_v59 = vadd.f32 %v9143_v11, %v3618_v5  ;;  %v3617_v36 = vsel %vm913_vm5, %v3585_v23, %v3466_v13 }
 0x3d0   : > { %v3809_v50 = vmul.f32 %v3777_v60, %v3681_v14  ;;  %5804 = verf.f32 %v3718_v47  ;;  %v9203_v10 = vadd.f32 %v9143_v11, %v3617_v36  ;;  %v3590_v14 = vsel %vm880_vm4, %v8924_v22, %v9100_v43 }
 0x3d1   : > { %v5795_v15 = vpop.eup %5794  ;;  %v3808_v35 = vmul.f32 %v3776_v8, %v3680_v45  ;;  %v3721_v63 = vmul.f32 0.70710677, %v9196_v59  ;;  %v3472_v38 = vpop.permute.xlu1 %3471  ;;  %v3589_v28 = vsel %vm880_vm4, %v8928_v41, %v9102_v29  ;;  %v3685_v45 = vmul.f32 0.5, %v3653_v1 }
 0x3d2   : > { %v5797_v42 = vpop.eup %5796  ;;  %3841 = vst [vmem:[%s9211_s5 + $0x8] sm:$0xff] %v3809_v50  ;;  %v3779_v26 = vadd.f32 1.0, %v5795_v15  ;;  %v3720_v58 = vmul.f32 0.70710677, %v9203_v10  ;;  %v3620_v17 = vsel %vm913_vm5, %v3588_v40, %v3472_v38  ;;  %v3470_v23 = vpop.permute.xlu0 %3469  ;;  %v3684_v22 = vmul.f32 0.5, %v9169_v44 }
 0x3d3   : > { %3840 = vst [vmem:[%s9211_s5] sm:$0xff] %v3808_v35  ;;  %v3778_v21 = vadd.f32 1.0, %v5797_v42  ;;  %5806 = verf.f32 %v3721_v63  ;;  %v9218_v2 = vadd.f32 %v9143_v11, %v3620_v17  ;;  %v3619_v33 = vsel %vm913_vm5, %v3587_v52, %v3470_v23 }
 0x3d4   : > { %v3811_v51 = vmul.f32 %v3779_v26, %v3683_v62  ;;  %5808 = verf.f32 %v3720_v58  ;;  %v9225_v30 = vadd.f32 %v9143_v11, %v3619_v33  ;;  %v3592_v1 = vsel %vm880_vm4, %v8936_v19, %v9104_v0 }
 0x3d5   : > { %v5799_v9 = vpop.eup %5798  ;;  %v3810_v60 = vmul.f32 %v3778_v21, %v3682_v12  ;;  %v3723_v47 = vmul.f32 0.70710677, %v9218_v2  ;;  %v3476_v5 = vpop.permute.xlu1 %3475  ;;  %v3591_v35 = vsel %vm880_vm4, %v8940_v32, %v9106_v34  ;;  %v3687_v63 = vmul.f32 0.5, %v9180_v54 }
 0x3d6   : > { %v5801_v13 = vpop.eup %5800  ;;  %3843 = vst [vmem:[%s9211_s5 + $0x18] sm:$0xff] %v3811_v51  ;;  %v3781_v8 = vadd.f32 1.0, %v5799_v9  ;;  %v3722_v43 = vmul.f32 0.70710677, %v9225_v30  ;;  %v3622_v36 = vsel %vm913_vm5, %v3590_v14, %v3476_v5  ;;  %v3474_v40 = vpop.permute.xlu0 %3473  ;;  %v3686_v0 = vmul.f32 0.5, %v9184_v53 }
 0x3d7   : > { %3842 = vst [vmem:[%s9211_s5 + $0x10] sm:$0xff] %v3810_v60  ;;  %v3780_v50 = vadd.f32 1.0, %v5801_v13  ;;  %5810 = verf.f32 %v3723_v47  ;;  %v9237_v41 = vadd.f32 %v9143_v11, %v3622_v36  ;;  %v3621_v29 = vsel %vm913_vm5, %v3589_v28, %v3474_v40 }
 0x3d8   : > { %v3813_v15 = vmul.f32 %v3781_v8, %v3685_v45  ;;  %5812 = verf.f32 %v3722_v43  ;;  %v9244_v44 = vadd.f32 %v9143_v11, %v3621_v29  ;;  %v3594_v54 = vsel %vm880_vm4, %v8944_v6, %v9108_v7 }
 0x3d9   : > { %v5803_v52 = vpop.eup %5802  ;;  %v3812_v62 = vmul.f32 %v3780_v50, %v3684_v22  ;;  %v3725_v38 = vmul.f32 0.70710677, %v9237_v41  ;;  %v3480_v42 = vpop.permute.xlu1 %3479  ;;  %v3593_v14 = vsel %vm880_vm4, %v8948_v55, %v9110_v49  ;;  %v3689_v9 = vmul.f32 0.5, %v9196_v59 }
 0x3da   : > { %v5805_v26 = vpop.eup %5804  ;;  %3845 = vst [vmem:[%s9211_s5 + $0x28] sm:$0xff] %v3813_v15  ;;  %v3783_v19 = vadd.f32 1.0, %v5803_v52  ;;  %v3724_v12 = vmul.f32 0.70710677, %v9244_v44  ;;  %v3624_v58 = vsel %vm913_vm5, %v3592_v1, %v3480_v42  ;;  %v3478_v17 = vpop.permute.xlu0 %3477  ;;  %v3688_v7 = vmul.f32 0.5, %v9203_v10 }
 0x3db   : > { %3844 = vst [vmem:[%s9211_s5 + $0x20] sm:$0xff] %v3812_v62  ;;  %v3782_v23 = vadd.f32 1.0, %v5805_v26  ;;  %5814 = verf.f32 %v3725_v38  ;;  %v9257_v32 = vadd.f32 %v9143_v11, %v3624_v58  ;;  %v3623_v34 = vsel %vm913_vm5, %v3591_v35, %v3478_v17 }
 0x3dc   : > { %v3815_v21 = vmul.f32 %v3783_v19, %v3687_v63  ;;  %5816 = verf.f32 %v3724_v12  ;;  %v9264_v53 = vadd.f32 %v9143_v11, %v3623_v34  ;;  %v3596_v59 = vsel %vm880_vm4, %v8956_v18, %v9112_v57 }
 0x3dd   : > { %v5807_v33 = vpop.eup %5806  ;;  %v3814_v51 = vmul.f32 %v3782_v23, %v3686_v0  ;;  %v3727_v28 = vmul.f32 0.70710677, %v9257_v32  ;;  %v3484_v60 = vpop.permute.xlu1 %3483  ;;  %v3595_v36 = vsel %vm880_vm4, %v8960_v56, %v9114_v31  ;;  %v3691_v50 = vmul.f32 0.5, %v9218_v2 }
 0x3de   : > { %v5809_v45 = vpop.eup %5808  ;;  %3847 = vst [vmem:[%s9211_s5 + $0x38] sm:$0xff] %v3815_v21  ;;  %v3785_v6 = vadd.f32 1.0, %v5807_v33  ;;  %v3726_v47 = vmul.f32 0.70710677, %v9264_v53  ;;  %v3626_v5 = vsel %vm913_vm5, %v3594_v54, %v3484_v60  ;;  %v3482_v13 = vpop.permute.xlu0 %3481  ;;  %v3690_v57 = vmul.f32 0.5, %v9225_v30 }
 0x3df   : > { %3846 = vst [vmem:[%s9211_s5 + $0x30] sm:$0xff] %v3814_v51  ;;  %v3784_v8 = vadd.f32 1.0, %v5809_v45  ;;  %5818 = verf.f32 %v3727_v28  ;;  %v9277_v55 = vadd.f32 %v9143_v11, %v3626_v5  ;;  %v3625_v49 = vsel %vm913_vm5, %v3593_v14, %v3482_v13 }
 0x3e0   : > { %v3817_v22 = vmul.f32 %v3785_v6, %v3689_v9  ;;  %5820 = verf.f32 %v3726_v47  ;;  %v9284_v10 = vadd.f32 %v9143_v11, %v3625_v49  ;;  %v3598_v2 = vsel %vm880_vm4, %v8968_v24, %v9116_v16 }
 0x3e1   : > { %v5811_v43 = vpop.eup %5810  ;;  %v3816_v40 = vmul.f32 %v3784_v8, %v3688_v7  ;;  %v3729_v29 = vmul.f32 0.70710677, %v9277_v55  ;;  %v3488_v1 = vpop.permute.xlu1 %3487  ;;  %v3597_v26 = vsel %vm880_vm4, %v8972_v39, %v9118_v46  ;;  %v3693_v0 = vmul.f32 0.5, %v9237_v41 }
 0x3e2   : > { %v5813_v15 = vpop.eup %5812  ;;  %3849 = vst [vmem:[%s9211_s5 + $0x48] sm:$0xff] %v3817_v22  ;;  %v3787_v18 = vadd.f32 1.0, %v5811_v43  ;;  %v3728_v52 = vmul.f32 0.70710677, %v9284_v10  ;;  %v3628_v35 = vsel %vm913_vm5, %v3596_v59, %v3488_v1  ;;  %v3486_v62 = vpop.permute.xlu0 %3485  ;;  %v3692_v16 = vmul.f32 0.5, %v9244_v44 }
 0x3e3   : > { %3848 = vst [vmem:[%s9211_s5 + $0x40] sm:$0xff] %v3816_v40  ;;  %v3786_v63 = vadd.f32 1.0, %v5813_v15  ;;  %5822 = verf.f32 %v3729_v29  ;;  %v9297_v56 = vadd.f32 %v9143_v11, %v3628_v35  ;;  %v3627_v31 = vsel %vm913_vm5, %v3595_v36, %v3486_v62 }
 0x3e4   : > { %v3819_v38 = vmul.f32 %v3787_v18, %v3691_v50  ;;  %5824 = verf.f32 %v3728_v52  ;;  %v9304_v30 = vadd.f32 %v9143_v11, %v3627_v31  ;;  %v3600_v41 = vsel %vm880_vm4, %v8976_v48, %v9120_v37  ;;  %v10082_v31 = vld [vmem:[#allocation29_spill] sm:$0xff] }
 0x3e5   : > { %v5815_v42 = vpop.eup %5814  ;;  %v3818_v19 = vmul.f32 %v3786_v63, %v3690_v57  ;;  %v3731_v12 = vmul.f32 0.70710677, %v9297_v56  ;;  %v3492_v58 = vpop.permute.xlu1 %3491  ;;  %v3599_v51 = vsel %vm880_vm4, %v8980_v27, %v9122_v25  ;;  %v3695_v28 = vmul.f32 0.5, %v9257_v32  ;;  %v10080_v57 = vld [vmem:[#allocation135_spill] sm:$0xff]  ;;  %v10081_v63 = vld [vmem:[#allocation161_spill] sm:$0xff] }
 0x3e6   : > { %v5817_v17 = vpop.eup %5816  ;;  %3851 = vst [vmem:[%s9211_s5 + $0x58] sm:$0xff] %v3819_v38  ;;  %v3789_v24 = vadd.f32 1.0, %v5815_v42  ;;  %v3730_v23 = vmul.f32 0.70710677, %v9304_v30  ;;  %v3630_v34 = vsel %vm913_vm5, %v3598_v2, %v3492_v58  ;;  %v3490_v54 = vpop.permute.xlu0 %3489  ;;  %v3694_v37 = vmul.f32 0.5, %v9264_v53 }
 0x3e7   : > { %3850 = vst [vmem:[%s9211_s5 + $0x50] sm:$0xff] %v3818_v19  ;;  %v3788_v21 = vadd.f32 1.0, %v5817_v17  ;;  %5826 = verf.f32 %v3731_v12  ;;  %v9317_v39 = vadd.f32 %v9143_v11, %v3630_v34  ;;  %v3629_v46 = vsel %vm913_vm5, %v3597_v26, %v3490_v54  ;;  %v10083_v54 = vld [vmem:[#allocation162_spill] sm:$0xff] }
 0x3e8   : > { %v3821_v33 = vmul.f32 %v3789_v24, %v3693_v0  ;;  %5828 = verf.f32 %v3730_v23  ;;  %v9324_v44 = vadd.f32 %v9143_v11, %v3629_v46  ;;  %v3602_v32 = vsel %vm880_vm4, %v8988_v61, %v9124_v20 }
 0x3e9   : > { %v5819_v14 = vpop.eup %5818  ;;  %v3820_v9 = vmul.f32 %v3788_v21, %v3692_v16  ;;  %v3733_v60 = vmul.f32 0.70710677, %v9317_v39  ;;  %v3496_v45 = vpop.permute.xlu1 %3495  ;;  %v3601_v59 = vsel %vm880_vm4, %v8993_v3, %v9126_v4  ;;  %v3697_v43 = vmul.f32 0.5, %v9277_v55  ;;  %v10079_v55 = vld [vmem:[#allocation30_spill] sm:$0xff]  ;;  %v10084_v21 = vld [vmem:[#allocation23_spill] sm:$0xff] }
 0x3ea   : > { %v5821_v6 = vpop.eup %5820  ;;  %3853 = vst [vmem:[%s9211_s5 + $0x68] sm:$0xff] %v3821_v33  ;;  %v3791_v48 = vadd.f32 1.0, %v5819_v14  ;;  %v3732_v7 = vmul.f32 0.70710677, %v9324_v44  ;;  %v3632_v47 = vsel %vm913_vm5, %v3600_v41, %v3496_v45  ;;  %v3494_v5 = vpop.permute.xlu0 %3493  ;;  %v3696_v20 = vmul.f32 0.5, %v9284_v10  ;;  %v10085_v14 = vld [vmem:[#allocation20_spill] sm:$0xff] }
 0x3eb   : > { %3852 = vst [vmem:[%s9211_s5 + $0x60] sm:$0xff] %v3820_v9  ;;  %v3790_v13 = vadd.f32 1.0, %v5821_v6  ;;  %5830 = verf.f32 %v3733_v60  ;;  %v9337_v27 = vadd.f32 %v9143_v11, %v3632_v47  ;;  %v3631_v25 = vsel %vm913_vm5, %v3599_v51, %v3494_v5  ;;  %v10086_v51 = vld [vmem:[#allocation24_spill] sm:$0xff] }
 0x3ec   : > { %v3823_v8 = vmul.f32 %v3791_v48, %v3695_v28  ;;  %5832 = verf.f32 %v3732_v7  ;;  %v9344_v53 = vadd.f32 %v9143_v11, %v3631_v25  ;;  %v3604_v52 = vsel %vm880_vm4, %v10080_v57, %v10079_v55 }
 0x3ed   : > { %v5823_v49 = vpop.eup %5822  ;;  %v3822_v22 = vmul.f32 %v3790_v13, %v3694_v37  ;;  %v3735_v36 = vmul.f32 0.70710677, %v9337_v27  ;;  %v3500_v40 = vpop.permute.xlu1 %3499  ;;  %v3603_v2 = vsel %vm880_vm4, %v10082_v31, %v10081_v63  ;;  %v3699_v42 = vmul.f32 0.5, %v9297_v56 }
 0x3ee   : > { %v5825_v50 = vpop.eup %5824  ;;  %3855 = vst [vmem:[%s9211_s5 + $0x78] sm:$0xff] %v3823_v8  ;;  %v3793_v61 = vadd.f32 1.0, %v5823_v49  ;;  %v3734_v29 = vmul.f32 0.70710677, %v9344_v53  ;;  %v3634_v1 = vsel %vm913_vm5, %v3602_v32, %v3500_v40  ;;  %v3498_v15 = vpop.permute.xlu0 %3497  ;;  %v3698_v58 = vmul.f32 0.5, %v9304_v30  ;;  %v10087_v8 = vld [vmem:[#allocation26_spill] sm:$0xff] }
 0x3ef   : > { %3854 = vst [vmem:[%s9211_s5 + $0x70] sm:$0xff] %v3822_v22  ;;  %v3792_v18 = vadd.f32 1.0, %v5825_v50  ;;  %5834 = verf.f32 %v3735_v36  ;;  %v9357_v3 = vadd.f32 %v9143_v11, %v3634_v1  ;;  %v3633_v4 = vsel %vm913_vm5, %v3601_v59, %v3498_v15  ;;  %v10088_v49 = vld [vmem:[#allocation122_spill] sm:$0xff]  ;;  %v10090_v40 = vld [vmem:[#allocation75_spill] sm:$0xff] }
 0x3f0   : > { %v3825_v35 = vmul.f32 %v3793_v61, %v3697_v43  ;;  %5836 = verf.f32 %v3734_v29  ;;  %v9364_v10 = vadd.f32 %v9143_v11, %v3633_v4  ;;  %v3606_v46 = vsel %vm880_vm4, %v10084_v21, %v10083_v54  ;;  %v10089_v36 = vld [vmem:[#allocation134_spill] sm:$0xff] }
 0x3f1   : > { %v5827_v62 = vpop.eup %5826  ;;  %v3824_v38 = vmul.f32 %v3792_v18, %v3696_v20  ;;  %v3737_v26 = vmul.f32 0.70710677, %v9357_v3  ;;  %v3504_v19 = vpop.permute.xlu1 %3503  ;;  %v3605_v9 = vsel %vm880_vm4, %v10086_v51, %v10085_v14  ;;  %v3701_v60 = vmul.f32 0.5, %v9317_v39 }
 0x3f2   : > { %v5829_v0 = vpop.eup %5828  ;;  %3857 = vst [vmem:[%s9211_s5 + $0x88] sm:$0xff] %v3825_v35  ;;  %v3795_v12 = vadd.f32 1.0, %v5827_v62  ;;  %v3736_v17 = vmul.f32 0.70710677, %v9364_v10  ;;  %v3636_v24 = vsel %vm913_vm5, %v3604_v52, %v3504_v19  ;;  %v3502_v16 = vpop.permute.xlu0 %3501  ;;  %v3700_v7 = vmul.f32 0.5, %v9324_v44 }
 0x3f3   : > { %3856 = vst [vmem:[%s9211_s5 + $0x80] sm:$0xff] %v3824_v38  ;;  %v3794_v23 = vadd.f32 1.0, %v5829_v0  ;;  %5838 = verf.f32 %v3737_v26  ;;  %v9377_v34 = vadd.f32 %v9143_v11, %v3636_v24  ;;  %v3635_v56 = vsel %vm913_vm5, %v3603_v2, %v3502_v16 }
 0x3f4   : > { %v3827_v41 = vmul.f32 %v3795_v12, %v3699_v42  ;;  %5840 = verf.f32 %v3736_v17  ;;  %v9384_v30 = vadd.f32 %v9143_v11, %v3635_v56  ;;  %v3608_v59 = vsel %vm880_vm4, %v10088_v49, %v10087_v8 }
 0x3f5   : > { %v5831_v33 = vpop.eup %5830  ;;  %v3826_v28 = vmul.f32 %v3794_v23, %v3698_v58  ;;  %v3739_v45 = vmul.f32 0.70710677, %v9377_v34  ;;  %v3508_v6 = vpop.permute.xlu1 %3507  ;;  %v3607_v50 = vsel %vm880_vm4, %v10090_v40, %v10089_v36  ;;  %v3703_v20 = vmul.f32 0.5, %v9337_v27 }
 0x3f6   : > { %v5833_v48 = vpop.eup %5832  ;;  %3859 = vst [vmem:[%s9211_s5 + $0x98] sm:$0xff] %v3827_v41  ;;  %v3797_v37 = vadd.f32 1.0, %v5831_v33  ;;  %v3738_v47 = vmul.f32 0.70710677, %v9384_v30  ;;  %v3638_v5 = vsel %vm913_vm5, %v3606_v46, %v3508_v6  ;;  %v3506_v13 = vpop.permute.xlu0 %3505  ;;  %v3702_v4 = vmul.f32 0.5, %v9344_v53 }
 0x3f7   : > { %3858 = vst [vmem:[%s9211_s5 + $0x90] sm:$0xff] %v3826_v28  ;;  %v3796_v25 = vadd.f32 1.0, %v5833_v48  ;;  %5842 = verf.f32 %v3739_v45  ;;  %v3677_v32 = vadd.f32 %v9143_v11, %v3638_v5  ;;  %v3637_v39 = vsel %vm913_vm5, %v3605_v9, %v3506_v13 }
 0x3f8   : > { %v3829_v22 = vmul.f32 %v3797_v37, %v3701_v60  ;;  %5844 = verf.f32 %v3738_v47  ;;  %v3676_v44 = vadd.f32 %v9143_v11, %v3637_v39  ;;  %v3705_v26 = vmul.f32 0.5, %v9357_v3 }
 0x3f9   : > { %v5835_v43 = vpop.eup %5834  ;;  %v3828_v61 = vmul.f32 %v3796_v25, %v3700_v7  ;;  %v3741_v29 = vmul.f32 0.70710677, %v3677_v32  ;;  %v3512_v1 = vpop.permute.xlu1 %3511  ;;  %v3704_v12 = vmul.f32 0.5, %v9364_v10  ;;  %v3707_v23 = vmul.f32 0.5, %v9377_v34 }
 0x3fa   : > { %v5837_v15 = vpop.eup %5836  ;;  %3861 = vst [vmem:[%s9211_s5 + $0xa8] sm:$0xff] %v3829_v22  ;;  %v3799_v18 = vadd.f32 1.0, %v5835_v43  ;;  %v3740_v55 = vmul.f32 0.70710677, %v3676_v44  ;;  %v3640_v57 = vsel %vm913_vm5, %v3608_v59, %v3512_v1  ;;  %v3510_v52 = vpop.permute.xlu0 %3509  ;;  %v3706_v56 = vmul.f32 0.5, %v9384_v30 }
 0x3fb   : > { %3860 = vst [vmem:[%s9211_s5 + $0xa0] sm:$0xff] %v3828_v61  ;;  %v3798_v35 = vadd.f32 1.0, %v5837_v15  ;;  %5846 = verf.f32 %v3741_v29  ;;  %v3679_v62 = vadd.f32 %v9143_v11, %v3640_v57  ;;  %v3639_v27 = vsel %vm913_vm5, %v3607_v50, %v3510_v52 }
 0x3fc   : > { %v3831_v63 = vmul.f32 %v3799_v18, %v3703_v20  ;;  %5848 = verf.f32 %v3740_v55  ;;  %v3678_v31 = vadd.f32 %v9143_v11, %v3639_v27  ;;  %v3709_v33 = vmul.f32 0.5, %v3677_v32 }
 0x3fd   : > { %v5839_v2 = vpop.eup %5838  ;;  %v3830_v38 = vmul.f32 %v3798_v35, %v3702_v4  ;;  %v3743_v53 = vmul.f32 0.70710677, %v3679_v62  ;;  %v3708_v34 = vmul.f32 0.5, %v3676_v44  ;;  %v3711_v45 = vmul.f32 0.5, %v3679_v62 }
 0x3fe   : > { %v5841_v42 = vpop.eup %5840  ;;  %3863 = vst [vmem:[%s9211_s5 + $0xb8] sm:$0xff] %v3831_v63  ;;  %v3801_v19 = vadd.f32 1.0, %v5839_v2  ;;  %v3742_v0 = vmul.f32 0.70710677, %v3678_v31  ;;  %v3710_v48 = vmul.f32 0.5, %v3678_v31 }
 0x3ff   : > { %3862 = vst [vmem:[%s9211_s5 + $0xb0] sm:$0xff] %v3830_v38  ;;  %v3800_v58 = vadd.f32 1.0, %v5841_v42  ;;  %5850 = verf.f32 %v3743_v53 }
 0x400   : > { %v3833_v17 = vmul.f32 %v3801_v19, %v3705_v26  ;;  %5852 = verf.f32 %v3742_v0 }
 0x401   : > { %v5843_v11 = vpop.eup %5842  ;;  %v3832_v24 = vmul.f32 %v3800_v58, %v3704_v12 }
 0x402   : > { %v5845_v16 = vpop.eup %5844  ;;  %3865 = vst [vmem:[%s9211_s5 + $0xc8] sm:$0xff] %v3833_v17  ;;  %v3803_v3 = vadd.f32 1.0, %v5843_v11 }
 0x403   : > { %3864 = vst [vmem:[%s9211_s5 + $0xc0] sm:$0xff] %v3832_v24  ;;  %v3802_v54 = vadd.f32 1.0, %v5845_v16 }
 0x404   : > { %v3835_v10 = vmul.f32 %v3803_v3, %v3707_v23 }
 0x405   : > { %v5847_v21 = vpop.eup %5846  ;;  %v3834_v46 = vmul.f32 %v3802_v54, %v3706_v56 }
 0x406   : > { %v5849_v41 = vpop.eup %5848  ;;  %3867 = vst [vmem:[%s9211_s5 + $0xd8] sm:$0xff] %v3835_v10  ;;  %v3805_v14 = vadd.f32 1.0, %v5847_v21 }
 0x407   : > { %3866 = vst [vmem:[%s9211_s5 + $0xd0] sm:$0xff] %v3834_v46  ;;  %v3804_v51 = vadd.f32 1.0, %v5849_v41 }
 0x408   : > { %v3837_v9 = vmul.f32 %v3805_v14, %v3709_v33 }
 0x409   : > { %v5851_v30 = vpop.eup %5850  ;;  %v3836_v28 = vmul.f32 %v3804_v51, %v3708_v34 }
 0x40a   : > { %v5853_v60 = vpop.eup %5852  ;;  %3869 = vst [vmem:[%s9211_s5 + $0xe8] sm:$0xff] %v3837_v9  ;;  %v3807_v6 = vadd.f32 1.0, %v5851_v30 }
 0x40b   : > { %3868 = vst [vmem:[%s9211_s5 + $0xe0] sm:$0xff] %v3836_v28  ;;  %v3806_v37 = vadd.f32 1.0, %v5853_v60 }
 0x40c   : > { %v3839_v7 = vmul.f32 %v3807_v6, %v3711_v45 }
 0x40d   : > { %v3838_v47 = vmul.f32 %v3806_v37, %v3710_v48 }
 0x40e   : > { %3871 = vst [vmem:[%s9211_s5 + $0xf8] sm:$0xff] %v3839_v7 }
 0x40f   : > { %3870 = vst [vmem:[%s9211_s5 + $0xf0] sm:$0xff] %v3838_v47 }
 0x410   : > { %5972 = shalt.err (!%p5969_p4)
}
 0x411   : > { %s5973_s30 = scalar_lea.hbm %s9431_s14, 4096  ;;  %s5977_s9 = scalar_lea.hbm %s10092_s13, 16384 }
 0x412   : > { %p5974_p1 = scmp.ne.s32.totalorder %s9431_s14, %s5973_s30  ;;  %p5978_p5 = scmp.lt.u32.totalorder %s9431_s14, %s10092_s13 }
 0x413   : > { %p5979_p6 = scmp.lt.u32.totalorder %s5977_s9, %s5973_s30  ;;  %p5981_p7 = scmp.lt.u32.totalorder %s5973_s30, %s9431_s14 }
 0x414   : > { %p5975_p3 = pnand %p5974_p1, %p10093_p10 }
 0x415   : > { %p5980_p13 = por %p5979_p6, %p5978_p5 }
 0x416   : > { %p5976_p9 = pneg %p5975_p3 }
 0x417   : > { %p5982_p11 = por %p5981_p7, %p5980_p13 }
 0x419   : > { %p5983_p12 = pnand %p5982_p11, %p5976_p9 }
 0x41b   : > { %5986 = shalt.err (!%p5983_p12)
}
 0x41c   : > { %s6097_s10 = smov 128   ;;  %s6098_s18 = smov 8  }
 0x41d   : > { %4728 = dma.vmem_to_hbm [thread:$0]  (%p10093_p10), %s9433_s20, 4096, %s9431_s14, %s3873_s15, %s6097_s10, %s6097_s10, %s6098_s18  }
 0x41e PF: > { %s10094_s8 = sld [smem:[#allocation11_spill]]  ;;  %s10095_s21 = sld [smem:[#allocation19_spill]] }
 0x41f   : > { %p4734_p8 = scmp.ge.s32.totalorder %s6087_s25, 2 }
 0x424   : > { %s3903_s12 = sand.u32 1, %s10094_s8   ;;  %p10096_p2 = scmp.ne.s32.totalorder %s10095_s21, 0 }
 0x425   : > { %s3904_s22 = scalar_lea.sflag [#allocation4], %s3903_s12 }
 0x426   : > { %p4731_p0 = pnand %p4734_p8, %p10096_p2 }
 0x428   : > { %6040 = dma.done.wait (!%p4731_p0), %s3904_s22, 4096  }
 0x429   : > { %6042 = vsyncadd (!%p4731_p0), %s3904_s22, 4294963200  ;;  %s23_s25 = sadd.s32 1, %s6087_s25   ;;  %s10097_s7 = sld [smem:[#allocation18_spill]] }
 0x42a   : > { %p20_p4 = scmp.ge.s32.totalorder %s23_s25, 6   ;;  %s10098_s27 = sld [smem:[#allocation12_spill]] }
 0x42b   : > { %s10099_s20 = sld [smem:[#allocation17_spill]]  ;;  %s10100_s21 = sld [smem:[#allocation14_spill]] }
 0x42c   : > { %s10101_s23 = sld [smem:[#allocation15_spill]]  ;;  %s10102_s6 = sld [smem:[#allocation16_spill]] }
 0x42d   : > { %s10103_s15 = smov %s6051_s16  ;;  %s10104_s16 = smov %s6055_s17 }
 0x42e   : > { %s10106_s18 = smov %s6063_s19  ;;  %s10108_s22 = smov %s6083_s24 }
 0x42f   : > { %s10105_s17 = smov %s10097_s7  ;;  %22 = sbr.rel (!%p20_p4) target bundleno = 13 (0xd), region = 97 }
 0x430   : > { %s10107_s19 = smov %s10098_s27 }
 0x432   : > { %s10109_s24 = smov %s10102_s6 }
 0x436   :  { %3909 = vsyncpa [#allocation3], 1 }
 0x437   :  { %3911 = vsyncpa [#allocation3 + $0x1], 1 }
 0x438   :  { %3912 = vsyncpa [#allocation6], 1 }
 0x439   :  { %3914 = vsyncpa [#allocation6 + $0x1], 1 }
 0x43a   :  { %3915 = vsyncpa [#allocation4], 1 }
 0x43b   :  { %3917 = vsyncpa [#allocation4 + $0x1], 1 }

</bundles_post_ra>
